<compile_context>
chip_gen: v5e
topology: v5e:2x2
jax: 0.10.0
libtpu: 0.0.40
codegen_flags: <defaults>
</compile_context>

<pallas_src>
import functools

import jax
import jax.numpy as jnp
from jax import lax
from jax.experimental import pallas as pl
from jax.experimental.pallas import tpu as pltpu


# ---------------------------------------------------------------------------
# Fused 3x3 conv (stride 1, pad 1, no bias) + folded BN + activation kernel.
# Several "branches" (independent weight sets) share the same input tile.
# ---------------------------------------------------------------------------
def _fused_conv3x3_bn_act_kernel(*refs, W, TH, Cin, couts, slopes):
    # refs = (x_ref, [w_ref, scale_ref, bias_ref] * nb, [o_ref] * nb)
    #   x_ref:     (1, H+2, W+2, Cin)   whole padded image for this batch elem
    #   w_ref:     (3, 3*Cin, Cb)       weights, (dy, dx*Cin+cin, cout)
    #   scale_ref: (1, Cb)  f32         gamma / sqrt(var + eps)
    #   bias_ref:  (1, Cb)  f32         beta - mean * scale
    #   o_ref:     (1, TH, W, Cb)       output row tile
    nb = len(couts)
    x_ref = refs[0]
    w_refs = [refs[1 + 3 * b] for b in range(nb)]
    s_refs = [refs[2 + 3 * b] for b in range(nb)]
    b_refs = [refs[3 + 3 * b] for b in range(nb)]
    o_refs = [refs[1 + 3 * nb + b] for b in range(nb)]

    row0 = pl.multiple_of(pl.program_id(1) * TH, TH)

    accs = [jnp.zeros((TH * W, cb), jnp.float32) for cb in couts]
    for dy in range(3):
        # (TH+? halo) row window: rows [row0 + dy, row0 + dy + TH) of x_pad.
        slab = x_ref[0, pl.ds(row0 + dy, TH), :, :]            # (TH, W+2, Cin)
        # im2col along dx only -> deep-K matmul with K = 3*Cin.
        patch = jnp.concatenate([slab[:, dx:dx + W, :] for dx in range(3)],
                                axis=-1)                        # (TH, W, 3*Cin)
        patch = patch.reshape(TH * W, 3 * Cin)
        for b in range(nb):
            accs[b] = accs[b] + jnp.dot(patch, w_refs[b][dy],
                                        preferred_element_type=jnp.float32)

    for b in range(nb):
        y = accs[b] * s_refs[b][0] + b_refs[b][0]               # f32 epilogue
        slope = slopes[b]
        if slope == 0.0:                                        # ReLU
            y = jnp.maximum(y, 0.0)
        else:                                                   # LeakyReLU
            y = jnp.where(y > 0.0, y, slope * y)
        o_refs[b][0] = y.reshape(TH, W, couts[b]).astype(o_refs[b].dtype)


def _pick_row_tile(h, target):
    t = min(h, target)
    while h % t != 0:
        t -= 1
    return t


def fused_conv3x3_bn_act(x_nhwc, branches, *, compute_dtype=jnp.bfloat16,
                         th_target=8):
    """Run several 3x3 conv + BN-affine + activation branches on one input.

    branches: list of dicts with keys
        w (3,3,Cin,Cb) HWIO, scale (Cb,), bias (Cb,), slope (float leaky
        slope; 0.0 == ReLU), out_dtype.
    Returns one (N, H, W, Cb) array per branch.
    """
    N, H, W, Cin = x_nhwc.shape
    TH = _pick_row_tile(H, th_target)

    # 1-pixel zero halo, in the (bf16) compute dtype to halve HBM traffic.
    x_pad = jnp.pad(x_nhwc.astype(compute_dtype),
                    ((0, 0), (1, 1), (1, 1), (0, 0)))

    in_arrays = [x_pad]
    # Constant block index along the row-tile axis -> fetched once per n and
    # kept VMEM resident while the kernel slices halo row windows out of it.
    in_specs = [pl.BlockSpec((1, H + 2, W + 2, Cin), lambda n, h: (n, 0, 0, 0))]
    out_shapes, out_specs, couts, slopes = [], [], [], []
    for br in branches:
        cb = br["w"].shape[-1]
        couts.append(cb)
        slopes.append(float(br["slope"]))
        w = br["w"].astype(compute_dtype).reshape(3, 3 * Cin, cb)
        in_arrays += [w,
                      br["scale"].reshape(1, cb).astype(jnp.float32),
                      br["bias"].reshape(1, cb).astype(jnp.float32)]
        in_specs += [pl.BlockSpec((3, 3 * Cin, cb), lambda n, h: (0, 0, 0)),
                     pl.BlockSpec((1, cb), lambda n, h: (0, 0)),
                     pl.BlockSpec((1, cb), lambda n, h: (0, 0))]
        out_shapes.append(jax.ShapeDtypeStruct((N, H, W, cb), br["out_dtype"]))
        out_specs.append(pl.BlockSpec((1, TH, W, cb), lambda n, h: (n, h, 0, 0)))

    kernel = functools.partial(
        _fused_conv3x3_bn_act_kernel,
        W=W, TH=TH, Cin=Cin, couts=tuple(couts), slopes=tuple(slopes))

    outs = pl.pallas_call(
        kernel,
        out_shape=tuple(out_shapes),
        grid=(N, H // TH),
        in_specs=in_specs,
        out_specs=tuple(out_specs),
        compiler_params=pltpu.CompilerParams(
            dimension_semantics=("parallel", "parallel"),
            vmem_limit_bytes=48 * 1024 * 1024),
    )(*in_arrays)
    if not isinstance(outs, (list, tuple)):
        outs = (outs,)
    return tuple(outs)


# ---------------------------------------------------------------------------
# Parameter construction (deterministic, synthetic). BN is in eval mode and
# folded into a per-channel scale/bias.
# ---------------------------------------------------------------------------
def _make_conv_bn_params(key, cin, cout, eps=1e-5):
    kw, kg, kb, km, kv = jax.random.split(key, 5)
    w = 0.1 * jax.random.normal(kw, (3, 3, cin, cout), jnp.float32)   # HWIO
    gamma = 1.0 + 0.1 * jax.random.normal(kg, (cout,), jnp.float32)
    beta = 0.1 * jax.random.normal(kb, (cout,), jnp.float32)
    mean = 0.1 * jax.random.normal(km, (cout,), jnp.float32)
    var = 1.0 + 0.1 * jnp.abs(jax.random.normal(kv, (cout,), jnp.float32))
    scale = gamma / jnp.sqrt(var + eps)
    bias = beta - mean * scale
    return {"w": w, "scale": scale, "bias": bias}


def init_ssh_params(key, in_channel, out_channel):
    assert out_channel % 4 == 0
    ks = jax.random.split(key, 5)
    return {
        "conv3X3":   _make_conv_bn_params(ks[0], in_channel, out_channel // 2),
        "conv5X5_1": _make_conv_bn_params(ks[1], in_channel, out_channel // 4),
        "conv5X5_2": _make_conv_bn_params(ks[2], out_channel // 4, out_channel // 4),
        "conv7X7_2": _make_conv_bn_params(ks[3], out_channel // 4, out_channel // 4),
        "conv7x7_3": _make_conv_bn_params(ks[4], out_channel // 4, out_channel // 4),
    }


# ---------------------------------------------------------------------------
# SSH forward (Pallas). Input / output are NCHW to match the PyTorch module.
# ---------------------------------------------------------------------------
def ssh_forward(params, x_nchw, out_channel, *, compute_dtype=jnp.bfloat16,
                th_target=8):
    leaky = 0.1 if out_channel <= 64 else 0.0
    x = jnp.transpose(x_nchw, (0, 2, 3, 1))                  # NCHW -> NHWC

    # conv3X3 (no-relu + fused post-concat relu) and conv5X5_1 (leaky) share x.
    c3, c5_1 = fused_conv3x3_bn_act(
        x,
        [dict(**params["conv3X3"], slope=0.0, out_dtype=jnp.float32),
         dict(**params["conv5X5_1"], slope=leaky, out_dtype=compute_dtype)],
        compute_dtype=compute_dtype, th_target=th_target)

    # conv5X5_2 (no-relu + fused final relu) and conv7X7_2 (leaky) share c5_1.
    c5, c7_2 = fused_conv3x3_bn_act(
        c5_1,
        [dict(**params["conv5X5_2"], slope=0.0, out_dtype=jnp.float32),
         dict(**params["conv7X7_2"], slope=leaky, out_dtype=compute_dtype)],
        compute_dtype=compute_dtype, th_target=th_target)

    # conv7x7_3 (no-relu + fused final relu).
    (c7,) = fused_conv3x3_bn_act(
        c7_2,
        [dict(**params["conv7x7_3"], slope=0.0, out_dtype=jnp.float32)],
        compute_dtype=compute_dtype, th_target=th_target)

    out = jnp.concatenate([c3, c5, c7], axis=-1)             # channel concat
    return jnp.transpose(out, (0, 3, 1, 2))                  # NHWC -> NCHW


# ---------------------------------------------------------------------------
# Pure-JAX reference (lax.conv) mirroring the bf16 compute pipeline.
# ---------------------------------------------------------------------------
def _ref_conv_bn_act(x, p, slope, compute_dtype):
    y = lax.conv_general_dilated(
        x.astype(compute_dtype), p["w"].astype(compute_dtype),
        window_strides=(1, 1), padding=((1, 1), (1, 1)),
        dimension_numbers=("NHWC", "HWIO", "NHWC"),
        preferred_element_type=jnp.float32)
    y = y * p["scale"] + p["bias"]
    return jnp.where(y > 0.0, y, slope * y)


def ssh_forward_ref(params, x_nchw, out_channel, compute_dtype=jnp.bfloat16):
    leaky = 0.1 if out_channel <= 64 else 0.0
    x = jnp.transpose(x_nchw, (0, 2, 3, 1))
    c3 = _ref_conv_bn_act(x, params["conv3X3"], 0.0, compute_dtype)
    c5_1 = _ref_conv_bn_act(x, params["conv5X5_1"], leaky,
                            compute_dtype).astype(compute_dtype)
    c5 = _ref_conv_bn_act(c5_1, params["conv5X5_2"], 0.0, compute_dtype)
    c7_2 = _ref_conv_bn_act(c5_1, params["conv7X7_2"], leaky,
                            compute_dtype).astype(compute_dtype)
    c7 = _ref_conv_bn_act(c7_2, params["conv7x7_3"], 0.0, compute_dtype)
    out = jnp.concatenate([c3, c5, c7], axis=-1)   # per-branch relu == relu(concat)
    return jnp.transpose(out, (0, 3, 1, 2))


if __name__ == "__main__":
    key = jax.random.PRNGKey(0)
    k_x, k_p = jax.random.split(key)

    N, C_in, H, W = 2, 4, 16, 16
    out_channel = 16  # % 4 == 0; <= 64 so leaky = 0.1

    x = jax.random.normal(k_x, (N, C_in, H, W), jnp.float32)  # NCHW like PyTorch
    params = init_ssh_params(k_p, C_in, out_channel)

    fwd = jax.jit(ssh_forward, static_argnums=2)
    out = jax.block_until_ready(fwd(params, x, out_channel))

    ref = jax.block_until_ready(ssh_forward_ref(params, x, out_channel))
    assert out.shape == (N, out_channel, H, W), out.shape
    max_err = float(jnp.max(jnp.abs(out - ref)))
    assert jnp.allclose(out, ref, rtol=2e-2, atol=2e-2), max_err

    print("KERNEL_OK")
</pallas_src>

<mosaic_0001>
module attributes {stable_mosaic.version = 11 : i64} {
  func.func @_fused_conv3x3_bn_act_kernel(%arg0: i32, %arg1: i32, %arg2: memref<1x18x18x4xbf16, #tpu.memory_space<vmem>>, %arg3: memref<3x12x8xbf16, #tpu.memory_space<vmem>>, %arg4: memref<1x8xf32, #tpu.memory_space<vmem>>, %arg5: memref<1x8xf32, #tpu.memory_space<vmem>>, %arg6: memref<3x12x4xbf16, #tpu.memory_space<vmem>>, %arg7: memref<1x4xf32, #tpu.memory_space<vmem>>, %arg8: memref<1x4xf32, #tpu.memory_space<vmem>>, %arg9: memref<1x8x16x8xf32, #tpu.memory_space<vmem>>, %arg10: memref<1x8x16x4xbf16, #tpu.memory_space<vmem>>) attributes {dimension_semantics = [#tpu.dimension_semantics<parallel>, #tpu.dimension_semantics<parallel>], iteration_bounds = array<i64: 2, 2>, scalar_prefetch = 0 : i64, scratch_operands = 0 : i64, tpu.core_type = #tpu.core_type<tc>, window_params = [{transform_indices = @transform_0, window_bounds = array<i64: 1, 18, 18, 4>}, {pipeline_mode = #tpu.pipeline_mode<synchronous>, transform_indices = @transform_1, window_bounds = array<i64: 3, 12, 8>}, {pipeline_mode = #tpu.pipeline_mode<synchronous>, transform_indices = @transform_2, window_bounds = array<i64: 1, 8>}, {pipeline_mode = #tpu.pipeline_mode<synchronous>, transform_indices = @transform_3, window_bounds = array<i64: 1, 8>}, {pipeline_mode = #tpu.pipeline_mode<synchronous>, transform_indices = @transform_4, window_bounds = array<i64: 3, 12, 4>}, {pipeline_mode = #tpu.pipeline_mode<synchronous>, transform_indices = @transform_5, window_bounds = array<i64: 1, 4>}, {pipeline_mode = #tpu.pipeline_mode<synchronous>, transform_indices = @transform_6, window_bounds = array<i64: 1, 4>}, {transform_indices = @transform_7, window_bounds = array<i64: 1, 8, 16, 8>}, {transform_indices = @transform_8, window_bounds = array<i64: 1, 8, 16, 4>}]} {
    %c8_i32 = arith.constant 8 : i32
    %0 = arith.muli %arg1, %c8_i32 : i32
    %1 = tpu.assume_multiple %0, 8 : i32
    %cst = arith.constant 0.000000e+00 : f32
    %2 = vector.broadcast %cst : f32 to vector<128x8xf32>
    %cst_0 = arith.constant 0.000000e+00 : f32
    %3 = vector.broadcast %cst_0 : f32 to vector<128x4xf32>
    %c0_i32 = arith.constant 0 : i32
    %4 = arith.addi %1, %c0_i32 : i32
    %c0 = arith.constant 0 : index
    %5 = arith.index_cast %4 : i32 to index
    %c0_1 = arith.constant 0 : index
    %c0_2 = arith.constant 0 : index
    %6 = vector.load %arg2[%c0, %5, %c0_1, %c0_2] : memref<1x18x18x4xbf16, #tpu.memory_space<vmem>>, vector<1x8x18x4xbf16>
    %7 = vector.shape_cast %6 : vector<1x8x18x4xbf16> to vector<8x18x4xbf16>
    %8 = vector.extract_strided_slice %7 {offsets = [0, 0, 0], sizes = [8, 16, 4], strides = [1, 1, 1]} : vector<8x18x4xbf16> to vector<8x16x4xbf16>
    %9 = vector.extract_strided_slice %7 {offsets = [0, 1, 0], sizes = [8, 16, 4], strides = [1, 1, 1]} : vector<8x18x4xbf16> to vector<8x16x4xbf16>
    %10 = vector.extract_strided_slice %7 {offsets = [0, 2, 0], sizes = [8, 16, 4], strides = [1, 1, 1]} : vector<8x18x4xbf16> to vector<8x16x4xbf16>
    %11 = tpu.concatenate %8, %9, %10 in 2 : vector<8x16x4xbf16>, vector<8x16x4xbf16>, vector<8x16x4xbf16> -> vector<8x16x12xbf16>
    %12 = vector.shape_cast %11 : vector<8x16x12xbf16> to vector<128x12xbf16>
    %c0_3 = arith.constant 0 : index
    %c0_4 = arith.constant 0 : index
    %c0_5 = arith.constant 0 : index
    %13 = vector.load %arg3[%c0_3, %c0_4, %c0_5] : memref<3x12x8xbf16, #tpu.memory_space<vmem>>, vector<1x12x8xbf16>
    %14 = vector.shape_cast %13 : vector<1x12x8xbf16> to vector<12x8xbf16>
    %cst_6 = arith.constant dense<0.000000e+00> : vector<128x8xf32>
    %15 = tpu.matmul %12, %14, %cst_6 {dimension_numbers = #tpu.dot_dimension_numbers<[1], [0], [0], [1], [0, 0, 1, 1], [], []>} : vector<128x12xbf16>, vector<12x8xbf16>, vector<128x8xf32> -> vector<128x8xf32>
    %16 = arith.addf %2, %15 : vector<128x8xf32>
    %c0_7 = arith.constant 0 : index
    %c0_8 = arith.constant 0 : index
    %c0_9 = arith.constant 0 : index
    %17 = vector.load %arg6[%c0_7, %c0_8, %c0_9] : memref<3x12x4xbf16, #tpu.memory_space<vmem>>, vector<1x12x4xbf16>
    %18 = vector.shape_cast %17 : vector<1x12x4xbf16> to vector<12x4xbf16>
    %cst_10 = arith.constant dense<0.000000e+00> : vector<128x4xf32>
    %19 = tpu.matmul %12, %18, %cst_10 {dimension_numbers = #tpu.dot_dimension_numbers<[1], [0], [0], [1], [0, 0, 1, 1], [], []>} : vector<128x12xbf16>, vector<12x4xbf16>, vector<128x4xf32> -> vector<128x4xf32>
    %20 = arith.addf %3, %19 : vector<128x4xf32>
    %c1_i32 = arith.constant 1 : i32
    %21 = arith.addi %1, %c1_i32 : i32
    %c0_11 = arith.constant 0 : index
    %22 = arith.index_cast %21 : i32 to index
    %c0_12 = arith.constant 0 : index
    %c0_13 = arith.constant 0 : index
    %23 = vector.load %arg2[%c0_11, %22, %c0_12, %c0_13] : memref<1x18x18x4xbf16, #tpu.memory_space<vmem>>, vector<1x8x18x4xbf16>
    %24 = vector.shape_cast %23 : vector<1x8x18x4xbf16> to vector<8x18x4xbf16>
    %25 = vector.extract_strided_slice %24 {offsets = [0, 0, 0], sizes = [8, 16, 4], strides = [1, 1, 1]} : vector<8x18x4xbf16> to vector<8x16x4xbf16>
    %26 = vector.extract_strided_slice %24 {offsets = [0, 1, 0], sizes = [8, 16, 4], strides = [1, 1, 1]} : vector<8x18x4xbf16> to vector<8x16x4xbf16>
    %27 = vector.extract_strided_slice %24 {offsets = [0, 2, 0], sizes = [8, 16, 4], strides = [1, 1, 1]} : vector<8x18x4xbf16> to vector<8x16x4xbf16>
    %28 = tpu.concatenate %25, %26, %27 in 2 : vector<8x16x4xbf16>, vector<8x16x4xbf16>, vector<8x16x4xbf16> -> vector<8x16x12xbf16>
    %29 = vector.shape_cast %28 : vector<8x16x12xbf16> to vector<128x12xbf16>
    %c1 = arith.constant 1 : index
    %c0_14 = arith.constant 0 : index
    %c0_15 = arith.constant 0 : index
    %30 = vector.load %arg3[%c1, %c0_14, %c0_15] : memref<3x12x8xbf16, #tpu.memory_space<vmem>>, vector<1x12x8xbf16>
    %31 = vector.shape_cast %30 : vector<1x12x8xbf16> to vector<12x8xbf16>
    %cst_16 = arith.constant dense<0.000000e+00> : vector<128x8xf32>
    %32 = tpu.matmul %29, %31, %cst_16 {dimension_numbers = #tpu.dot_dimension_numbers<[1], [0], [0], [1], [0, 0, 1, 1], [], []>} : vector<128x12xbf16>, vector<12x8xbf16>, vector<128x8xf32> -> vector<128x8xf32>
    %33 = arith.addf %16, %32 : vector<128x8xf32>
    %c1_17 = arith.constant 1 : index
    %c0_18 = arith.constant 0 : index
    %c0_19 = arith.constant 0 : index
    %34 = vector.load %arg6[%c1_17, %c0_18, %c0_19] : memref<3x12x4xbf16, #tpu.memory_space<vmem>>, vector<1x12x4xbf16>
    %35 = vector.shape_cast %34 : vector<1x12x4xbf16> to vector<12x4xbf16>
    %cst_20 = arith.constant dense<0.000000e+00> : vector<128x4xf32>
    %36 = tpu.matmul %29, %35, %cst_20 {dimension_numbers = #tpu.dot_dimension_numbers<[1], [0], [0], [1], [0, 0, 1, 1], [], []>} : vector<128x12xbf16>, vector<12x4xbf16>, vector<128x4xf32> -> vector<128x4xf32>
    %37 = arith.addf %20, %36 : vector<128x4xf32>
    %c2_i32 = arith.constant 2 : i32
    %38 = arith.addi %1, %c2_i32 : i32
    %c0_21 = arith.constant 0 : index
    %39 = arith.index_cast %38 : i32 to index
    %c0_22 = arith.constant 0 : index
    %c0_23 = arith.constant 0 : index
    %40 = vector.load %arg2[%c0_21, %39, %c0_22, %c0_23] : memref<1x18x18x4xbf16, #tpu.memory_space<vmem>>, vector<1x8x18x4xbf16>
    %41 = vector.shape_cast %40 : vector<1x8x18x4xbf16> to vector<8x18x4xbf16>
    %42 = vector.extract_strided_slice %41 {offsets = [0, 0, 0], sizes = [8, 16, 4], strides = [1, 1, 1]} : vector<8x18x4xbf16> to vector<8x16x4xbf16>
    %43 = vector.extract_strided_slice %41 {offsets = [0, 1, 0], sizes = [8, 16, 4], strides = [1, 1, 1]} : vector<8x18x4xbf16> to vector<8x16x4xbf16>
    %44 = vector.extract_strided_slice %41 {offsets = [0, 2, 0], sizes = [8, 16, 4], strides = [1, 1, 1]} : vector<8x18x4xbf16> to vector<8x16x4xbf16>
    %45 = tpu.concatenate %42, %43, %44 in 2 : vector<8x16x4xbf16>, vector<8x16x4xbf16>, vector<8x16x4xbf16> -> vector<8x16x12xbf16>
    %46 = vector.shape_cast %45 : vector<8x16x12xbf16> to vector<128x12xbf16>
    %c2 = arith.constant 2 : index
    %c0_24 = arith.constant 0 : index
    %c0_25 = arith.constant 0 : index
    %47 = vector.load %arg3[%c2, %c0_24, %c0_25] : memref<3x12x8xbf16, #tpu.memory_space<vmem>>, vector<1x12x8xbf16>
    %48 = vector.shape_cast %47 : vector<1x12x8xbf16> to vector<12x8xbf16>
    %cst_26 = arith.constant dense<0.000000e+00> : vector<128x8xf32>
    %49 = tpu.matmul %46, %48, %cst_26 {dimension_numbers = #tpu.dot_dimension_numbers<[1], [0], [0], [1], [0, 0, 1, 1], [], []>} : vector<128x12xbf16>, vector<12x8xbf16>, vector<128x8xf32> -> vector<128x8xf32>
    %50 = arith.addf %33, %49 : vector<128x8xf32>
    %c2_27 = arith.constant 2 : index
    %c0_28 = arith.constant 0 : index
    %c0_29 = arith.constant 0 : index
    %51 = vector.load %arg6[%c2_27, %c0_28, %c0_29] : memref<3x12x4xbf16, #tpu.memory_space<vmem>>, vector<1x12x4xbf16>
    %52 = vector.shape_cast %51 : vector<1x12x4xbf16> to vector<12x4xbf16>
    %cst_30 = arith.constant dense<0.000000e+00> : vector<128x4xf32>
    %53 = tpu.matmul %46, %52, %cst_30 {dimension_numbers = #tpu.dot_dimension_numbers<[1], [0], [0], [1], [0, 0, 1, 1], [], []>} : vector<128x12xbf16>, vector<12x4xbf16>, vector<128x4xf32> -> vector<128x4xf32>
    %54 = arith.addf %37, %53 : vector<128x4xf32>
    %c0_31 = arith.constant 0 : index
    %c0_32 = arith.constant 0 : index
    %55 = vector.load %arg4[%c0_31, %c0_32] : memref<1x8xf32, #tpu.memory_space<vmem>>, vector<1x8xf32>
    %56 = vector.shape_cast %55 : vector<1x8xf32> to vector<8xf32>
    %57 = vector.shape_cast %56 : vector<8xf32> to vector<1x8xf32>
    %58 = vector.broadcast %57 : vector<1x8xf32> to vector<128x8xf32>
    %59 = arith.mulf %50, %58 : vector<128x8xf32>
    %c0_33 = arith.constant 0 : index
    %c0_34 = arith.constant 0 : index
    %60 = vector.load %arg5[%c0_33, %c0_34] : memref<1x8xf32, #tpu.memory_space<vmem>>, vector<1x8xf32>
    %61 = vector.shape_cast %60 : vector<1x8xf32> to vector<8xf32>
    %62 = vector.shape_cast %61 : vector<8xf32> to vector<1x8xf32>
    %63 = vector.broadcast %62 : vector<1x8xf32> to vector<128x8xf32>
    %64 = arith.addf %59, %63 : vector<128x8xf32>
    %cst_35 = arith.constant 0.000000e+00 : f32
    %65 = vector.broadcast %cst_35 : f32 to vector<128x8xf32>
    %66 = arith.maximumf %64, %65 : vector<128x8xf32>
    %67 = vector.shape_cast %66 : vector<128x8xf32> to vector<8x16x8xf32>
    %c0_36 = arith.constant 0 : index
    %c0_37 = arith.constant 0 : index
    %c0_38 = arith.constant 0 : index
    %c0_39 = arith.constant 0 : index
    %68 = vector.load %arg9[%c0_36, %c0_37, %c0_38, %c0_39] : memref<1x8x16x8xf32, #tpu.memory_space<vmem>>, vector<1x8x16x8xf32>
    %69 = vector.shape_cast %68 : vector<1x8x16x8xf32> to vector<8x16x8xf32>
    %70 = vector.shape_cast %67 : vector<8x16x8xf32> to vector<1x8x16x8xf32>
    tpu.vector_store %arg9[%c0_36, %c0_37, %c0_38, %c0_39], %70 {strides = array<i32>} : memref<1x8x16x8xf32, #tpu.memory_space<vmem>>, vector<1x8x16x8xf32>,
    %c0_40 = arith.constant 0 : index
    %c0_41 = arith.constant 0 : index
    %71 = vector.load %arg7[%c0_40, %c0_41] : memref<1x4xf32, #tpu.memory_space<vmem>>, vector<1x4xf32>
    %72 = vector.shape_cast %71 : vector<1x4xf32> to vector<4xf32>
    %73 = vector.shape_cast %72 : vector<4xf32> to vector<1x4xf32>
    %74 = vector.broadcast %73 : vector<1x4xf32> to vector<128x4xf32>
    %75 = arith.mulf %54, %74 : vector<128x4xf32>
    %c0_42 = arith.constant 0 : index
    %c0_43 = arith.constant 0 : index
    %76 = vector.load %arg8[%c0_42, %c0_43] : memref<1x4xf32, #tpu.memory_space<vmem>>, vector<1x4xf32>
    %77 = vector.shape_cast %76 : vector<1x4xf32> to vector<4xf32>
    %78 = vector.shape_cast %77 : vector<4xf32> to vector<1x4xf32>
    %79 = vector.broadcast %78 : vector<1x4xf32> to vector<128x4xf32>
    %80 = arith.addf %75, %79 : vector<128x4xf32>
    %cst_44 = arith.constant 0.000000e+00 : f32
    %81 = vector.broadcast %cst_44 : f32 to vector<128x4xf32>
    %82 = arith.cmpf ogt, %80, %81 : vector<128x4xf32>
    %cst_45 = arith.constant 1.000000e-01 : f32
    %83 = vector.broadcast %cst_45 : f32 to vector<128x4xf32>
    %84 = arith.mulf %83, %80 : vector<128x4xf32>
    %85 = arith.select %82, %80, %84 : vector<128x4xi1>, vector<128x4xf32>
    %86 = vector.shape_cast %85 : vector<128x4xf32> to vector<8x16x4xf32>
    %87 = arith.truncf %86 : vector<8x16x4xf32> to vector<8x16x4xbf16>
    %c0_46 = arith.constant 0 : index
    %c0_47 = arith.constant 0 : index
    %c0_48 = arith.constant 0 : index
    %c0_49 = arith.constant 0 : index
    %88 = vector.load %arg10[%c0_46, %c0_47, %c0_48, %c0_49] : memref<1x8x16x4xbf16, #tpu.memory_space<vmem>>, vector<1x8x16x4xbf16>
    %89 = vector.shape_cast %88 : vector<1x8x16x4xbf16> to vector<8x16x4xbf16>
    %90 = vector.shape_cast %87 : vector<8x16x4xbf16> to vector<1x8x16x4xbf16>
    tpu.vector_store %arg10[%c0_46, %c0_47, %c0_48, %c0_49], %90 {strides = array<i32>} : memref<1x8x16x4xbf16, #tpu.memory_space<vmem>>, vector<1x8x16x4xbf16>,
    return
  }
  func.func @transform_0(%arg0: i32, %arg1: i32) -> (i32, i32, i32, i32) {
    %c0_i32 = arith.constant 0 : i32
    %c0_i32_0 = arith.constant 0 : i32
    %c0_i32_1 = arith.constant 0 : i32
    %c0_i32_2 = arith.constant 0 : i32
    return %arg0, %c0_i32, %c0_i32_0, %c0_i32_1 : i32, i32, i32, i32
  }
  func.func @transform_1(%arg0: i32, %arg1: i32) -> (i32, i32, i32) {
    %c0_i32 = arith.constant 0 : i32
    %c0_i32_0 = arith.constant 0 : i32
    %c0_i32_1 = arith.constant 0 : i32
    %c0_i32_2 = arith.constant 0 : i32
    return %c0_i32, %c0_i32_0, %c0_i32_1 : i32, i32, i32
  }
  func.func @transform_2(%arg0: i32, %arg1: i32) -> (i32, i32) {
    %c0_i32 = arith.constant 0 : i32
    %c0_i32_0 = arith.constant 0 : i32
    %c0_i32_1 = arith.constant 0 : i32
    return %c0_i32, %c0_i32_0 : i32, i32
  }
  func.func @transform_3(%arg0: i32, %arg1: i32) -> (i32, i32) {
    %c0_i32 = arith.constant 0 : i32
    %c0_i32_0 = arith.constant 0 : i32
    %c0_i32_1 = arith.constant 0 : i32
    return %c0_i32, %c0_i32_0 : i32, i32
  }
  func.func @transform_4(%arg0: i32, %arg1: i32) -> (i32, i32, i32) {
    %c0_i32 = arith.constant 0 : i32
    %c0_i32_0 = arith.constant 0 : i32
    %c0_i32_1 = arith.constant 0 : i32
    %c0_i32_2 = arith.constant 0 : i32
    return %c0_i32, %c0_i32_0, %c0_i32_1 : i32, i32, i32
  }
  func.func @transform_5(%arg0: i32, %arg1: i32) -> (i32, i32) {
    %c0_i32 = arith.constant 0 : i32
    %c0_i32_0 = arith.constant 0 : i32
    %c0_i32_1 = arith.constant 0 : i32
    return %c0_i32, %c0_i32_0 : i32, i32
  }
  func.func @transform_6(%arg0: i32, %arg1: i32) -> (i32, i32) {
    %c0_i32 = arith.constant 0 : i32
    %c0_i32_0 = arith.constant 0 : i32
    %c0_i32_1 = arith.constant 0 : i32
    return %c0_i32, %c0_i32_0 : i32, i32
  }
  func.func @transform_7(%arg0: i32, %arg1: i32) -> (i32, i32, i32, i32) {
    %c0_i32 = arith.constant 0 : i32
    %c0_i32_0 = arith.constant 0 : i32
    %c0_i32_1 = arith.constant 0 : i32
    return %arg0, %arg1, %c0_i32, %c0_i32_0 : i32, i32, i32, i32
  }
  func.func @transform_8(%arg0: i32, %arg1: i32) -> (i32, i32, i32, i32) {
    %c0_i32 = arith.constant 0 : i32
    %c0_i32_0 = arith.constant 0 : i32
    %c0_i32_1 = arith.constant 0 : i32
    return %arg0, %arg1, %c0_i32, %c0_i32_0 : i32, i32, i32, i32
  }
}

module attributes {stable_mosaic.version = 11 : i64} {
  func.func @_fused_conv3x3_bn_act_kernel(%arg0: i32, %arg1: i32, %arg2: memref<1x18x18x4xbf16, #tpu.memory_space<vmem>>, %arg3: memref<3x12x4xbf16, #tpu.memory_space<vmem>>, %arg4: memref<1x4xf32, #tpu.memory_space<vmem>>, %arg5: memref<1x4xf32, #tpu.memory_space<vmem>>, %arg6: memref<3x12x4xbf16, #tpu.memory_space<vmem>>, %arg7: memref<1x4xf32, #tpu.memory_space<vmem>>, %arg8: memref<1x4xf32, #tpu.memory_space<vmem>>, %arg9: memref<1x8x16x4xf32, #tpu.memory_space<vmem>>, %arg10: memref<1x8x16x4xbf16, #tpu.memory_space<vmem>>) attributes {dimension_semantics = [#tpu.dimension_semantics<parallel>, #tpu.dimension_semantics<parallel>], iteration_bounds = array<i64: 2, 2>, scalar_prefetch = 0 : i64, scratch_operands = 0 : i64, tpu.core_type = #tpu.core_type<tc>, window_params = [{transform_indices = @transform_0, window_bounds = array<i64: 1, 18, 18, 4>}, {pipeline_mode = #tpu.pipeline_mode<synchronous>, transform_indices = @transform_1, window_bounds = array<i64: 3, 12, 4>}, {pipeline_mode = #tpu.pipeline_mode<synchronous>, transform_indices = @transform_2, window_bounds = array<i64: 1, 4>}, {pipeline_mode = #tpu.pipeline_mode<synchronous>, transform_indices = @transform_3, window_bounds = array<i64: 1, 4>}, {pipeline_mode = #tpu.pipeline_mode<synchronous>, transform_indices = @transform_4, window_bounds = array<i64: 3, 12, 4>}, {pipeline_mode = #tpu.pipeline_mode<synchronous>, transform_indices = @transform_5, window_bounds = array<i64: 1, 4>}, {pipeline_mode = #tpu.pipeline_mode<synchronous>, transform_indices = @transform_6, window_bounds = array<i64: 1, 4>}, {transform_indices = @transform_7, window_bounds = array<i64: 1, 8, 16, 4>}, {transform_indices = @transform_8, window_bounds = array<i64: 1, 8, 16, 4>}]} {
    %c8_i32 = arith.constant 8 : i32
    %0 = arith.muli %arg1, %c8_i32 : i32
    %1 = tpu.assume_multiple %0, 8 : i32
    %cst = arith.constant 0.000000e+00 : f32
    %2 = vector.broadcast %cst : f32 to vector<128x4xf32>
    %cst_0 = arith.constant 0.000000e+00 : f32
    %3 = vector.broadcast %cst_0 : f32 to vector<128x4xf32>
    %c0_i32 = arith.constant 0 : i32
    %4 = arith.addi %1, %c0_i32 : i32
    %c0 = arith.constant 0 : index
    %5 = arith.index_cast %4 : i32 to index
    %c0_1 = arith.constant 0 : index
    %c0_2 = arith.constant 0 : index
    %6 = vector.load %arg2[%c0, %5, %c0_1, %c0_2] : memref<1x18x18x4xbf16, #tpu.memory_space<vmem>>, vector<1x8x18x4xbf16>
    %7 = vector.shape_cast %6 : vector<1x8x18x4xbf16> to vector<8x18x4xbf16>
    %8 = vector.extract_strided_slice %7 {offsets = [0, 0, 0], sizes = [8, 16, 4], strides = [1, 1, 1]} : vector<8x18x4xbf16> to vector<8x16x4xbf16>
    %9 = vector.extract_strided_slice %7 {offsets = [0, 1, 0], sizes = [8, 16, 4], strides = [1, 1, 1]} : vector<8x18x4xbf16> to vector<8x16x4xbf16>
    %10 = vector.extract_strided_slice %7 {offsets = [0, 2, 0], sizes = [8, 16, 4], strides = [1, 1, 1]} : vector<8x18x4xbf16> to vector<8x16x4xbf16>
    %11 = tpu.concatenate %8, %9, %10 in 2 : vector<8x16x4xbf16>, vector<8x16x4xbf16>, vector<8x16x4xbf16> -> vector<8x16x12xbf16>
    %12 = vector.shape_cast %11 : vector<8x16x12xbf16> to vector<128x12xbf16>
    %c0_3 = arith.constant 0 : index
    %c0_4 = arith.constant 0 : index
    %c0_5 = arith.constant 0 : index
    %13 = vector.load %arg3[%c0_3, %c0_4, %c0_5] : memref<3x12x4xbf16, #tpu.memory_space<vmem>>, vector<1x12x4xbf16>
    %14 = vector.shape_cast %13 : vector<1x12x4xbf16> to vector<12x4xbf16>
    %cst_6 = arith.constant dense<0.000000e+00> : vector<128x4xf32>
    %15 = tpu.matmul %12, %14, %cst_6 {dimension_numbers = #tpu.dot_dimension_numbers<[1], [0], [0], [1], [0, 0, 1, 1], [], []>} : vector<128x12xbf16>, vector<12x4xbf16>, vector<128x4xf32> -> vector<128x4xf32>
    %16 = arith.addf %2, %15 : vector<128x4xf32>
    %c0_7 = arith.constant 0 : index
    %c0_8 = arith.constant 0 : index
    %c0_9 = arith.constant 0 : index
    %17 = vector.load %arg6[%c0_7, %c0_8, %c0_9] : memref<3x12x4xbf16, #tpu.memory_space<vmem>>, vector<1x12x4xbf16>
    %18 = vector.shape_cast %17 : vector<1x12x4xbf16> to vector<12x4xbf16>
    %cst_10 = arith.constant dense<0.000000e+00> : vector<128x4xf32>
    %19 = tpu.matmul %12, %18, %cst_10 {dimension_numbers = #tpu.dot_dimension_numbers<[1], [0], [0], [1], [0, 0, 1, 1], [], []>} : vector<128x12xbf16>, vector<12x4xbf16>, vector<128x4xf32> -> vector<128x4xf32>
    %20 = arith.addf %3, %19 : vector<128x4xf32>
    %c1_i32 = arith.constant 1 : i32
    %21 = arith.addi %1, %c1_i32 : i32
    %c0_11 = arith.constant 0 : index
    %22 = arith.index_cast %21 : i32 to index
    %c0_12 = arith.constant 0 : index
    %c0_13 = arith.constant 0 : index
    %23 = vector.load %arg2[%c0_11, %22, %c0_12, %c0_13] : memref<1x18x18x4xbf16, #tpu.memory_space<vmem>>, vector<1x8x18x4xbf16>
    %24 = vector.shape_cast %23 : vector<1x8x18x4xbf16> to vector<8x18x4xbf16>
    %25 = vector.extract_strided_slice %24 {offsets = [0, 0, 0], sizes = [8, 16, 4], strides = [1, 1, 1]} : vector<8x18x4xbf16> to vector<8x16x4xbf16>
    %26 = vector.extract_strided_slice %24 {offsets = [0, 1, 0], sizes = [8, 16, 4], strides = [1, 1, 1]} : vector<8x18x4xbf16> to vector<8x16x4xbf16>
    %27 = vector.extract_strided_slice %24 {offsets = [0, 2, 0], sizes = [8, 16, 4], strides = [1, 1, 1]} : vector<8x18x4xbf16> to vector<8x16x4xbf16>
    %28 = tpu.concatenate %25, %26, %27 in 2 : vector<8x16x4xbf16>, vector<8x16x4xbf16>, vector<8x16x4xbf16> -> vector<8x16x12xbf16>
    %29 = vector.shape_cast %28 : vector<8x16x12xbf16> to vector<128x12xbf16>
    %c1 = arith.constant 1 : index
    %c0_14 = arith.constant 0 : index
    %c0_15 = arith.constant 0 : index
    %30 = vector.load %arg3[%c1, %c0_14, %c0_15] : memref<3x12x4xbf16, #tpu.memory_space<vmem>>, vector<1x12x4xbf16>
    %31 = vector.shape_cast %30 : vector<1x12x4xbf16> to vector<12x4xbf16>
    %cst_16 = arith.constant dense<0.000000e+00> : vector<128x4xf32>
    %32 = tpu.matmul %29, %31, %cst_16 {dimension_numbers = #tpu.dot_dimension_numbers<[1], [0], [0], [1], [0, 0, 1, 1], [], []>} : vector<128x12xbf16>, vector<12x4xbf16>, vector<128x4xf32> -> vector<128x4xf32>
    %33 = arith.addf %16, %32 : vector<128x4xf32>
    %c1_17 = arith.constant 1 : index
    %c0_18 = arith.constant 0 : index
    %c0_19 = arith.constant 0 : index
    %34 = vector.load %arg6[%c1_17, %c0_18, %c0_19] : memref<3x12x4xbf16, #tpu.memory_space<vmem>>, vector<1x12x4xbf16>
    %35 = vector.shape_cast %34 : vector<1x12x4xbf16> to vector<12x4xbf16>
    %cst_20 = arith.constant dense<0.000000e+00> : vector<128x4xf32>
    %36 = tpu.matmul %29, %35, %cst_20 {dimension_numbers = #tpu.dot_dimension_numbers<[1], [0], [0], [1], [0, 0, 1, 1], [], []>} : vector<128x12xbf16>, vector<12x4xbf16>, vector<128x4xf32> -> vector<128x4xf32>
    %37 = arith.addf %20, %36 : vector<128x4xf32>
    %c2_i32 = arith.constant 2 : i32
    %38 = arith.addi %1, %c2_i32 : i32
    %c0_21 = arith.constant 0 : index
    %39 = arith.index_cast %38 : i32 to index
    %c0_22 = arith.constant 0 : index
    %c0_23 = arith.constant 0 : index
    %40 = vector.load %arg2[%c0_21, %39, %c0_22, %c0_23] : memref<1x18x18x4xbf16, #tpu.memory_space<vmem>>, vector<1x8x18x4xbf16>
    %41 = vector.shape_cast %40 : vector<1x8x18x4xbf16> to vector<8x18x4xbf16>
    %42 = vector.extract_strided_slice %41 {offsets = [0, 0, 0], sizes = [8, 16, 4], strides = [1, 1, 1]} : vector<8x18x4xbf16> to vector<8x16x4xbf16>
    %43 = vector.extract_strided_slice %41 {offsets = [0, 1, 0], sizes = [8, 16, 4], strides = [1, 1, 1]} : vector<8x18x4xbf16> to vector<8x16x4xbf16>
    %44 = vector.extract_strided_slice %41 {offsets = [0, 2, 0], sizes = [8, 16, 4], strides = [1, 1, 1]} : vector<8x18x4xbf16> to vector<8x16x4xbf16>
    %45 = tpu.concatenate %42, %43, %44 in 2 : vector<8x16x4xbf16>, vector<8x16x4xbf16>, vector<8x16x4xbf16> -> vector<8x16x12xbf16>
    %46 = vector.shape_cast %45 : vector<8x16x12xbf16> to vector<128x12xbf16>
    %c2 = arith.constant 2 : index
    %c0_24 = arith.constant 0 : index
    %c0_25 = arith.constant 0 : index
    %47 = vector.load %arg3[%c2, %c0_24, %c0_25] : memref<3x12x4xbf16, #tpu.memory_space<vmem>>, vector<1x12x4xbf16>
    %48 = vector.shape_cast %47 : vector<1x12x4xbf16> to vector<12x4xbf16>
    %cst_26 = arith.constant dense<0.000000e+00> : vector<128x4xf32>
    %49 = tpu.matmul %46, %48, %cst_26 {dimension_numbers = #tpu.dot_dimension_numbers<[1], [0], [0], [1], [0, 0, 1, 1], [], []>} : vector<128x12xbf16>, vector<12x4xbf16>, vector<128x4xf32> -> vector<128x4xf32>
    %50 = arith.addf %33, %49 : vector<128x4xf32>
    %c2_27 = arith.constant 2 : index
    %c0_28 = arith.constant 0 : index
    %c0_29 = arith.constant 0 : index
    %51 = vector.load %arg6[%c2_27, %c0_28, %c0_29] : memref<3x12x4xbf16, #tpu.memory_space<vmem>>, vector<1x12x4xbf16>
    %52 = vector.shape_cast %51 : vector<1x12x4xbf16> to vector<12x4xbf16>
    %cst_30 = arith.constant dense<0.000000e+00> : vector<128x4xf32>
    %53 = tpu.matmul %46, %52, %cst_30 {dimension_numbers = #tpu.dot_dimension_numbers<[1], [0], [0], [1], [0, 0, 1, 1], [], []>} : vector<128x12xbf16>, vector<12x4xbf16>, vector<128x4xf32> -> vector<128x4xf32>
    %54 = arith.addf %37, %53 : vector<128x4xf32>
    %c0_31 = arith.constant 0 : index
    %c0_32 = arith.constant 0 : index
    %55 = vector.load %arg4[%c0_31, %c0_32] : memref<1x4xf32, #tpu.memory_space<vmem>>, vector<1x4xf32>
    %56 = vector.shape_cast %55 : vector<1x4xf32> to vector<4xf32>
    %57 = vector.shape_cast %56 : vector<4xf32> to vector<1x4xf32>
    %58 = vector.broadcast %57 : vector<1x4xf32> to vector<128x4xf32>
    %59 = arith.mulf %50, %58 : vector<128x4xf32>
    %c0_33 = arith.constant 0 : index
    %c0_34 = arith.constant 0 : index
    %60 = vector.load %arg5[%c0_33, %c0_34] : memref<1x4xf32, #tpu.memory_space<vmem>>, vector<1x4xf32>
    %61 = vector.shape_cast %60 : vector<1x4xf32> to vector<4xf32>
    %62 = vector.shape_cast %61 : vector<4xf32> to vector<1x4xf32>
    %63 = vector.broadcast %62 : vector<1x4xf32> to vector<128x4xf32>
    %64 = arith.addf %59, %63 : vector<128x4xf32>
    %cst_35 = arith.constant 0.000000e+00 : f32
    %65 = vector.broadcast %cst_35 : f32 to vector<128x4xf32>
    %66 = arith.maximumf %64, %65 : vector<128x4xf32>
    %67 = vector.shape_cast %66 : vector<128x4xf32> to vector<8x16x4xf32>
    %c0_36 = arith.constant 0 : index
    %c0_37 = arith.constant 0 : index
    %c0_38 = arith.constant 0 : index
    %c0_39 = arith.constant 0 : index
    %68 = vector.load %arg9[%c0_36, %c0_37, %c0_38, %c0_39] : memref<1x8x16x4xf32, #tpu.memory_space<vmem>>, vector<1x8x16x4xf32>
    %69 = vector.shape_cast %68 : vector<1x8x16x4xf32> to vector<8x16x4xf32>
    %70 = vector.shape_cast %67 : vector<8x16x4xf32> to vector<1x8x16x4xf32>
    tpu.vector_store %arg9[%c0_36, %c0_37, %c0_38, %c0_39], %70 {strides = array<i32>} : memref<1x8x16x4xf32, #tpu.memory_space<vmem>>, vector<1x8x16x4xf32>,
    %c0_40 = arith.constant 0 : index
    %c0_41 = arith.constant 0 : index
    %71 = vector.load %arg7[%c0_40, %c0_41] : memref<1x4xf32, #tpu.memory_space<vmem>>, vector<1x4xf32>
    %72 = vector.shape_cast %71 : vector<1x4xf32> to vector<4xf32>
    %73 = vector.shape_cast %72 : vector<4xf32> to vector<1x4xf32>
    %74 = vector.broadcast %73 : vector<1x4xf32> to vector<128x4xf32>
    %75 = arith.mulf %54, %74 : vector<128x4xf32>
    %c0_42 = arith.constant 0 : index
    %c0_43 = arith.constant 0 : index
    %76 = vector.load %arg8[%c0_42, %c0_43] : memref<1x4xf32, #tpu.memory_space<vmem>>, vector<1x4xf32>
    %77 = vector.shape_cast %76 : vector<1x4xf32> to vector<4xf32>
    %78 = vector.shape_cast %77 : vector<4xf32> to vector<1x4xf32>
    %79 = vector.broadcast %78 : vector<1x4xf32> to vector<128x4xf32>
    %80 = arith.addf %75, %79 : vector<128x4xf32>
    %cst_44 = arith.constant 0.000000e+00 : f32
    %81 = vector.broadcast %cst_44 : f32 to vector<128x4xf32>
    %82 = arith.cmpf ogt, %80, %81 : vector<128x4xf32>
    %cst_45 = arith.constant 1.000000e-01 : f32
    %83 = vector.broadcast %cst_45 : f32 to vector<128x4xf32>
    %84 = arith.mulf %83, %80 : vector<128x4xf32>
    %85 = arith.select %82, %80, %84 : vector<128x4xi1>, vector<128x4xf32>
    %86 = vector.shape_cast %85 : vector<128x4xf32> to vector<8x16x4xf32>
    %87 = arith.truncf %86 : vector<8x16x4xf32> to vector<8x16x4xbf16>
    %c0_46 = arith.constant 0 : index
    %c0_47 = arith.constant 0 : index
    %c0_48 = arith.constant 0 : index
    %c0_49 = arith.constant 0 : index
    %88 = vector.load %arg10[%c0_46, %c0_47, %c0_48, %c0_49] : memref<1x8x16x4xbf16, #tpu.memory_space<vmem>>, vector<1x8x16x4xbf16>
    %89 = vector.shape_cast %88 : vector<1x8x16x4xbf16> to vector<8x16x4xbf16>
    %90 = vector.shape_cast %87 : vector<8x16x4xbf16> to vector<1x8x16x4xbf16>
    tpu.vector_store %arg10[%c0_46, %c0_47, %c0_48, %c0_49], %90 {strides = array<i32>} : memref<1x8x16x4xbf16, #tpu.memory_space<vmem>>, vector<1x8x16x4xbf16>,
    return
  }
  func.func @transform_0(%arg0: i32, %arg1: i32) -> (i32, i32, i32, i32) {
    %c0_i32 = arith.constant 0 : i32
    %c0_i32_0 = arith.constant 0 : i32
    %c0_i32_1 = arith.constant 0 : i32
    %c0_i32_2 = arith.constant 0 : i32
    return %arg0, %c0_i32, %c0_i32_0, %c0_i32_1 : i32, i32, i32, i32
  }
  func.func @transform_1(%arg0: i32, %arg1: i32) -> (i32, i32, i32) {
    %c0_i32 = arith.constant 0 : i32
    %c0_i32_0 = arith.constant 0 : i32
    %c0_i32_1 = arith.constant 0 : i32
    %c0_i32_2 = arith.constant 0 : i32
    return %c0_i32, %c0_i32_0, %c0_i32_1 : i32, i32, i32
  }
  func.func @transform_2(%arg0: i32, %arg1: i32) -> (i32, i32) {
    %c0_i32 = arith.constant 0 : i32
    %c0_i32_0 = arith.constant 0 : i32
    %c0_i32_1 = arith.constant 0 : i32
    return %c0_i32, %c0_i32_0 : i32, i32
  }
  func.func @transform_3(%arg0: i32, %arg1: i32) -> (i32, i32) {
    %c0_i32 = arith.constant 0 : i32
    %c0_i32_0 = arith.constant 0 : i32
    %c0_i32_1 = arith.constant 0 : i32
    return %c0_i32, %c0_i32_0 : i32, i32
  }
  func.func @transform_4(%arg0: i32, %arg1: i32) -> (i32, i32, i32) {
    %c0_i32 = arith.constant 0 : i32
    %c0_i32_0 = arith.constant 0 : i32
    %c0_i32_1 = arith.constant 0 : i32
    %c0_i32_2 = arith.constant 0 : i32
    return %c0_i32, %c0_i32_0, %c0_i32_1 : i32, i32, i32
  }
  func.func @transform_5(%arg0: i32, %arg1: i32) -> (i32, i32) {
    %c0_i32 = arith.constant 0 : i32
    %c0_i32_0 = arith.constant 0 : i32
    %c0_i32_1 = arith.constant 0 : i32
    return %c0_i32, %c0_i32_0 : i32, i32
  }
  func.func @transform_6(%arg0: i32, %arg1: i32) -> (i32, i32) {
    %c0_i32 = arith.constant 0 : i32
    %c0_i32_0 = arith.constant 0 : i32
    %c0_i32_1 = arith.constant 0 : i32
    return %c0_i32, %c0_i32_0 : i32, i32
  }
  func.func @transform_7(%arg0: i32, %arg1: i32) -> (i32, i32, i32, i32) {
    %c0_i32 = arith.constant 0 : i32
    %c0_i32_0 = arith.constant 0 : i32
    %c0_i32_1 = arith.constant 0 : i32
    return %arg0, %arg1, %c0_i32, %c0_i32_0 : i32, i32, i32, i32
  }
  func.func @transform_8(%arg0: i32, %arg1: i32) -> (i32, i32, i32, i32) {
    %c0_i32 = arith.constant 0 : i32
    %c0_i32_0 = arith.constant 0 : i32
    %c0_i32_1 = arith.constant 0 : i32
    return %arg0, %arg1, %c0_i32, %c0_i32_0 : i32, i32, i32, i32
  }
}

module attributes {stable_mosaic.version = 11 : i64} {
  func.func @_fused_conv3x3_bn_act_kernel(%arg0: i32, %arg1: i32, %arg2: memref<1x18x18x4xbf16, #tpu.memory_space<vmem>>, %arg3: memref<3x12x4xbf16, #tpu.memory_space<vmem>>, %arg4: memref<1x4xf32, #tpu.memory_space<vmem>>, %arg5: memref<1x4xf32, #tpu.memory_space<vmem>>, %arg6: memref<1x8x16x4xf32, #tpu.memory_space<vmem>>) attributes {dimension_semantics = [#tpu.dimension_semantics<parallel>, #tpu.dimension_semantics<parallel>], iteration_bounds = array<i64: 2, 2>, scalar_prefetch = 0 : i64, scratch_operands = 0 : i64, tpu.core_type = #tpu.core_type<tc>, window_params = [{transform_indices = @transform_0, window_bounds = array<i64: 1, 18, 18, 4>}, {pipeline_mode = #tpu.pipeline_mode<synchronous>, transform_indices = @transform_1, window_bounds = array<i64: 3, 12, 4>}, {pipeline_mode = #tpu.pipeline_mode<synchronous>, transform_indices = @transform_2, window_bounds = array<i64: 1, 4>}, {pipeline_mode = #tpu.pipeline_mode<synchronous>, transform_indices = @transform_3, window_bounds = array<i64: 1, 4>}, {transform_indices = @transform_4, window_bounds = array<i64: 1, 8, 16, 4>}]} {
    %c8_i32 = arith.constant 8 : i32
    %0 = arith.muli %arg1, %c8_i32 : i32
    %1 = tpu.assume_multiple %0, 8 : i32
    %cst = arith.constant 0.000000e+00 : f32
    %2 = vector.broadcast %cst : f32 to vector<128x4xf32>
    %c0_i32 = arith.constant 0 : i32
    %3 = arith.addi %1, %c0_i32 : i32
    %c0 = arith.constant 0 : index
    %4 = arith.index_cast %3 : i32 to index
    %c0_0 = arith.constant 0 : index
    %c0_1 = arith.constant 0 : index
    %5 = vector.load %arg2[%c0, %4, %c0_0, %c0_1] : memref<1x18x18x4xbf16, #tpu.memory_space<vmem>>, vector<1x8x18x4xbf16>
    %6 = vector.shape_cast %5 : vector<1x8x18x4xbf16> to vector<8x18x4xbf16>
    %7 = vector.extract_strided_slice %6 {offsets = [0, 0, 0], sizes = [8, 16, 4], strides = [1, 1, 1]} : vector<8x18x4xbf16> to vector<8x16x4xbf16>
    %8 = vector.extract_strided_slice %6 {offsets = [0, 1, 0], sizes = [8, 16, 4], strides = [1, 1, 1]} : vector<8x18x4xbf16> to vector<8x16x4xbf16>
    %9 = vector.extract_strided_slice %6 {offsets = [0, 2, 0], sizes = [8, 16, 4], strides = [1, 1, 1]} : vector<8x18x4xbf16> to vector<8x16x4xbf16>
    %10 = tpu.concatenate %7, %8, %9 in 2 : vector<8x16x4xbf16>, vector<8x16x4xbf16>, vector<8x16x4xbf16> -> vector<8x16x12xbf16>
    %11 = vector.shape_cast %10 : vector<8x16x12xbf16> to vector<128x12xbf16>
    %c0_2 = arith.constant 0 : index
    %c0_3 = arith.constant 0 : index
    %c0_4 = arith.constant 0 : index
    %12 = vector.load %arg3[%c0_2, %c0_3, %c0_4] : memref<3x12x4xbf16, #tpu.memory_space<vmem>>, vector<1x12x4xbf16>
    %13 = vector.shape_cast %12 : vector<1x12x4xbf16> to vector<12x4xbf16>
    %cst_5 = arith.constant dense<0.000000e+00> : vector<128x4xf32>
    %14 = tpu.matmul %11, %13, %cst_5 {dimension_numbers = #tpu.dot_dimension_numbers<[1], [0], [0], [1], [0, 0, 1, 1], [], []>} : vector<128x12xbf16>, vector<12x4xbf16>, vector<128x4xf32> -> vector<128x4xf32>
    %15 = arith.addf %2, %14 : vector<128x4xf32>
    %c1_i32 = arith.constant 1 : i32
    %16 = arith.addi %1, %c1_i32 : i32
    %c0_6 = arith.constant 0 : index
    %17 = arith.index_cast %16 : i32 to index
    %c0_7 = arith.constant 0 : index
    %c0_8 = arith.constant 0 : index
    %18 = vector.load %arg2[%c0_6, %17, %c0_7, %c0_8] : memref<1x18x18x4xbf16, #tpu.memory_space<vmem>>, vector<1x8x18x4xbf16>
    %19 = vector.shape_cast %18 : vector<1x8x18x4xbf16> to vector<8x18x4xbf16>
    %20 = vector.extract_strided_slice %19 {offsets = [0, 0, 0], sizes = [8, 16, 4], strides = [1, 1, 1]} : vector<8x18x4xbf16> to vector<8x16x4xbf16>
    %21 = vector.extract_strided_slice %19 {offsets = [0, 1, 0], sizes = [8, 16, 4], strides = [1, 1, 1]} : vector<8x18x4xbf16> to vector<8x16x4xbf16>
    %22 = vector.extract_strided_slice %19 {offsets = [0, 2, 0], sizes = [8, 16, 4], strides = [1, 1, 1]} : vector<8x18x4xbf16> to vector<8x16x4xbf16>
    %23 = tpu.concatenate %20, %21, %22 in 2 : vector<8x16x4xbf16>, vector<8x16x4xbf16>, vector<8x16x4xbf16> -> vector<8x16x12xbf16>
    %24 = vector.shape_cast %23 : vector<8x16x12xbf16> to vector<128x12xbf16>
    %c1 = arith.constant 1 : index
    %c0_9 = arith.constant 0 : index
    %c0_10 = arith.constant 0 : index
    %25 = vector.load %arg3[%c1, %c0_9, %c0_10] : memref<3x12x4xbf16, #tpu.memory_space<vmem>>, vector<1x12x4xbf16>
    %26 = vector.shape_cast %25 : vector<1x12x4xbf16> to vector<12x4xbf16>
    %cst_11 = arith.constant dense<0.000000e+00> : vector<128x4xf32>
    %27 = tpu.matmul %24, %26, %cst_11 {dimension_numbers = #tpu.dot_dimension_numbers<[1], [0], [0], [1], [0, 0, 1, 1], [], []>} : vector<128x12xbf16>, vector<12x4xbf16>, vector<128x4xf32> -> vector<128x4xf32>
    %28 = arith.addf %15, %27 : vector<128x4xf32>
    %c2_i32 = arith.constant 2 : i32
    %29 = arith.addi %1, %c2_i32 : i32
    %c0_12 = arith.constant 0 : index
    %30 = arith.index_cast %29 : i32 to index
    %c0_13 = arith.constant 0 : index
    %c0_14 = arith.constant 0 : index
    %31 = vector.load %arg2[%c0_12, %30, %c0_13, %c0_14] : memref<1x18x18x4xbf16, #tpu.memory_space<vmem>>, vector<1x8x18x4xbf16>
    %32 = vector.shape_cast %31 : vector<1x8x18x4xbf16> to vector<8x18x4xbf16>
    %33 = vector.extract_strided_slice %32 {offsets = [0, 0, 0], sizes = [8, 16, 4], strides = [1, 1, 1]} : vector<8x18x4xbf16> to vector<8x16x4xbf16>
    %34 = vector.extract_strided_slice %32 {offsets = [0, 1, 0], sizes = [8, 16, 4], strides = [1, 1, 1]} : vector<8x18x4xbf16> to vector<8x16x4xbf16>
    %35 = vector.extract_strided_slice %32 {offsets = [0, 2, 0], sizes = [8, 16, 4], strides = [1, 1, 1]} : vector<8x18x4xbf16> to vector<8x16x4xbf16>
    %36 = tpu.concatenate %33, %34, %35 in 2 : vector<8x16x4xbf16>, vector<8x16x4xbf16>, vector<8x16x4xbf16> -> vector<8x16x12xbf16>
    %37 = vector.shape_cast %36 : vector<8x16x12xbf16> to vector<128x12xbf16>
    %c2 = arith.constant 2 : index
    %c0_15 = arith.constant 0 : index
    %c0_16 = arith.constant 0 : index
    %38 = vector.load %arg3[%c2, %c0_15, %c0_16] : memref<3x12x4xbf16, #tpu.memory_space<vmem>>, vector<1x12x4xbf16>
    %39 = vector.shape_cast %38 : vector<1x12x4xbf16> to vector<12x4xbf16>
    %cst_17 = arith.constant dense<0.000000e+00> : vector<128x4xf32>
    %40 = tpu.matmul %37, %39, %cst_17 {dimension_numbers = #tpu.dot_dimension_numbers<[1], [0], [0], [1], [0, 0, 1, 1], [], []>} : vector<128x12xbf16>, vector<12x4xbf16>, vector<128x4xf32> -> vector<128x4xf32>
    %41 = arith.addf %28, %40 : vector<128x4xf32>
    %c0_18 = arith.constant 0 : index
    %c0_19 = arith.constant 0 : index
    %42 = vector.load %arg4[%c0_18, %c0_19] : memref<1x4xf32, #tpu.memory_space<vmem>>, vector<1x4xf32>
    %43 = vector.shape_cast %42 : vector<1x4xf32> to vector<4xf32>
    %44 = vector.shape_cast %43 : vector<4xf32> to vector<1x4xf32>
    %45 = vector.broadcast %44 : vector<1x4xf32> to vector<128x4xf32>
    %46 = arith.mulf %41, %45 : vector<128x4xf32>
    %c0_20 = arith.constant 0 : index
    %c0_21 = arith.constant 0 : index
    %47 = vector.load %arg5[%c0_20, %c0_21] : memref<1x4xf32, #tpu.memory_space<vmem>>, vector<1x4xf32>
    %48 = vector.shape_cast %47 : vector<1x4xf32> to vector<4xf32>
    %49 = vector.shape_cast %48 : vector<4xf32> to vector<1x4xf32>
    %50 = vector.broadcast %49 : vector<1x4xf32> to vector<128x4xf32>
    %51 = arith.addf %46, %50 : vector<128x4xf32>
    %cst_22 = arith.constant 0.000000e+00 : f32
    %52 = vector.broadcast %cst_22 : f32 to vector<128x4xf32>
    %53 = arith.maximumf %51, %52 : vector<128x4xf32>
    %54 = vector.shape_cast %53 : vector<128x4xf32> to vector<8x16x4xf32>
    %c0_23 = arith.constant 0 : index
    %c0_24 = arith.constant 0 : index
    %c0_25 = arith.constant 0 : index
    %c0_26 = arith.constant 0 : index
    %55 = vector.load %arg6[%c0_23, %c0_24, %c0_25, %c0_26] : memref<1x8x16x4xf32, #tpu.memory_space<vmem>>, vector<1x8x16x4xf32>
    %56 = vector.shape_cast %55 : vector<1x8x16x4xf32> to vector<8x16x4xf32>
    %57 = vector.shape_cast %54 : vector<8x16x4xf32> to vector<1x8x16x4xf32>
    tpu.vector_store %arg6[%c0_23, %c0_24, %c0_25, %c0_26], %57 {strides = array<i32>} : memref<1x8x16x4xf32, #tpu.memory_space<vmem>>, vector<1x8x16x4xf32>,
    return
  }
  func.func @transform_0(%arg0: i32, %arg1: i32) -> (i32, i32, i32, i32) {
    %c0_i32 = arith.constant 0 : i32
    %c0_i32_0 = arith.constant 0 : i32
    %c0_i32_1 = arith.constant 0 : i32
    %c0_i32_2 = arith.constant 0 : i32
    return %arg0, %c0_i32, %c0_i32_0, %c0_i32_1 : i32, i32, i32, i32
  }
  func.func @transform_1(%arg0: i32, %arg1: i32) -> (i32, i32, i32) {
    %c0_i32 = arith.constant 0 : i32
    %c0_i32_0 = arith.constant 0 : i32
    %c0_i32_1 = arith.constant 0 : i32
    %c0_i32_2 = arith.constant 0 : i32
    return %c0_i32, %c0_i32_0, %c0_i32_1 : i32, i32, i32
  }
  func.func @transform_2(%arg0: i32, %arg1: i32) -> (i32, i32) {
    %c0_i32 = arith.constant 0 : i32
    %c0_i32_0 = arith.constant 0 : i32
    %c0_i32_1 = arith.constant 0 : i32
    return %c0_i32, %c0_i32_0 : i32, i32
  }
  func.func @transform_3(%arg0: i32, %arg1: i32) -> (i32, i32) {
    %c0_i32 = arith.constant 0 : i32
    %c0_i32_0 = arith.constant 0 : i32
    %c0_i32_1 = arith.constant 0 : i32
    return %c0_i32, %c0_i32_0 : i32, i32
  }
  func.func @transform_4(%arg0: i32, %arg1: i32) -> (i32, i32, i32, i32) {
    %c0_i32 = arith.constant 0 : i32
    %c0_i32_0 = arith.constant 0 : i32
    %c0_i32_1 = arith.constant 0 : i32
    return %arg0, %arg1, %c0_i32, %c0_i32_0 : i32, i32, i32, i32
  }
}

</mosaic_0001>

<bundles_post_ra>
// kernel: ssh_forward.3
= control target key start
LH: loop header
LB: loop body
LE: loop exit
PB: predicated region body
PF: predicated region fallthrough
CT: control target
= control target key end

     0   :  { %s2393_s27 = smov 0   ;;  %s2395_s28 = smov 0   ;;  %s3167_s0 = inlined_call_operand.vmem [shape: bf16[2,18,18,4], index: 0, kind: input, shape index: {}]   ;;  %s3168_s1 = inlined_call_operand.vmem [shape: bf16[3,12,8], index: 1, kind: input, shape index: {}]   ;;  %s3169_s2 = inlined_call_operand.vmem [shape: f32[1,8], index: 2, kind: input, shape index: {}]   ;;  %s3170_s3 = inlined_call_operand.vmem [shape: f32[1,8], index: 3, kind: input, shape index: {}]   ;;  %s3171_s4 = inlined_call_operand.vmem [shape: bf16[3,12,4], index: 4, kind: input, shape index: {}]   ;;  %s3172_s5 = inlined_call_operand.vmem [shape: f32[1,4], index: 5, kind: input, shape index: {}]   ;;  %s3173_s6 = inlined_call_operand.vmem [shape: f32[1,4], index: 6, kind: input, shape index: {}]   ;;  %s3174_s7 = inlined_call_operand.vmem [shape: f32[2,16,16,8], index: 7, kind: output, shape index: {0}]   ;;  %s3175_s8 = inlined_call_operand.vmem [shape: bf16[2,16,16,4], index: 8, kind: output, shape index: {1}]  }
   0x1   :  { %s2397_s29 = smov 0   ;;  %s2399_s30 = smov 0  }
   0x2   :  { %s2401_s9 = smov 0  }
   0x3 LB: > { %s28_s10 = sadd.s32 1, %s2336_s29  ;;  %s31_s11 = sadd.s32 1, %s2340_s30  ;;  %s2344_s9 = sphi %s2401_s9, %s19_s9   ;;  %s2340_s30 = sphi %s2399_s30, %s3179_s30   ;;  %s2336_s29 = sphi %s2397_s29, %s3178_s29   ;;  %s2332_s28 = sphi %s2395_s28, %s3177_s28   ;;  %s2328_s27 = sphi %s2393_s27, %s3176_s27  }
   0x4   : > { %p29_p0 = scmp.ge.s32.totalorder %s28_s10, 2  ;;  %p1983_p1 = scmp.ge.s32.totalorder %s2344_s9, 1 }
   0x5   : > { %p281_p2 = scmp.lt.s32.totalorder %s2344_s9, 5 }
   0x6   : > { %s3181_s10 = smov (%p29_p0, %s28_s10), 0  ;;  %s3183_s11 = smov (!%p29_p0, %s31_s11), %s2340_s30 }
   0x7   : > { %p282_p3 = pnand %p1983_p1, %p281_p2  ;;  %p33_p4 = scmp.ge.s32.totalorder %s3183_s11, 2 }
   0x8   : > { %p330_p5 = scmp.lt.s32.totalorder (!%p282_p3), %s2332_s28, 1  ;;  %s2226_s12 = smul.u32 (!%p282_p3), 96, %s2328_s27 }
   0x9   : > { %s3185_s11 = smov (%p33_p4, %s3183_s11), 0  ;;  %285 = sbr.rel (%p282_p3) target bundleno = 499 (0x1f3), region = 48 }
   0xa   : > { %s2346_s18 = smov (!%p282_p3), 8   ;;  %s2347_s19 = smov (!%p282_p3), 4  }
   0xe   : > { %s3187_s28 = smov (!%p330_p5, %s2332_s28), 1  ;;  %vm563_vm0 = vcmask 1046528   ;;  %vm450_vm1 = vsmask.f32 7424  ;;  %vm943_vm2 = vcmask 1045504   ;;  %vm604_vm3 = vcmask 31744  }
   0xf   : > { %s2259_s13 = smul.u32 216, %s3187_s28  ;;  %vm621_vm4 = vcmask 64512   ;;  %vm926_vm5 = vcmask 97280   ;;  %vm1806_vm7 = vcmask 27648  }
  0x11   : > { %s334_s16 = scalar_lea.vmem %s3167_s0, %s2259_s13 }
  0x12   : > { %s2432_s17 = scalar_lea.vmem %s334_s16, %s2226_s12 }
  0x13   : > { %v2435_v0 = vld [vmem:[%s2432_s17 + $0x30] sm:$0xff]  ;;  %v376_v1 = vld [vmem:[%s2432_s17 + $0x38] sm:$0x1]  ;;  %v2439_v2 = vld [vmem:[%s2432_s17 + $0x3c] sm:$0xff] }
  0x14   : > { %v438_v3 = vunpack.c.l.b16 %v376_v1  ;;  %v2044_v4 = vld [vmem:[%s2432_s17 + $0x44] sm:$0x1]  ;;  %v500_v5 = vshrl.u32 %v2435_v0, 16  ;;  %v502_v6 = vshll.u32 %v2435_v0, 16  ;;  %v364_v8 = vld [vmem:[%s2432_s17 + $0x8] sm:$0x1] }
  0x15   : > { %v722_v7 = vunpack.c.l.b16 %v2044_v4  ;;  %v576_v10 = vrot.slane %v2435_v0, 1  ;;  %v785_v11 = vshll.u32 %v2439_v2, 16  ;;  %v2032_v12 = vld [vmem:[%s2432_s17 + $0x14] sm:$0x1]  ;;  %v2449_v15 = vld [vmem:[%s2432_s17] sm:$0xff]  ;;  %v434_v18 = vunpack.c.l.b16 %v364_v8  ;;  %v2454_v26 = vld [vmem:[%s2432_s17 + $0xc] sm:$0xff] }
  0x16   : > { %v446_v9 = vpack.c.b16 %v438_v3, %v438_v3  ;;  %v504_v13 = vrot.slane %v502_v6, 1  ;;  %v783_v20 = vshrl.u32 %v2439_v2, 16  ;;  %v718_v22 = vunpack.c.l.b16 %v2032_v12  ;;  %v2047_v41 = vld [vmem:[%s2432_s17 + $0x50] sm:$0x1]  ;;  %v379_v43 = vld [vmem:[%s2432_s17 + $0x44] sm:$0x1] }
  0x17   : > { %v730_v14 = vpack.c.b16 %v722_v7, %v722_v7  ;;  %v787_v21 = vrot.slane %v785_v11, 1  ;;  %v442_v27 = vpack.c.b16 %v434_v18, %v434_v18  ;;  %v564_v28 = vrot.slane %v2449_v15, 1  ;;  %v2472_v50 = vld [vmem:[%s2432_s17 + $0x48] sm:$0xff]  ;;  %v2480_v61 = vld [vmem:[%s2432_s17 + $0x3c] sm:$0xff]  ;;  %v367_v63 = vld [vmem:[%s2432_s17 + $0x14] sm:$0x1] }
  0x18   : > { %v577_v16 = vrot.slane %v446_v9, 1  ;;  %v507_v17 = vshll.u32 %v446_v9, 16  ;;  %v505_v19 = vor.u32 %v504_v13, %v500_v5  ;;  %v858_v30 = vrot.slane %v2439_v2, 1  ;;  %v382_v18 = vld [vmem:[%s2432_s17 + $0x50] sm:$0x1] }
  0x19   : > { %v790_v25 = vshll.u32 %v730_v14, 16  ;;  %v859_v31 = vrot.slane %v730_v14, 1  ;;  %v565_v32 = vrot.slane %v442_v27, 1  ;;  %v726_v33 = vpack.c.b16 %v718_v22, %v718_v22 }
  0x1a   : > { %v578_v23 = vsel %vm563_vm0, %v576_v10, %v577_v16  ;;  %v509_v24 = vrot.slane %v507_v17, 1  ;;  %v788_v34 = vor.u32 %v787_v21, %v783_v20  ;;  %v737_v37 = vshll.u32 %v2454_v26, 16  ;;  %v2490_v10 = vld [vmem:[%s2432_s17 + $0xc] sm:$0xff]  ;;  %v2035_v17 = vld [vmem:[%s2432_s17 + $0x20] sm:$0x1] }
  0x1b   : > { %596 = vrot.lane.b32.xlu1 %v578_v23, %s2346_s18  ;;  %v792_v35 = vrot.slane %v790_v25, 1  ;;  %v566_v36 = vsel %vm563_vm0, %v564_v28, %v565_v32  ;;  %v452_v38 = vshrl.u32 %v2449_v15, 16  ;;  %v454_v39 = vshll.u32 %v2449_v15, 16 }
  0x1c   : > { %v510_v29 = vsel %vm450_vm1, %v505_v19, %v509_v24  ;;  %588 = vrot.lane.b32.xlu2 %v566_v36, %s2346_s18  ;;  %v459_v40 = vshll.u32 %v442_v27, 16  ;;  %v860_v42 = vsel %vm563_vm0, %v858_v30, %v859_v31  ;;  %v735_v44 = vshrl.u32 %v2454_v26, 16  ;;  %v2499_v24 = vld [vmem:[%s2432_s17 + $0x18] sm:$0xff] }
  0x1d   : > { %555 = vrot.lane.b32.xlu0 %v510_v29, %s2347_s19  ;;  %v456_v45 = vrot.slane %v454_v39, 1  ;;  %v793_v47 = vsel %vm450_vm1, %v788_v34, %v792_v35  ;;  %v739_v48 = vrot.slane %v737_v37, 1  ;;  %v742_v49 = vshll.u32 %v726_v33, 16  ;;  %v2504_v29 = vld [vmem:[%s2432_s17 + $0x48] sm:$0xff] }
  0x1e   : > { %v461_v46 = vrot.slane %v459_v40, 1  ;;  %v723_v51 = vunpack.c.l.b16 %v2047_v41  ;;  %v439_v52 = vunpack.c.l.b16 %v379_v43  ;;  %v846_v54 = vrot.slane %v2454_v26, 1  ;;  %v2050_v43 = vld [vmem:[%s2432_s17 + $0x5c] sm:$0x1] }
  0x1f   : > { %v457_v53 = vor.u32 %v456_v45, %v452_v38  ;;  %v847_v55 = vrot.slane %v726_v33, 1  ;;  %v740_v57 = vor.u32 %v739_v48, %v735_v44  ;;  %v744_v58 = vrot.slane %v742_v49, 1 }
  0x20   : > { %v731_v59 = vpack.c.b16 %v723_v51, %v723_v51  ;;  %v797_v60 = vshll.u32 %v2472_v50, 16  ;;  %v447_v62 = vpack.c.b16 %v439_v52, %v439_v52  ;;  %v795_v3 = vshrl.u32 %v2472_v50, 16  ;;  %v2521_v51 = vld [vmem:[%s2432_s17 + $0x54] sm:$0xff] }
  0x21   : > { %v462_v56 = vsel %vm450_vm1, %v457_v53, %v461_v46  ;;  %v848_v1 = vsel %vm563_vm0, %v846_v54, %v847_v55  ;;  %v512_v4 = vshrl.u32 %v2480_v61, 16  ;;  %v514_v5 = vshll.u32 %v2480_v61, 16 }
  0x22   : > { %v519_v6 = vshll.u32 %v447_v62, 16  ;;  %v745_v7 = vsel %vm450_vm1, %v740_v57, %v744_v58  ;;  %v799_v8 = vrot.slane %v797_v60, 1  ;;  %v802_v9 = vshll.u32 %v731_v59, 16 }
  0x23   : > { %878 = vrot.lane.b32.xlu1 %v860_v42, %s2346_s18  ;;  %v435_v11 = vunpack.c.l.b16 %v367_v63  ;;  %v516_v12 = vrot.slane %v514_v5, 1  ;;  %v579_v14 = vrot.slane %v2480_v61, 1  ;;  %v580_v16 = vrot.slane %v447_v62, 1 }
  0x24   : > { %547 = vrot.lane.b32.xlu2 %v462_v56, %s2347_s19  ;;  %v521_v13 = vrot.slane %v519_v6, 1  ;;  %v800_v20 = vor.u32 %v799_v8, %v795_v3  ;;  %v804_v21 = vrot.slane %v802_v9, 1  ;;  %v466_v23 = vshll.u32 %v2490_v10, 16  ;;  %v370_v3 = vld [vmem:[%s2432_s17 + $0x20] sm:$0x1] }
  0x25   : > { %838 = vrot.lane.b32.xlu0 %v793_v47, %s2347_s19  ;;  %v517_v19 = vor.u32 %v516_v12, %v512_v4  ;;  %v443_v22 = vpack.c.b16 %v435_v11, %v435_v11  ;;  %v719_v25 = vunpack.c.l.b16 %v2035_v17  ;;  %v581_v28 = vsel %vm563_vm0, %v579_v14, %v580_v16  ;;  %v2038_v4 = vld [vmem:[%s2432_s17 + $0x2c] sm:$0x1]  ;;  %v2537_v12 = vld [vmem:[%s2432_s17 + $0x18] sm:$0xff]  ;;  %v2541_v16 = vld [vmem:[%s2432_s17 + $0x24] sm:$0xff] }
  0x26   : > { %v440_v30 = vunpack.c.l.b16 %v382_v18  ;;  %v861_v31 = vrot.slane %v2472_v50, 1  ;;  %v862_v32 = vrot.slane %v731_v59, 1  ;;  %v749_v33 = vshll.u32 %v2499_v24, 16 }
  0x27   : > { %v522_v27 = vsel %vm450_vm1, %v517_v19, %v521_v13  ;;  %v805_v34 = vsel %vm450_vm1, %v800_v20, %v804_v21  ;;  %v464_v35 = vshrl.u32 %v2490_v10, 16  ;;  %v468_v36 = vrot.slane %v466_v23, 1 }
  0x28   : > { %v471_v37 = vshll.u32 %v443_v22, 16  ;;  %v727_v38 = vpack.c.b16 %v719_v25, %v719_v25  ;;  %v567_v39 = vrot.slane %v2490_v10, 1  ;;  %v568_v40 = vrot.slane %v443_v22, 1 }
  0x29   : > { %v2513_v41 = vpack.c.b16 %v440_v30, %v440_v30  ;;  %v526_v42 = vshll.u32 %v2504_v29, 16  ;;  %v863_v44 = vsel %vm563_vm0, %v861_v31, %v862_v32  ;;  %v747_v45 = vshrl.u32 %v2499_v24, 16  ;;  %v2053_v30 = vld [vmem:[%s2432_s17 + $0x68] sm:$0x1] }
  0x2a   : > { %v751_v46 = vrot.slane %v749_v33, 1  ;;  %v754_v47 = vshll.u32 %v727_v38, 16  ;;  %v469_v48 = vor.u32 %v468_v36, %v464_v35  ;;  %v473_v49 = vrot.slane %v471_v37, 1 }
  0x2b   : > { %870 = vrot.lane.b32.xlu1 %v848_v1, %s2346_s18  ;;  %v724_v52 = vunpack.c.l.b16 %v2050_v43  ;;  %v569_v53 = vsel %vm563_vm0, %v567_v39, %v568_v40  ;;  %v524_v54 = vshrl.u32 %v2504_v29, 16  ;;  %v528_v55 = vrot.slane %v526_v42, 1  ;;  %v2559_v43 = vld [vmem:[%s2432_s17 + $0x60] sm:$0xff] }
  0x2c   : > { %557 = vrot.lane.b32.xlu2 %v522_v27, %s2347_s19  ;;  %v531_v56 = vshll.u32 %v2513_v41, 16  ;;  %v752_v57 = vor.u32 %v751_v46, %v747_v45  ;;  %v756_v58 = vrot.slane %v754_v47, 1  ;;  %v809_v59 = vshll.u32 %v2521_v51, 16 }
  0x2d   : > { %830 = vrot.lane.b32.xlu0 %v745_v7, %s2347_s19  ;;  %v474_v60 = vsel %vm450_vm1, %v469_v48, %v473_v49  ;;  %v732_v62 = vpack.c.b16 %v724_v52, %v724_v52  ;;  %v529_v63 = vor.u32 %v528_v55, %v524_v54  ;;  %v807_v6 = vshrl.u32 %v2521_v51, 16  ;;  %v2564_v48 = vld [vmem:[%s2432_s17 + $0x54] sm:$0xff]  ;;  %v373_v55 = vld [vmem:[%s2432_s17 + $0x2c] sm:$0x1] }
  0x2e   : > { %v533_v1 = vrot.slane %v531_v56, 1  ;;  %v757_v5 = vsel %vm450_vm1, %v752_v57, %v756_v58  ;;  %v811_v7 = vrot.slane %v809_v59, 1  ;;  %v849_v9 = vrot.slane %v2499_v24, 1 }
  0x2f   : > { %v814_v8 = vshll.u32 %v732_v62, 16  ;;  %v850_v11 = vrot.slane %v727_v38, 1  ;;  %v436_v13 = vunpack.c.l.b16 %v370_v3  ;;  %v720_v17 = vunpack.c.l.b16 %v2038_v4  ;;  %v385_v38 = vld [vmem:[%s2432_s17 + $0x5c] sm:$0x1]  ;;  %v2579_v4 = vld [vmem:[%s2432_s17 + $0x24] sm:$0xff] }
  0x30   : > { %v534_v14 = vsel %vm450_vm1, %v529_v63, %v533_v1  ;;  %v812_v18 = vor.u32 %v811_v7, %v807_v6  ;;  %v478_v20 = vshll.u32 %v2537_v12, 16  ;;  %v864_v23 = vrot.slane %v2521_v51, 1 }
  0x31   : > { %v816_v19 = vrot.slane %v814_v8, 1  ;;  %v851_v21 = vsel %vm563_vm0, %v849_v9, %v850_v11  ;;  %v444_v22 = vpack.c.b16 %v436_v13, %v436_v13  ;;  %v865_v25 = vrot.slane %v732_v62, 1 }
  0x32   : > { %v728_v27 = vpack.c.b16 %v720_v17, %v720_v17  ;;  %v476_v32 = vshrl.u32 %v2537_v12, 16  ;;  %v480_v33 = vrot.slane %v478_v20, 1  ;;  %v582_v35 = vrot.slane %v2504_v29, 1 }
  0x33   : > { %598 = vrot.lane.b32.xlu1 %v581_v28, %s2346_s18  ;;  %v761_v28 = vshll.u32 %v2541_v16, 16  ;;  %v817_v31 = vsel %vm450_vm1, %v812_v18, %v816_v19  ;;  %v583_v36 = vrot.slane %v2513_v41, 1  ;;  %v759_v37 = vshrl.u32 %v2541_v16, 16 }
  0x34   : > { %880 = vrot.lane.b32.xlu2 %v863_v44, %s2346_s18  ;;  %v866_v39 = vsel %vm563_vm0, %v864_v23, %v865_v25  ;;  %v766_v42 = vshll.u32 %v728_v27, 16  ;;  %v725_v44 = vunpack.c.l.b16 %v2053_v30  ;;  %v481_v45 = vor.u32 %v480_v33, %v476_v32  ;;  %v2041_v23 = vld [vmem:[%s2432_s17 + $0x38] sm:$0x1] }
  0x35   : > { %840 = vrot.lane.b32.xlu0 %v805_v34, %s2347_s19  ;;  %v483_v34 = vshll.u32 %v444_v22, 16  ;;  %v763_v40 = vrot.slane %v761_v28, 1  ;;  %v584_v47 = vsel %vm563_vm0, %v582_v35, %v583_v36  ;;  %v441_v41 = vunpack.c.l.b16 %v385_v38  ;;  %v2142_v38 = vld [vmem:[%s2432_s17 + $0x20] sm:$0x1] }
  0x36   : > { %v768_v52 = vrot.slane %v766_v42, 1  ;;  %v821_v54 = vshll.u32 %v2559_v43, 16  ;;  %v570_v57 = vrot.slane %v2537_v12, 1  ;;  %v571_v58 = vrot.slane %v444_v22, 1 }
  0x37   : > { %v485_v46 = vrot.slane %v483_v34, 1  ;;  %v764_v49 = vor.u32 %v763_v40, %v759_v37  ;;  %v449_v59 = vpack.c.b16 %v441_v41, %v441_v41  ;;  %v819_v62 = vshrl.u32 %v2559_v43, 16  ;;  %v2596_v34 = vld [vmem:[%s2432_s17 + $0x30] sm:$0xff]  ;;  %v2145_v40 = vld [vmem:[%s2432_s17 + $0x2c] sm:$0x1] }
  0x38   : > { %v823_v1 = vrot.slane %v821_v54, 1  ;;  %v852_v6 = vrot.slane %v2541_v16, 1  ;;  %v853_v7 = vrot.slane %v728_v27, 1  ;;  %v572_v8 = vsel %vm563_vm0, %v570_v57, %v571_v58 }
  0x39   : > { %v486_v56 = vsel %vm450_vm1, %v481_v45, %v485_v46  ;;  %v769_v63 = vsel %vm450_vm1, %v764_v49, %v768_v52  ;;  %v536_v9 = vshrl.u32 %v2564_v48, 16  ;;  %v543_v13 = vshll.u32 %v449_v59, 16  ;;  %v2612_v52 = vld [vmem:[%s2432_s17 + $0x24] sm:$0xff] }
  0x3a   : > { %v490_v19 = vshll.u32 %v2579_v4, 16  ;;  %v854_v20 = vsel %vm563_vm0, %v852_v6, %v853_v7  ;;  %v488_v27 = vshrl.u32 %v2579_v4, 16  ;;  %v586_v32 = vrot.slane %v449_v59, 1 }
  0x3b   : > { %590 = vrot.lane.b32.xlu1 %v569_v53, %s2346_s18  ;;  %v2567_v53 = vpack.c.b16 %v725_v44, %v725_v44  ;;  %v545_v22 = vrot.slane %v543_v13, 1  ;;  %v721_v35 = vunpack.c.l.b16 %v2041_v23  ;;  %v867_v42 = vrot.slane %v2559_v43, 1  ;;  %v2102_v23 = vld [vmem:[%s3168_s1] sm:$0xf] }
  0x3c   : > { %832 = vrot.lane.b32.xlu2 %v757_v5, %s2347_s19  ;;  %v437_v5 = vunpack.c.l.b16 %v373_v55  ;;  %v492_v28 = vrot.slane %v490_v19, 1  ;;  %v773_v46 = vshll.u32 %v2596_v34, 16  ;;  %v1262_v41 = vunpack.c.l.b16 %v2142_v38 }
  0x3d   : > { %549 = vrot.lane.b32.xlu0 %v474_v60, %s2347_s19  ;;  %v538_v60 = vshll.u32 %v2564_v48, 16  ;;  %v826_v3 = vshll.u32 %v2567_v53, 16  ;;  %v868_v44 = vrot.slane %v2567_v53, 1  ;;  %v729_v45 = vpack.c.b16 %v721_v35, %v721_v35 }
  0x3e   : > { %v445_v18 = vpack.c.b16 %v437_v5, %v437_v5  ;;  %v493_v36 = vor.u32 %v492_v28, %v488_v27  ;;  %v1263_v54 = vunpack.c.l.b16 %v2145_v40  ;;  %v573_v55 = vrot.slane %v2579_v4, 1  ;;  %v2148_v27 = vld [vmem:[%s2432_s17 + $0x38] sm:$0x1] }
  0x3f   : > { %v540_v11 = vrot.slane %v538_v60, 1  ;;  %v828_v17 = vrot.slane %v826_v3, 1  ;;  %v869_v53 = vsel %vm563_vm0, %v867_v42, %v868_v44  ;;  %v771_v58 = vshrl.u32 %v2596_v34, 16 }
  0x40   : > { %v495_v30 = vshll.u32 %v445_v18, 16  ;;  %v775_v59 = vrot.slane %v773_v46, 1  ;;  %v778_v60 = vshll.u32 %v729_v45, 16  ;;  %v1271_v3 = vpack.c.b16 %v1263_v54, %v1263_v54  ;;  %v2245_v54 = vld [vmem:[%s3168_s1 + $0x8] sm:$0x30] }
  0x41   : > { %v1293_v5 = vshll.u32 %v2612_v52, 16 }
  0x42   : > { %v497_v37 = vrot.slane %v495_v30, 1  ;;  %v780_v13 = vrot.slane %v778_v60, 1  ;;  %v1298_v19 = vshll.u32 %v1271_v3, 16  ;;  %v2637_v30 = vld [vmem:[%s2432_s17 + $0x30] sm:$0xff] }
  0x43   : > { %559 = vrot.lane.b32.xlu1 %v534_v14, %s2347_s19  ;;  %v824_v14 = vor.u32 %v823_v1, %v819_v62  ;;  %v1270_v62 = vpack.c.b16 %v1262_v41, %v1262_v41  ;;  %v856_v1 = vrot.slane %v729_v45, 1  ;;  %v1305_v40 = vshll.u32 %v2637_v30, 16 }
  0x44   : > { %842 = vrot.lane.b32.xlu2 %v817_v31, %s2347_s19  ;;  %v585_v31 = vrot.slane %v2564_v48, 1  ;;  %v498_v49 = vsel %vm450_vm1, %v493_v36, %v497_v37  ;;  %v1303_v45 = vshrl.u32 %v2637_v30, 16 }
  0x45   : > { %872 = vrot.lane.b32.xlu0 %v851_v21, %s2346_s18  ;;  %v541_v21 = vor.u32 %v540_v11, %v536_v9  ;;  %v829_v25 = vsel %vm450_vm1, %v824_v14, %v828_v17  ;;  %v1286_v9 = vshll.u32 %v1270_v62, 16  ;;  %v776_v11 = vor.u32 %v775_v59, %v771_v58 }
  0x46   : > { %v1291_v17 = vshrl.u32 %v2612_v52, 16  ;;  %v1391_v38 = vrot.slane %v1270_v62, 1  ;;  %v1307_v46 = vrot.slane %v1305_v40, 1 }
  0x47   : > { %v546_v33 = vsel %vm450_vm1, %v541_v21, %v545_v22  ;;  %v1288_v21 = vrot.slane %v1286_v9, 1  ;;  %v781_v22 = vsel %vm450_vm1, %v776_v11, %v780_v13  ;;  %v2667_v9 = vld [vmem:[%s2432_s17 + $0x3c] sm:$0xff] }
  0x4b   : > { %882 = vrot.lane.b32.xlu1 %v866_v39, %s2346_s18  ;;  %v587_v39 = vsel %vm563_vm0, %v585_v31, %v586_v32  ;;  %v1264_v31 = vunpack.c.l.b16 %v2148_v27  ;;  %v2154_v27 = vld [vmem:[%s2432_s17 + $0x50] sm:$0x1] }
  0x4c   : > { %551 = vrot.lane.b32.xlu2 %v486_v56, %s2347_s19  ;;  %v574_v56 = vrot.slane %v445_v18, 1  ;;  %v1295_v18 = vrot.slane %v1293_v5, 1  ;;  %v1394_v5 = vrot.slane %v1271_v3, 1 }
  0x4d   : > { %600 = vrot.lane.b32.xlu0 %v584_v47, %s2346_s18  ;;  %v2607_v47 = vld [vmem:[%s2432_s17 + $0x18] sm:$0xff] }
  0x4e   : > { %v1281_v57 = vshll.u32 %v2607_v47, 16  ;;  %v575_v6 = vsel %vm563_vm0, %v573_v55, %v574_v56  ;;  %v1279_v7 = vshrl.u32 %v2607_v47, 16  ;;  %v1296_v32 = vor.u32 %v1295_v18, %v1291_v17 }
  0x4f   : > { %v1390_v37 = vrot.slane %v2607_v47, 1  ;;  %v1396_v55 = vrot.slane %v2637_v30, 1 }
  0x51   : > { %v1392_v44 = vsel %vm563_vm0, %v1390_v37, %v1391_v38 }
  0x53   : > { %834 = vrot.lane.b32.xlu1 %v769_v63, %s2347_s19  ;;  %v855_v63 = vrot.slane %v2596_v34, 1 }
  0x54   : > { %874 = vrot.lane.b32.xlu2 %v854_v20, %s2346_s18 }
  0x55   : > { %592 = vrot.lane.b32.xlu0 %v572_v8, %s2346_s18  ;;  %v1283_v8 = vrot.slane %v1281_v57, 1  ;;  %v857_v14 = vsel %vm563_vm0, %v855_v63, %v856_v1  ;;  %v1393_v1 = vrot.slane %v2612_v52, 1 }
  0x57   : > { %v1284_v20 = vor.u32 %v1283_v8, %v1279_v7  ;;  %v2151_v7 = vld [vmem:[%s2432_s17 + $0x44] sm:$0x1] }
  0x58   : > { %v1265_v8 = vunpack.c.l.b16 %v2151_v7 }
  0x59   : > { %v1289_v35 = vsel %vm450_vm1, %v1284_v20, %v1288_v21  ;;  %v2116_v20 = vld [vmem:[%s3171_s4 + $0x8] sm:$0xf]  ;;  %v2128_v21 = vld [vmem:[%s3171_s4] sm:$0xf] }
  0x5a   : > { %v1273_v11 = vpack.c.b16 %v1265_v8, %v1265_v8 }
  0x5b   : > { %844 = vrot.lane.b32.xlu1 %v829_v25, %s2347_s19  ;;  %v2235_v25 = vld [vmem:[%s3168_s1] sm:$0x30] }
  0x5c   : > { %602 = vrot.lane.b32.xlu2 %v587_v39, %s2346_s18  ;;  %v2103_v28 = vor.u32 %v2235_v25, %v2102_v23  ;;  %v1272_v39 = vpack.c.b16 %v1264_v31, %v1264_v31  ;;  %v1400_v17 = vrot.slane %v1273_v11, 1  ;;  %v2236_v23 = vld [vmem:[%s3171_s4] sm:$0x30]  ;;  %v2694_v31 = vld [vmem:[%s2432_s17 + $0x48] sm:$0xff]  ;;  %v1322_v7 = vshll.u32 %v1273_v11, 16 }
  0x5d   : > { %561 = vrot.lane.b32.xlu0 %v546_v33, %s2347_s19  ;;  %v1300_v33 = vrot.slane %v1298_v19, 1  ;;  %v2129_v25 = vor.u32 %v2236_v23, %v2128_v21  ;;  %v1329_v37 = vshll.u32 %v2694_v31, 16  ;;  %v1327_v40 = vshrl.u32 %v2694_v31, 16 }
  0x5e   : > { %v1018_v36 = vsel %vm943_vm2, %v2103_v28, 0  ;;  %v1310_v41 = vshll.u32 %v1272_v39, 16  ;;  %v1397_v56 = vrot.slane %v1272_v39, 1 }
  0x5f   : > { %1027 = vmatpush.bf16.msra.mxu1 %v1018_v36  ;;  %2258 = vmatpush.bf16.msra.mxu3 %v1018_v36  ;;  %v1301_v42 = vsel %vm450_vm1, %v1296_v32, %v1300_v33  ;;  %v1266_v32 = vunpack.c.l.b16 %v2154_v27  ;;  %v1135_v33 = vsel %vm943_vm2, %v2129_v25, 0 }
  0x60   : > { %v1312_v58 = vrot.slane %v1310_v41, 1  ;;  %v1398_v60 = vsel %vm563_vm0, %v1396_v55, %v1397_v56  ;;  %v2256_v41 = vld [vmem:[%s3171_s4 + $0x10] sm:$0x30] }
  0x61   : > { %v2697_v36 = vpack.c.b16 %v1266_v32, %v1266_v32 }
  0x63   : > { %553 = vrot.lane.b32.xlu1 %v498_v49, %s2347_s19  ;;  %v2090_v49 = vld [vmem:[%s3168_s1 + $0x8] sm:$0xf]  ;;  %1144 = vmatpush.bf16.msrb.mxu3 %v1135_v33 }
  0x64   : > { %594 = vrot.lane.b32.xlu2 %v575_v6, %s2346_s18  ;;  %v2091_v57 = vor.u32 %v2245_v54, %v2090_v49  ;;  %v1395_v6 = vsel %vm563_vm0, %v1393_v1, %v1394_v5  ;;  %v1315_v5 = vshrl.u32 %v2667_v9, 16 }
  0x65   : > { %884 = vrot.lane.b32.xlu0 %v869_v53, %s2346_s18  ;;  %v1308_v53 = vor.u32 %v1307_v46, %v1303_v45  ;;  %v2214_v46 = vld [vmem:[%s3171_s4 + $0x10] sm:$0xf] }
  0x66   : > { %v945_v59 = vsel %vm943_vm2, %v2091_v57, 0  ;;  %v2215_v54 = vor.u32 %v2256_v41, %v2214_v46  ;;  %v2255_v57 = vld [vmem:[%s3168_s1 + $0x10] sm:$0x30] }
  0x67   : > { %2257 = vmatpush.bf16.msra.mxu2 %v945_v59  ;;  %954 = vmatpush.bf16.msra.mxu0 %v945_v59  ;;  %v1313_v63 = vsel %vm450_vm1, %v1308_v53, %v1312_v58 }
  0x68   : > { %v1563_v53 = vsel %vm943_vm2, %v2215_v54, 0 }
  0x69   : > { %1572 = vmatpush.bf16.msrb.mxu1 %v1563_v53 }
  0x6b   : > { %876 = vrot.lane.b32.xlu1 %v857_v14, %s2346_s18  ;;  %v1399_v14 = vrot.slane %v2667_v9, 1 }
  0x6c   : > { %1374 = vrot.lane.b32.xlu2 %v1289_v35, %s2347_s19 }
  0x6d   : > { %836 = vrot.lane.b32.xlu0 %v781_v22, %s2347_s19  ;;  %v1401_v19 = vsel %vm563_vm0, %v1399_v14, %v1400_v17  ;;  %v1324_v17 = vrot.slane %v1322_v7, 1 }
  0x73   : > { %1376 = vrot.lane.b32.xlu1 %v1301_v42, %s2347_s19  ;;  %v1331_v42 = vrot.slane %v1329_v37, 1 }
  0x74   : > { %1416 = vrot.lane.b32.xlu2 %v1395_v6, %s2346_s18 }
  0x75   : > { %1414 = vrot.lane.b32.xlu0 %v1392_v44, %s2346_s18  ;;  %v1334_v44 = vshll.u32 %v2697_v36, 16  ;;  %v1332_v55 = vor.u32 %v1331_v42, %v1327_v40 }
  0x76   : > { %v589_v62 = vpop.permute.xlu2 %588 }
  0x77   : > { %v1336_v56 = vrot.slane %v1334_v44, 1 }
  0x79   : > { %v1337_v59 = vsel %vm450_vm1, %v1332_v55, %v1336_v56  ;;  %v1402_v55 = vrot.slane %v2694_v31, 1  ;;  %v1403_v56 = vrot.slane %v2697_v36, 1 }
  0x7b   : > { %1418 = vrot.lane.b32.xlu1 %v1398_v60, %s2346_s18 }
  0x7d   : > { %1378 = vrot.lane.b32.xlu0 %v1313_v63, %s2347_s19  ;;  %v1317_v63 = vshll.u32 %v2667_v9, 16 }
  0x7e   : > { %v548_v13 = vpop.permute.xlu2 %547 }
  0x7f   : > { %v606_v3 = vsel %vm604_vm3, %v2449_v15, %v548_v13  ;;  %v2246_v15 = vld [vmem:[%s3171_s4 + $0x8] sm:$0x30]  ;;  %v1319_v6 = vrot.slane %v1317_v63, 1 }
  0x80   : > { %v2673_v18 = vsel %vm621_vm4, %v606_v3, %v589_v62  ;;  %v2117_v22 = vor.u32 %v2246_v15, %v2116_v20  ;;  %v2737_v15 = vld [vmem:[%s2432_s17 + $0x54] sm:$0xff] }
  0x81   : > { %2104 = vmatmul.msk.bf16.vlgmr.msra.gmra.mxu1 %vm926_vm5, %v2673_v18  ;;  %v1320_v14 = vor.u32 %v1319_v6, %v1315_v5  ;;  %v1339_v25 = vshrl.u32 %v2737_v15, 16 }
  0x82   : > { %v1078_v28 = vsel %vm943_vm2, %v2117_v22, 0 }
  0x83   : > { %1087 = vmatpush.bf16.msrb.mxu2 %v1078_v28  ;;  %1382 = vrot.lane.b32.xlu1 %v1337_v59, %s2347_s19  ;;  %v1325_v20 = vsel %vm450_vm1, %v1320_v14, %v1324_v17  ;;  %v2163_v17 = vld [vmem:[%s2432_s17 + $0x74] sm:$0x1] }
  0x84   : > { %1380 = vrot.lane.b32.xlu2 %v1325_v20, %s2347_s19  ;;  %v2797_v20 = vld [vmem:[%s2432_s17 + $0x6c] sm:$0xff] }
  0x85   : > { %1420 = vrot.lane.b32.xlu0 %v1401_v19, %s2346_s18  ;;  %v2157_v19 = vld [vmem:[%s2432_s17 + $0x5c] sm:$0x1] }
  0x86   : > { %v558_v38 = vpop.permute.xlu2 %557  ;;  %v1267_v21 = vunpack.c.l.b16 %v2157_v19 }
  0x87   : > { %v616_v44 = vsel %vm604_vm3, %v2480_v61, %v558_v38 }
  0x88   : > { %v1275_v22 = vpack.c.b16 %v1267_v21, %v1267_v21  ;;  %v1269_v21 = vunpack.c.l.b16 %v2163_v17 }
  0x8a   : > { %v1346_v28 = vshll.u32 %v1275_v22, 16  ;;  %v1406_v42 = vrot.slane %v1275_v22, 1  ;;  %v1365_v22 = vshll.u32 %v2797_v20, 16 }
  0x8c   : > { %v1348_v37 = vrot.slane %v1346_v28, 1 }
  0x8d   : > { %v597_v35 = vpop.permute.xlu1 %596 }
  0x8e   : > { %v881_v13 = vpop.permute.xlu2 %880 }
  0x8f   : > { %v556_v39 = vpop.permute.xlu0 %555 }
  0x90   : > { %v614_v45 = vsel %vm604_vm3, %v2435_v0, %v556_v39  ;;  %v2200_v0 = vld [vmem:[%s3168_s1 + $0x10] sm:$0xf]  ;;  %v1405_v39 = vrot.slane %v2737_v15, 1 }
  0x91   : > { %v2711_v49 = vsel %vm621_vm4, %v614_v45, %v597_v35  ;;  %v2201_v58 = vor.u32 %v2255_v57, %v2200_v0  ;;  %v1404_v0 = vsel %vm563_vm0, %v1402_v55, %v1403_v56 }
  0x92   : > { %2108 = vmatmul.msk.bf16.vlgmr.msra.gmra.mxu3 %vm926_vm5, %v2711_v49  ;;  %1422 = vrot.lane.b32.xlu2 %v1404_v0, %s2346_s18 }
  0x93   : > { %v1487_v62 = vsel %vm943_vm2, %v2201_v58, 0  ;;  %v2160_v58 = vld [vmem:[%s2432_s17 + $0x68] sm:$0x1] }
  0x94   : > { %1496 = vmatpush.bf16.msrb.mxu0 %v1487_v62  ;;  %v1268_v59 = vunpack.c.l.b16 %v2160_v58  ;;  %v2776_v62 = vld [vmem:[%s2432_s17 + $0x60] sm:$0xff]  ;;  %s1985_s17 = sshll.u32 %s2328_s27, 3 }
  0x95   : > { %v879_v60 = vpop.permute.xlu1 %878  ;;  %p338_p6 = scmp.lt.s32.totalorder %s1985_s17, 15 }
  0x96   : > { %v833_v40 = vpop.permute.xlu2 %832  ;;  %v1276_v36 = vpack.c.b16 %v1268_v59, %v1268_v59 }
  0x97   : > { %v839_v1 = vpop.permute.xlu0 %838  ;;  %v889_v7 = vsel %vm604_vm3, %v2499_v24, %v833_v40  ;;  %v1277_v24 = vpack.c.b16 %v1269_v21, %v1269_v21  ;;  %s3189_s17 = smov (!%p338_p6, %s1985_s17), 15 }
  0x98   : > { %v895_v8 = vsel %vm604_vm3, %v2439_v2, %v839_v1  ;;  %v1341_v2 = vshll.u32 %v2737_v15, 16  ;;  %v1408_v1 = vrot.slane %v2776_v62, 1  ;;  %v1409_v5 = vrot.slane %v1276_v36, 1 }
  0x99   : > { %v2730_v3 = vsel %vm621_vm4, %v895_v8, %v879_v60  ;;  %v1370_v28 = vshll.u32 %v1277_v24, 16  ;;  %v1358_v55 = vshll.u32 %v1276_v36, 16 }
  0x9a   : > { %2096 = vmatmul.msk.bf16.vlgmr.msra.gmra.mxu2 %vm926_vm5, %v2730_v3  ;;  %v1343_v27 = vrot.slane %v1341_v2, 1  ;;  %v1410_v6 = vsel %vm563_vm0, %v1408_v1, %v1409_v5 }
  0x9b   : > { %v1360_v0 = vrot.slane %v1358_v55, 1 }
  0x9c   : > { %v1344_v35 = vor.u32 %v1343_v27, %v1339_v25  ;;  %v1363_v27 = vshrl.u32 %v2797_v20, 16 }
  0x9d   : > { %v871_v11 = vpop.permute.xlu1 %870 }
  0x9e   : > { %v1349_v45 = vsel %vm450_vm1, %v1344_v35, %v1348_v37  ;;  %v843_v57 = vpop.permute.xlu2 %842 }
  0x9f   : > { %v831_v23 = vpop.permute.xlu0 %830  ;;  %1384 = vrot.lane.b32.xlu0 %v1349_v45, %s2347_s19  ;;  %v899_v19 = vsel %vm604_vm3, %v2521_v51, %v843_v57  ;;  %v1367_v51 = vrot.slane %v1365_v22, 1 }
  0xa0   : > { %v887_v32 = vsel %vm604_vm3, %v2454_v26, %v831_v23  ;;  %v1407_v26 = vsel %vm563_vm0, %v1405_v39, %v1406_v42  ;;  %v1372_v39 = vrot.slane %v1370_v28, 1 }
  0xa1   : > { %v2745_v33 = vsel %vm621_vm4, %v887_v32, %v871_v11  ;;  %1424 = vrot.lane.b32.xlu1 %v1407_v26, %s2346_s18  ;;  %v1368_v37 = vor.u32 %v1367_v51, %v1363_v27 }
  0xa2   : > { %2092 = vmatmul.msk.bf16.vlgmr.msra.gmra.mxu0 %vm926_vm5, %v2745_v33 }
  0xa3   : > { %v1373_v40 = vsel %vm450_vm1, %v1368_v37, %v1372_v39 }
  0xa5   : > { %v599_v46 = vpop.permute.xlu1 %598 }
  0xa6   : > { %v2757_v41 = vsel %vm621_vm4, %v616_v44, %v599_v46  ;;  %v1353_v44 = vshll.u32 %v2776_v62, 16 }
  0xa7   : > { %v841_v54 = vpop.permute.xlu0 %840  ;;  %2109 = vmatmul.msk.bf16.gmra.mxu3 %vm926_vm5, %v2757_v41  ;;  %1426 = vrot.lane.b32.xlu0 %v1410_v6, %s2346_s18 }
  0xa8   : > { %v897_v61 = vsel %vm604_vm3, %v2472_v50, %v841_v54  ;;  %v1351_v54 = vshrl.u32 %v2776_v62, 16 }
  0xa9   : > { %v2764_v38 = vsel %vm621_vm4, %v897_v61, %v881_v13  ;;  %1388 = vrot.lane.b32.xlu1 %v1373_v40, %s2347_s19  ;;  %v1355_v61 = vrot.slane %v1353_v44, 1 }
  0xaa   : > { %2097 = vmatmul.msk.bf16.gmra.mxu2 %vm926_vm5, %v2764_v38 }
  0xad   : > { %v591_v53 = vpop.permute.xlu1 %590 }
  0xaf   : > { %v550_v60 = vpop.permute.xlu0 %549 }
  0xb0   : > { %v608_v50 = vsel %vm604_vm3, %v2490_v10, %v550_v60  ;;  %v552_v10 = vpop.permute.xlu2 %551 }
  0xb1   : > { %v2779_v63 = vsel %vm621_vm4, %v608_v50, %v591_v53 }
  0xb2   : > { %2105 = vmatmul.msk.bf16.gmra.mxu1 %vm926_vm5, %v2779_v63 }
  0xb5   : > { %v560_v8 = vpop.permute.xlu1 %559 }
  0xb6   : > { %v618_v23 = vsel %vm604_vm3, %v2504_v29, %v560_v8  ;;  %v610_v29 = vsel %vm604_vm3, %v2537_v12, %v552_v10  ;;  %v1356_v12 = vor.u32 %v1355_v61, %v1351_v54  ;;  %v1412_v10 = vrot.slane %v1277_v24, 1 }
  0xb7   : > { %v873_v13 = vpop.permute.xlu0 %872 }
  0xb8   : > { %v2789_v14 = vsel %vm621_vm4, %v889_v7, %v873_v13  ;;  %v875_v35 = vpop.permute.xlu2 %874  ;;  %v1361_v53 = vsel %vm450_vm1, %v1356_v12, %v1360_v0 }
  0xb9   : > { %2093 = vmatmul.msk.bf16.gmra.mxu0 %vm926_vm5, %v2789_v14  ;;  %1386 = vrot.lane.b32.xlu2 %v1361_v53, %s2347_s19  ;;  %s1987_s19 = sshll.u32 %s3187_s28, 5 }
  0xbd   : > { %v883_v11 = vpop.permute.xlu1 %882 }
  0xbe   : > { %v2801_v2 = vsel %vm621_vm4, %v899_v19, %v883_v11 }
  0xbf   : > { %v601_v25 = vpop.permute.xlu0 %600  ;;  %2098 = vmatmul.msk.bf16.gmra.mxu2 %vm926_vm5, %v2801_v2 }
  0xc0   : > { %v2809_v32 = vsel %vm621_vm4, %v618_v23, %v601_v25  ;;  %v603_v57 = vpop.permute.xlu2 %602 }
  0xc1   : > { %2110 = vmatmul.msk.bf16.gmra.mxu3 %vm926_vm5, %v2809_v32 }
  0xc5   : > { %v835_v42 = vpop.permute.xlu1 %834 }
  0xc6   : > { %v891_v45 = vsel %vm604_vm3, %v2541_v16, %v835_v42 }
  0xc7   : > { %v593_v26 = vpop.permute.xlu0 %592  ;;  %v907_v46 = vsel %vm621_vm4, %v891_v45, %v875_v35 }
  0xc8   : > { %v627_v56 = vsel %vm621_vm4, %v610_v29, %v593_v26  ;;  %v595_v50 = vpop.permute.xlu2 %594 }
  0xc9   : > { %2094 = vmatmul.msk.bf16.gmra.mxu0 %vm926_vm5, %v907_v46  ;;  %2106 = vmatmul.msk.bf16.gmra.mxu1 %vm926_vm5, %v627_v56 }
  0xcd   : > { %v845_v16 = vpop.permute.xlu1 %844 }
  0xce   : > { %v901_v5 = vsel %vm604_vm3, %v2559_v43, %v845_v16 }
  0xcf   : > { %v562_v58 = vpop.permute.xlu0 %561 }
  0xd0   : > { %v620_v59 = vsel %vm604_vm3, %v2564_v48, %v562_v58  ;;  %v1411_v48 = vrot.slane %v2797_v20, 1  ;;  %v1375_v21 = vpop.permute.xlu2 %1374 }
  0xd1   : > { %v2830_v60 = vsel %vm621_vm4, %v620_v59, %v603_v57  ;;  %v1431_v11 = vsel %vm604_vm3, %v2607_v47, %v1375_v21 }
  0xd2   : > { %2111 = vmatmul.msk.bf16.gmra.mxu3 %vm926_vm5, %v2830_v60  ;;  %v1413_v13 = vsel %vm563_vm0, %v1411_v48, %v1412_v10 }
  0xd3   : > { %1428 = vrot.lane.b32.xlu2 %v1413_v13, %s2346_s18  ;;  %s1986_s18 = sshll.u32 %s3189_s17, 1 }
  0xd4   : > { %s342_s23 = sadd.s32 %s1987_s19, %s1986_s18 }
  0xd5   : > { %v554_v36 = vpop.permute.xlu1 %553  ;;  %s1988_s12 = sshll.u32 %s342_s23, 3  ;;  %s1992_s13 = sshll.u32 %s342_s23, 2 }
  0xd6   : > { %v612_v1 = vsel %vm604_vm3, %v2579_v4, %v554_v36  ;;  %s2999_s16 = scalar_lea.vmem %s3174_s7, %s1988_s12  ;;  %s3006_s19 = scalar_lea.vmem %s3175_s8, %s1992_s13 }
  0xd7   : > { %v885_v6 = vpop.permute.xlu0 %884  ;;  %v629_v7 = vsel %vm621_vm4, %v612_v1, %v595_v50 }
  0xd8   : > { %v2840_v8 = vsel %vm621_vm4, %v901_v5, %v885_v6  ;;  %v1417_v23 = vpop.permute.xlu2 %1416 }
  0xd9   : > { %2099 = vmatmul.msk.bf16.gmra.mxu2 %vm926_vm5, %v2840_v8  ;;  %2107 = vmatmul.msk.bf16.gmra.mxu1 %vm926_vm5, %v629_v7 }
  0xdd   : > { %v877_v4 = vpop.permute.xlu1 %876 }
  0xdf   : > { %v837_v43 = vpop.permute.xlu0 %836 }
  0xe0   : > { %v893_v17 = vsel %vm604_vm3, %v2596_v34, %v837_v43 }
  0xe1   : > { %v909_v19 = vsel %vm621_vm4, %v893_v17, %v877_v4 }
  0xe2   : > { %2095 = vmatmul.msk.bf16.gmra.mxu0 %vm926_vm5, %v909_v19  ;;  %2130 = vmatmul.msk.bf16.vlgmr.msrb.gmra.mxu3 %vm926_vm5, %v2673_v18 }
  0xe5   : > { %v1377_v34 = vpop.permute.xlu1 %1376 }
  0xe6   : > { %v1433_v18 = vsel %vm604_vm3, %v2612_v52, %v1377_v34  ;;  %v1381_v52 = vpop.permute.xlu2 %1380 }
  0xe7   : > { %v1415_v24 = vpop.permute.xlu0 %1414  ;;  %v1449_v47 = vsel %vm621_vm4, %v1433_v18, %v1417_v23 }
  0xe8   : > { %v1447_v22 = vsel %vm621_vm4, %v1431_v11, %v1415_v24 }
  0xe9   : > { %2118 = vmatmul.msk.bf16.vlgmr.msrb.gmra.mxu2 %vm926_vm5, %v2745_v33  ;;  %2216 = vmatmul.msk.bf16.vlgmr.msrb.gmra.mxu1 %vm926_vm5, %v1447_v22 }
  0xed   : > { %v1419_v25 = vpop.permute.xlu1 %1418 }
  0xee   : > { %v1423_v42 = vpop.permute.xlu2 %1422 }
  0xef   : > { %v1379_v33 = vpop.permute.xlu0 %1378 }
  0xf2   : > { %2131 = vmatmul.msk.bf16.gmra.mxu3 %vm926_vm5, %v2779_v63  ;;  %2202 = vmatmul.msk.bf16.vlgmr.msrb.gmra.mxu0 %vm926_vm5, %v1447_v22  ;;  %v1435_v63 = vsel %vm604_vm3, %v2637_v30, %v1379_v33 }
  0xf3   : > { %v1451_v27 = vsel %vm621_vm4, %v1435_v63, %v1419_v25 }
  0xf5   : > { %v1383_v39 = vpop.permute.xlu1 %1382 }
  0xf6   : > { %v1439_v29 = vsel %vm604_vm3, %v2694_v31, %v1383_v39  ;;  %v2985_v39 = vld [vmem:[%s3173_s6] ss:$0 sm:$0xff] }
  0xf7   : > { %v1421_v51 = vpop.permute.xlu0 %1420  ;;  %v1455_v26 = vsel %vm621_vm4, %v1439_v29, %v1423_v42  ;;  %v2990_v42 = vld [vmem:[%s3170_s3] ss:$0 sm:$0xff] }
  0xf9   : > { %2119 = vmatmul.msk.bf16.gmra.mxu2 %vm926_vm5, %v2789_v14  ;;  %2217 = vmatmul.msk.bf16.gmra.mxu1 %vm926_vm5, %v1449_v47  ;;  %v1437_v14 = vsel %vm604_vm3, %v2667_v9, %v1381_v52  ;;  %v2973_v52 = vld [vmem:[%s3172_s5] ss:$0 sm:$0xff] }
  0xfa   : > { %v1453_v28 = vsel %vm621_vm4, %v1437_v14, %v1421_v51 }
  0xfe   : > { %v2885_v40 = vpop.f32.mrf.mxu1 }
 0x102   : > { %2132 = vmatmul.msk.bf16.gmra.mxu3 %vm926_vm5, %v627_v56  ;;  %2203 = vmatmul.msk.bf16.gmra.mxu0 %vm926_vm5, %v1449_v47 }
 0x106   : > { %v2900_v54 = vpop.f32.mrf.mxu1 }
 0x109   : > { %2120 = vmatmul.msk.bf16.gmra.mxu2 %vm926_vm5, %v907_v46  ;;  %2218 = vmatmul.msk.bf16.gmra.mxu1 %vm926_vm5, %v1451_v27 }
 0x111   : > { %v1385_v31 = vpop.permute.xlu0 %1384 }
 0x112   : > { %2133 = vmatmul.msk.bf16.gmra.mxu3 %vm926_vm5, %v629_v7  ;;  %2204 = vmatmul.msk.bf16.gmra.mxu0 %vm926_vm5, %v1451_v27  ;;  %v1441_v12 = vsel %vm604_vm3, %v2737_v15, %v1385_v31 }
 0x113   : > { %v1387_v50 = vpop.permute.xlu2 %1386 }
 0x114   : > { %v1443_v1 = vsel %vm604_vm3, %v2776_v62, %v1387_v50 }
 0x115   : > { %v1049_v35 = vpop.f32.mrf.mxu3 }
 0x119   : > { %2121 = vmatmul.msk.bf16.gmra.mxu2 %vm926_vm5, %v909_v19  ;;  %2219 = vmatmul.msk.bf16.gmra.mxu1 %vm926_vm5, %v1453_v28  ;;  %v1427_v5 = vpop.permute.xlu0 %1426 }
 0x11a   : > { %v1459_v48 = vsel %vm621_vm4, %v1443_v1, %v1427_v5 }
 0x11d   : > { %v976_v30 = vpop.f32.mrf.mxu2  ;;  %v1051_v9 = vpop.f32.mrf.mxu3 }
 0x11e   : > { %v2883_v37 = vadd.f32 %v1049_v35, %v976_v30  ;;  %v2980_v35 = vld [vmem:[%s3169_s2] ss:$0 sm:$0xff] }
 0x11f   : > { %v2895_v46 = vpop.f32.mrf.mxu0 }
 0x120   : > { %v1030_v51 = vadd.f32 %v2885_v40, %v2895_v46 }
 0x122   : > { %2134 = vmatmul.msk.bf16.gmra.mxu3 %vm926_vm5, %v2711_v49  ;;  %2205 = vmatmul.msk.bf16.gmra.mxu0 %vm926_vm5, %v1453_v28 }
 0x125   : > { %v978_v44 = vpop.f32.mrf.mxu2 }
 0x126   : > { %v2892_v45 = vadd.f32 %v1051_v9, %v978_v44 }
 0x127   : > { %v2904_v56 = vpop.f32.mrf.mxu0 }
 0x129   : > { %2122 = vmatmul.msk.bf16.gmra.mxu2 %vm926_vm5, %v2730_v3  ;;  %2220 = vmatmul.msk.bf16.gmra.mxu1 %vm926_vm5, %v1455_v26  ;;  %v1425_v3 = vpop.permute.xlu1 %1424 }
 0x12a   : > { %v1054_v49 = vpop.f32.mrf.mxu3  ;;  %v1457_v58 = vsel %vm621_vm4, %v1441_v12, %v1425_v3  ;;  %v1032_v3 = vadd.f32 %v2900_v54, %v2904_v56 }
 0x12d   : > { %v981_v61 = vpop.f32.mrf.mxu2  ;;  %v1429_v17 = vpop.permute.xlu2 %1428 }
 0x12e   : > { %v2902_v55 = vadd.f32 %v1054_v49, %v981_v61 }
 0x12f   : > { %v2911_v0 = vpop.f32.mrf.mxu1 }
 0x131   : > { %v1389_v43 = vpop.permute.xlu1 %1388 }
 0x132   : > { %2135 = vmatmul.msk.bf16.gmra.mxu3 %vm926_vm5, %v2757_v41  ;;  %2206 = vmatmul.msk.bf16.gmra.mxu0 %vm926_vm5, %v1455_v26  ;;  %v1056_v57 = vpop.f32.mrf.mxu3 }
 0x135   : > { %v983_v53 = vpop.f32.mrf.mxu2 }
 0x136   : > { %v2913_v16 = vadd.f32 %v1056_v57, %v983_v53  ;;  %v2916_v59 = vpop.f32.mrf.mxu0 }
 0x137   : > { %v2921_v41 = vpop.f32.mrf.mxu1 }
 0x139   : > { %2123 = vmatmul.msk.bf16.gmra.mxu2 %vm926_vm5, %v2764_v38  ;;  %2221 = vmatmul.msk.bf16.gmra.mxu1 %vm926_vm5, %v1457_v58 }
 0x13e   : > { %v2926_v36 = vpop.f32.mrf.mxu0 }
 0x142   : > { %v986_v15 = vpop.f32.mrf.mxu2  ;;  %2136 = vmatmul.msk.bf16.gmra.mxu3 %vm926_vm5, %v2809_v32  ;;  %2207 = vmatmul.msk.bf16.gmra.mxu0 %vm926_vm5, %v1457_v58 }
 0x144   : > { %v1059_v6 = vpop.f32.mrf.mxu3 }
 0x145   : > { %v2930_v7 = vadd.f32 %v1059_v6, %v986_v15 }
 0x146   : > { %v2932_v38 = vpop.f32.mrf.mxu1  ;;  %v2938_v13 = vpop.f32.mrf.mxu0 }
 0x149   : > { %2124 = vmatmul.msk.bf16.gmra.mxu2 %vm926_vm5, %v2801_v2  ;;  %2222 = vmatmul.msk.bf16.gmra.mxu1 %vm926_vm5, %v1459_v48  ;;  %v1445_v2 = vsel %vm604_vm3, %v2797_v20, %v1389_v43 }
 0x14a   : > { %v988_v32 = vpop.f32.mrf.mxu2  ;;  %v1461_v11 = vsel %vm621_vm4, %v1445_v2, %v1429_v17  ;;  %v1035_v17 = vadd.f32 %v2911_v0, %v2916_v59 }
 0x14c   : > { %v1061_v10 = vpop.f32.mrf.mxu3 }
 0x14d   : > { %v2940_v4 = vadd.f32 %v1061_v10, %v988_v32 }
 0x14e   : > { %v2942_v62 = vpop.f32.mrf.mxu1  ;;  %v2952_v24 = vpop.f32.mrf.mxu0 }
 0x152   : > { %2137 = vmatmul.msk.bf16.gmra.mxu3 %vm926_vm5, %v2830_v60  ;;  %2208 = vmatmul.msk.bf16.gmra.mxu0 %vm926_vm5, %v1459_v48 }
 0x155   : > { %v1064_v19 = vpop.f32.mrf.mxu3 }
 0x156   : > { %v2949_v21 = vpop.f32.mrf.mxu1 }
 0x159   : > { %2125 = vmatmul.msk.bf16.gmra.mxu2 %vm926_vm5, %v2840_v8  ;;  %2223 = vmatmul.msk.bf16.gmra.mxu1 %vm926_vm5, %v1461_v11 }
 0x15c   : > { %v991_v60 = vpop.f32.mrf.mxu2 }
 0x15d   : > { %v2957_v22 = vadd.f32 %v1064_v19, %v991_v60  ;;  %v1066_v34 = vpop.f32.mrf.mxu3 }
 0x15e   : > { %v2959_v18 = vpop.f32.mrf.mxu1 }
 0x15f   : > { %v2961_v20 = vpop.f32.mrf.mxu0 }
 0x162   : > { %2209 = vmatmul.msk.bf16.gmra.mxu0 %vm926_vm5, %v1461_v11 }
 0x164   : > { %v993_v23 = vpop.f32.mrf.mxu2 }
 0x165   : > { %v2965_v47 = vadd.f32 %v1066_v34, %v993_v23  ;;  %v1146_v33 = vpop.f32.mrf.mxu3 }
 0x166   : > { %v1574_v8 = vpop.f32.mrf.mxu1 }
 0x167   : > { %v2967_v63 = vpop.f32.mrf.mxu0 }
 0x16c   : > { %v1089_v25 = vpop.f32.mrf.mxu2 }
 0x16d   : > { %v1147_v27 = vadd.f32 %v1146_v33, %v1089_v25  ;;  %v1148_v14 = vpop.f32.mrf.mxu3 }
 0x16e   : > { %v1576_v28 = vpop.f32.mrf.mxu1 }
 0x16f   : > { %v1614_v30 = vadd.f32 %v1574_v8, %v1147_v27  ;;  %v1498_v9 = vpop.f32.mrf.mxu0 }
 0x170   : > { %v1538_v29 = vadd.f32 %v1498_v9, %v1030_v51  ;;  %v1037_v9 = vadd.f32 %v2921_v41, %v2926_v36 }
 0x171   : > { %v1706_v40 = vmul.f32 %v2973_v52, %v1614_v30 }
 0x172   : > { %v1634_v44 = vmul.f32 %v2980_v35, %v1538_v29 }
 0x173   : > { %v1726_v26 = vadd.f32 %v2985_v39, %v1706_v40 }
 0x174   : > { %v1654_v46 = vadd.f32 %v2990_v42, %v1634_v44  ;;  %v1091_v49 = vpop.f32.mrf.mxu2 }
 0x175   : > { %vm1742_vm6 = vcmp.gt.f32.partialorder %v1726_v26, 0.0  ;;  %v1758_v61 = vmul.f32 0.1, %v1726_v26  ;;  %v1149_v31 = vadd.f32 %v1148_v14, %v1091_v49  ;;  %v1151_v12 = vpop.f32.mrf.mxu3 }
 0x176   : > { %v1670_v57 = vmax.f32 %v1654_v46, 0.0  ;;  %v1579_v53 = vpop.f32.mrf.mxu1 }
 0x177   : > { %v1774_v58 = vsel %vm1742_vm6, %v1726_v26, %v1758_v61  ;;  %v1615_v50 = vadd.f32 %v1576_v28, %v1149_v31  ;;  %v1500_v15 = vpop.f32.mrf.mxu0 }
 0x178   : > { %v1790_v1 = vpack.c.bf16 %v1774_v58, %v1774_v58  ;;  %1686 = vst.msk [vmem:[%s2999_s16] sm:$0xff] %vm621_vm4, %v1670_v57  ;;  %v1539_v5 = vadd.f32 %v1500_v15, %v1032_v3 }
 0x179   : > { %v1707_v6 = vmul.f32 %v2973_v52, %v1615_v50  ;;  %v1040_v50 = vadd.f32 %v2932_v38, %v2938_v13 }
 0x17a   : > { %1807 = vst.msk [vmem:[%s3006_s19] sm:$0xf] %vm1806_vm7, %v1790_v1  ;;  %v1635_v54 = vmul.f32 %v2980_v35, %v1539_v5 }
 0x17b   : > { %v1727_v56 = vadd.f32 %v2985_v39, %v1707_v6 }
 0x17c   : > { %v1655_v48 = vadd.f32 %v2990_v42, %v1635_v54  ;;  %v1094_v32 = vpop.f32.mrf.mxu2 }
 0x17d   : > { %vm1743_vm8 = vcmp.gt.f32.partialorder %v1727_v56, 0.0  ;;  %v1759_v10 = vmul.f32 0.1, %v1727_v56  ;;  %v1152_v43 = vadd.f32 %v1151_v12, %v1094_v32  ;;  %v1153_v2 = vpop.f32.mrf.mxu3 }
 0x17e   : > { %v1671_v19 = vmax.f32 %v1655_v48, 0.0  ;;  %v1581_v11 = vpop.f32.mrf.mxu1 }
 0x17f   : > { %v1775_v60 = vsel %vm1743_vm8, %v1727_v56, %v1759_v10  ;;  %v1616_v34 = vadd.f32 %v1579_v53, %v1152_v43  ;;  %v1503_v23 = vpop.f32.mrf.mxu0 }
 0x180   : > { %v1791_v33 = vpack.c.bf16 %v1775_v60, %v1775_v60  ;;  %1687 = vst.msk [vmem:[%s2999_s16 + $0x8] sm:$0xff] %vm621_vm4, %v1671_v19  ;;  %v1540_v8 = vadd.f32 %v1503_v23, %v1035_v17 }
 0x181   : > { %v1708_v25 = vmul.f32 %v2973_v52, %v1616_v34 }
 0x182   : > { %1808 = vst.msk [vmem:[%s3006_s19 + $0x4] sm:$0xf] %vm1806_vm7, %v1791_v33  ;;  %v1636_v27 = vmul.f32 %v2980_v35, %v1540_v8 }
 0x183   : > { %v1728_v14 = vadd.f32 %v2985_v39, %v1708_v25 }
 0x184   : > { %v1656_v0 = vadd.f32 %v2990_v42, %v1636_v27  ;;  %v1096_v59 = vpop.f32.mrf.mxu2 }
 0x185   : > { %vm1744_vm9 = vcmp.gt.f32.partialorder %v1728_v14, 0.0  ;;  %v1760_v51 = vmul.f32 0.1, %v1728_v14  ;;  %v1154_v28 = vadd.f32 %v1153_v2, %v1096_v59  ;;  %v1156_v30 = vpop.f32.mrf.mxu3 }
 0x186   : > { %v1672_v29 = vmax.f32 %v1656_v0, 0.0  ;;  %v1584_v40 = vpop.f32.mrf.mxu1 }
 0x187   : > { %v1776_v44 = vsel %vm1744_vm9, %v1728_v14, %v1760_v51  ;;  %v1617_v26 = vadd.f32 %v1581_v11, %v1154_v28  ;;  %v1505_v46 = vpop.f32.mrf.mxu0  ;;  %v1042_v11 = vadd.f32 %v2942_v62, %v2952_v24 }
 0x188   : > { %v1792_v49 = vpack.c.bf16 %v1776_v44, %v1776_v44  ;;  %1688 = vst.msk [vmem:[%s2999_s16 + $0x10] sm:$0xff] %vm621_vm4, %v1672_v29  ;;  %v1541_v61 = vadd.f32 %v1505_v46, %v1037_v9  ;;  %v1045_v9 = vadd.f32 %v2949_v21, %v2961_v20 }
 0x189   : > { %v1709_v31 = vmul.f32 %v2973_v52, %v1617_v26 }
 0x18a   : > { %1809 = vst.msk [vmem:[%s3006_s19 + $0x8] sm:$0xf] %vm1806_vm7, %v1792_v49  ;;  %v1637_v12 = vmul.f32 %v2980_v35, %v1541_v61 }
 0x18b   : > { %v1729_v3 = vadd.f32 %v2985_v39, %v1709_v31 }
 0x18c   : > { %v1657_v41 = vadd.f32 %v2990_v42, %v1637_v12  ;;  %v1099_v36 = vpop.f32.mrf.mxu2 }
 0x18d   : > { %vm1745_vm10 = vcmp.gt.f32.partialorder %v1729_v3, 0.0  ;;  %v1761_v57 = vmul.f32 0.1, %v1729_v3  ;;  %v1157_v53 = vadd.f32 %v1156_v30, %v1099_v36  ;;  %v1158_v58 = vpop.f32.mrf.mxu3 }
 0x18e   : > { %v1673_v15 = vmax.f32 %v1657_v41, 0.0  ;;  %v1586_v1 = vpop.f32.mrf.mxu1 }
 0x18f   : > { %v1777_v5 = vsel %vm1745_vm10, %v1729_v3, %v1761_v57  ;;  %v1618_v6 = vadd.f32 %v1584_v40, %v1157_v53  ;;  %v1508_v54 = vpop.f32.mrf.mxu0  ;;  %v1047_v53 = vadd.f32 %v2959_v18, %v2967_v63 }
 0x190   : > { %v1793_v56 = vpack.c.bf16 %v1777_v5, %v1777_v5  ;;  %1689 = vst.msk [vmem:[%s2999_s16 + $0x18] sm:$0xff] %vm621_vm4, %v1673_v15  ;;  %v1542_v48 = vadd.f32 %v1508_v54, %v1040_v50 }
 0x191   : > { %v1710_v32 = vmul.f32 %v2973_v52, %v1618_v6 }
 0x192   : > { %1810 = vst.msk [vmem:[%s3006_s19 + $0xc] sm:$0xf] %vm1806_vm7, %v1793_v56  ;;  %v1638_v10 = vmul.f32 %v2980_v35, %v1542_v48 }
 0x193   : > { %v1730_v43 = vadd.f32 %v2985_v39, %v1710_v32 }
 0x194   : > { %v1658_v38 = vadd.f32 %v2990_v42, %v1638_v10  ;;  %v1101_v13 = vpop.f32.mrf.mxu2 }
 0x195   : > { %vm1746_vm11 = vcmp.gt.f32.partialorder %v1730_v43, 0.0  ;;  %v1762_v2 = vmul.f32 0.1, %v1730_v43  ;;  %v1159_v17 = vadd.f32 %v1158_v58, %v1101_v13  ;;  %v1161_v19 = vpop.f32.mrf.mxu3 }
 0x196   : > { %v1674_v60 = vmax.f32 %v1658_v38, 0.0  ;;  %v1589_v34 = vpop.f32.mrf.mxu1 }
 0x197   : > { %v1778_v23 = vsel %vm1746_vm11, %v1730_v43, %v1762_v2  ;;  %v1619_v33 = vadd.f32 %v1586_v1, %v1159_v17  ;;  %v1510_v8 = vpop.f32.mrf.mxu0 }
 0x198   : > { %v1794_v25 = vpack.c.bf16 %v1778_v23, %v1778_v23  ;;  %1690 = vst.msk [vmem:[%s2999_s16 + $0x20] sm:$0xff] %vm621_vm4, %v1674_v60  ;;  %v1543_v27 = vadd.f32 %v1510_v8, %v1042_v11 }
 0x199   : > { %v1711_v14 = vmul.f32 %v2973_v52, %v1619_v33 }
 0x19a   : > { %1811 = vst.msk [vmem:[%s3006_s19 + $0x10] sm:$0xf] %vm1806_vm7, %v1794_v25  ;;  %v1639_v0 = vmul.f32 %v2980_v35, %v1543_v27 }
 0x19b   : > { %v1731_v59 = vadd.f32 %v2985_v39, %v1711_v14 }
 0x19c   : > { %v1659_v62 = vadd.f32 %v2990_v42, %v1639_v0  ;;  %v1104_v24 = vpop.f32.mrf.mxu2 }
 0x19d   : > { %vm1747_vm12 = vcmp.gt.f32.partialorder %v1731_v59, 0.0  ;;  %v1763_v51 = vmul.f32 0.1, %v1731_v59  ;;  %v1162_v28 = vadd.f32 %v1161_v19, %v1104_v24  ;;  %v1163_v30 = vpop.f32.mrf.mxu3 }
 0x19e   : > { %v1675_v29 = vmax.f32 %v1659_v62, 0.0  ;;  %v1591_v40 = vpop.f32.mrf.mxu1 }
 0x19f   : > { %v1779_v44 = vsel %vm1747_vm12, %v1731_v59, %v1763_v51  ;;  %v1620_v26 = vadd.f32 %v1589_v34, %v1162_v28  ;;  %v1513_v46 = vpop.f32.mrf.mxu0 }
 0x1a0   : > { %v1795_v49 = vpack.c.bf16 %v1779_v44, %v1779_v44  ;;  %1691 = vst.msk [vmem:[%s2999_s16 + $0x28] sm:$0xff] %vm621_vm4, %v1675_v29  ;;  %v1544_v61 = vadd.f32 %v1513_v46, %v1045_v9 }
 0x1a1   : > { %v1712_v31 = vmul.f32 %v2973_v52, %v1620_v26 }
 0x1a2   : > { %1812 = vst.msk [vmem:[%s3006_s19 + $0x14] sm:$0xf] %vm1806_vm7, %v1795_v49  ;;  %v1640_v12 = vmul.f32 %v2980_v35, %v1544_v61 }
 0x1a3   : > { %v1732_v3 = vadd.f32 %v2985_v39, %v1712_v31 }
 0x1a4   : > { %v1660_v21 = vadd.f32 %v2990_v42, %v1640_v12  ;;  %v1106_v20 = vpop.f32.mrf.mxu2 }
 0x1a5   : > { %vm1748_vm13 = vcmp.gt.f32.partialorder %v1732_v3, 0.0  ;;  %v1764_v41 = vmul.f32 0.1, %v1732_v3  ;;  %v1164_v36 = vadd.f32 %v1163_v30, %v1106_v20  ;;  %v1166_v57 = vpop.f32.mrf.mxu3 }
 0x1a6   : > { %v1676_v58 = vmax.f32 %v1660_v21, 0.0  ;;  %v1594_v50 = vpop.f32.mrf.mxu1 }
 0x1a7   : > { %v1780_v15 = vsel %vm1748_vm13, %v1732_v3, %v1764_v41  ;;  %v1621_v1 = vadd.f32 %v1591_v40, %v1164_v36  ;;  %v1515_v5 = vpop.f32.mrf.mxu0 }
 0x1a8   : > { %v1796_v6 = vpack.c.bf16 %v1780_v15, %v1780_v15  ;;  %1692 = vst.msk [vmem:[%s2999_s16 + $0x30] sm:$0xff] %vm621_vm4, %v1676_v58  ;;  %v1545_v54 = vadd.f32 %v1515_v5, %v1047_v53 }
 0x1a9   : > { %v1713_v56 = vmul.f32 %v2973_v52, %v1621_v1 }
 0x1aa   : > { %1813 = vst.msk [vmem:[%s3006_s19 + $0x18] sm:$0xf] %vm1806_vm7, %v1796_v6  ;;  %v1641_v48 = vmul.f32 %v2980_v35, %v1545_v54 }
 0x1ab   : > { %v1733_v32 = vadd.f32 %v2985_v39, %v1713_v56 }
 0x1ac   : > { %v1661_v18 = vadd.f32 %v2990_v42, %v1641_v48  ;;  %v1109_v63 = vpop.f32.mrf.mxu2 }
 0x1ad   : > { %vm1749_vm14 = vcmp.gt.f32.partialorder %v1733_v32, 0.0  ;;  %v1765_v10 = vmul.f32 0.1, %v1733_v32  ;;  %v1167_v43 = vadd.f32 %v1166_v57, %v1109_v63  ;;  %v1168_v38 = vpop.f32.mrf.mxu3 }
 0x1ae   : > { %v1677_v13 = vmax.f32 %v1661_v18, 0.0  ;;  %v1596_v2 = vpop.f32.mrf.mxu1 }
 0x1af   : > { %v1781_v17 = vsel %vm1749_vm14, %v1733_v32, %v1765_v10  ;;  %v1622_v19 = vadd.f32 %v1594_v50, %v1167_v43  ;;  %v1518_v11 = vpop.f32.mrf.mxu0 }
 0x1b0   : > { %v1797_v60 = vpack.c.bf16 %v1781_v17, %v1781_v17  ;;  %1693 = vst.msk [vmem:[%s2999_s16 + $0x38] sm:$0xff] %vm621_vm4, %v1677_v13  ;;  %v1546_v34 = vadd.f32 %v1518_v11, %v2883_v37 }
 0x1b1   : > { %v1714_v23 = vmul.f32 %v2973_v52, %v1622_v19 }
 0x1b2   : > { %1814 = vst.msk [vmem:[%s3006_s19 + $0x1c] sm:$0xf] %vm1806_vm7, %v1797_v60  ;;  %v1642_v33 = vmul.f32 %v2980_v35, %v1546_v34 }
 0x1b3   : > { %v1734_v8 = vadd.f32 %v2985_v39, %v1714_v23 }
 0x1b4   : > { %v1662_v25 = vadd.f32 %v2990_v42, %v1642_v33  ;;  %v1111_v27 = vpop.f32.mrf.mxu2 }
 0x1b5   : > { %vm1750_vm15 = vcmp.gt.f32.partialorder %v1734_v8, 0.0  ;;  %v1766_v14 = vmul.f32 0.1, %v1734_v8  ;;  %v1169_v0 = vadd.f32 %v1168_v38, %v1111_v27  ;;  %v1171_v59 = vpop.f32.mrf.mxu3 }
 0x1b6   : > { %v1678_v62 = vmax.f32 %v1662_v25, 0.0  ;;  %v1599_v24 = vpop.f32.mrf.mxu1 }
 0x1b7   : > { %v1782_v37 = vsel %vm1750_vm15, %v1734_v8, %v1766_v14  ;;  %v1623_v51 = vadd.f32 %v1596_v2, %v1169_v0  ;;  %v1520_v28 = vpop.f32.mrf.mxu0 }
 0x1b8   : > { %v1798_v30 = vpack.c.bf16 %v1782_v37, %v1782_v37  ;;  %1694 = vst.msk [vmem:[%s2999_s16 + $0x40] sm:$0xff] %vm621_vm4, %v1678_v62  ;;  %v1547_v9 = vadd.f32 %v1520_v28, %v2892_v45 }
 0x1b9   : > { %v1715_v29 = vmul.f32 %v2973_v52, %v1623_v51 }
 0x1ba   : > { %1815 = vst.msk [vmem:[%s3006_s19 + $0x20] sm:$0xf] %vm1806_vm7, %v1798_v30  ;;  %v1643_v40 = vmul.f32 %v2980_v35, %v1547_v9 }
 0x1bb   : > { %v1735_v44 = vadd.f32 %v2985_v39, %v1715_v29 }
 0x1bc   : > { %v1663_v26 = vadd.f32 %v2990_v42, %v1643_v40  ;;  %v1114_v46 = vpop.f32.mrf.mxu2 }
 0x1bd   : > { %vm1751_vm0 = vcmp.gt.f32.partialorder %v1735_v44, 0.0  ;;  %v1767_v49 = vmul.f32 0.1, %v1735_v44  ;;  %v1172_v61 = vadd.f32 %v1171_v59, %v1114_v46  ;;  %v1173_v31 = vpop.f32.mrf.mxu3 }
 0x1be   : > { %v1679_v12 = vmax.f32 %v1663_v26, 0.0  ;;  %v1601_v3 = vpop.f32.mrf.mxu1 }
 0x1bf   : > { %v1783_v45 = vsel %vm1751_vm0, %v1735_v44, %v1767_v49  ;;  %v1624_v21 = vadd.f32 %v1599_v24, %v1172_v61  ;;  %v1523_v20 = vpop.f32.mrf.mxu0 }
 0x1c0   : > { %v1799_v41 = vpack.c.bf16 %v1783_v45, %v1783_v45  ;;  %1695 = vst.msk [vmem:[%s2999_s16 + $0x48] sm:$0xff] %vm621_vm4, %v1679_v12  ;;  %v1548_v36 = vadd.f32 %v1523_v20, %v2902_v55 }
 0x1c1   : > { %v1716_v57 = vmul.f32 %v2973_v52, %v1624_v21 }
 0x1c2   : > { %1816 = vst.msk [vmem:[%s3006_s19 + $0x24] sm:$0xf] %vm1806_vm7, %v1799_v41  ;;  %v1644_v53 = vmul.f32 %v2980_v35, %v1548_v36 }
 0x1c3   : > { %v1736_v58 = vadd.f32 %v2985_v39, %v1716_v57 }
 0x1c4   : > { %v1664_v50 = vadd.f32 %v2990_v42, %v1644_v53  ;;  %v1116_v15 = vpop.f32.mrf.mxu2 }
 0x1c5   : > { %vm1752_vm1 = vcmp.gt.f32.partialorder %v1736_v58, 0.0  ;;  %v1768_v1 = vmul.f32 0.1, %v1736_v58  ;;  %v1174_v5 = vadd.f32 %v1173_v31, %v1116_v15  ;;  %v1176_v54 = vpop.f32.mrf.mxu3 }
 0x1c6   : > { %v1680_v6 = vmax.f32 %v1664_v50, 0.0  ;;  %v1604_v18 = vpop.f32.mrf.mxu1 }
 0x1c7   : > { %v1784_v56 = vsel %vm1752_vm1, %v1736_v58, %v1768_v1  ;;  %v1625_v55 = vadd.f32 %v1601_v3, %v1174_v5  ;;  %v1525_v48 = vpop.f32.mrf.mxu0 }
 0x1c8   : > { %v1800_v32 = vpack.c.bf16 %v1784_v56, %v1784_v56  ;;  %1696 = vst.msk [vmem:[%s2999_s16 + $0x50] sm:$0xff] %vm621_vm4, %v1680_v6  ;;  %v1549_v63 = vadd.f32 %v1525_v48, %v2913_v16 }
 0x1c9   : > { %v1717_v10 = vmul.f32 %v2973_v52, %v1625_v55 }
 0x1ca   : > { %1817 = vst.msk [vmem:[%s3006_s19 + $0x28] sm:$0xf] %vm1806_vm7, %v1800_v32  ;;  %v1645_v43 = vmul.f32 %v2980_v35, %v1549_v63 }
 0x1cb   : > { %v1737_v38 = vadd.f32 %v2985_v39, %v1717_v10 }
 0x1cc   : > { %v1665_v13 = vadd.f32 %v2990_v42, %v1645_v43  ;;  %v1119_v2 = vpop.f32.mrf.mxu2 }
 0x1cd   : > { %vm1753_vm2 = vcmp.gt.f32.partialorder %v1737_v38, 0.0  ;;  %v1769_v17 = vmul.f32 0.1, %v1737_v38  ;;  %v1177_v19 = vadd.f32 %v1176_v54, %v1119_v2  ;;  %v1178_v33 = vpop.f32.mrf.mxu3 }
 0x1ce   : > { %v1681_v11 = vmax.f32 %v1665_v13, 0.0  ;;  %v1606_v27 = vpop.f32.mrf.mxu1 }
 0x1cf   : > { %v1785_v60 = vsel %vm1753_vm2, %v1737_v38, %v1769_v17  ;;  %v1626_v34 = vadd.f32 %v1604_v18, %v1177_v19  ;;  %v1528_v23 = vpop.f32.mrf.mxu0 }
 0x1d0   : > { %v1801_v16 = vpack.c.bf16 %v1785_v60, %v1785_v60  ;;  %1697 = vst.msk [vmem:[%s2999_s16 + $0x58] sm:$0xff] %vm621_vm4, %v1681_v11  ;;  %v1550_v8 = vadd.f32 %v1528_v23, %v2930_v7 }
 0x1d1   : > { %v1718_v25 = vmul.f32 %v2973_v52, %v1626_v34 }
 0x1d2   : > { %1818 = vst.msk [vmem:[%s3006_s19 + $0x2c] sm:$0xf] %vm1806_vm7, %v1801_v16  ;;  %v1646_v14 = vmul.f32 %v2980_v35, %v1550_v8 }
 0x1d3   : > { %v1738_v0 = vadd.f32 %v2985_v39, %v1718_v25 }
 0x1d4   : > { %v1666_v59 = vadd.f32 %v2990_v42, %v1646_v14  ;;  %v1121_v62 = vpop.f32.mrf.mxu2 }
 0x1d5   : > { %vm1754_vm3 = vcmp.gt.f32.partialorder %v1738_v0, 0.0  ;;  %v1770_v24 = vmul.f32 0.1, %v1738_v0  ;;  %v1179_v37 = vadd.f32 %v1178_v33, %v1121_v62  ;;  %v1181_v44 = vpop.f32.mrf.mxu3 }
 0x1d6   : > { %v1682_v51 = vmax.f32 %v1666_v59, 0.0  ;;  %v1609_v49 = vpop.f32.mrf.mxu1 }
 0x1d7   : > { %v1786_v28 = vsel %vm1754_vm3, %v1738_v0, %v1770_v24  ;;  %v1627_v7 = vadd.f32 %v1606_v27, %v1179_v37  ;;  %v1530_v30 = vpop.f32.mrf.mxu0 }
 0x1d8   : > { %v1802_v9 = vpack.c.bf16 %v1786_v28, %v1786_v28  ;;  %1698 = vst.msk [vmem:[%s2999_s16 + $0x60] sm:$0xff] %vm621_vm4, %v1682_v51  ;;  %v1551_v29 = vadd.f32 %v1530_v30, %v2940_v4 }
 0x1d9   : > { %v1719_v40 = vmul.f32 %v2973_v52, %v1627_v7 }
 0x1da   : > { %1819 = vst.msk [vmem:[%s3006_s19 + $0x30] sm:$0xf] %vm1806_vm7, %v1802_v9  ;;  %v1647_v26 = vmul.f32 %v2980_v35, %v1551_v29 }
 0x1db   : > { %v1739_v46 = vadd.f32 %v2985_v39, %v1719_v40 }
 0x1dc   : > { %v1667_v61 = vadd.f32 %v2990_v42, %v1647_v26  ;;  %v1124_v31 = vpop.f32.mrf.mxu2 }
 0x1dd   : > { %vm1755_vm5 = vcmp.gt.f32.partialorder %v1739_v46, 0.0  ;;  %v1771_v12 = vmul.f32 0.1, %v1739_v46  ;;  %v1182_v3 = vadd.f32 %v1181_v44, %v1124_v31  ;;  %v1183_v50 = vpop.f32.mrf.mxu3 }
 0x1de   : > { %v1683_v45 = vmax.f32 %v1667_v61, 0.0  ;;  %v1611_v54 = vpop.f32.mrf.mxu1 }
 0x1df   : > { %v1787_v4 = vsel %vm1755_vm5, %v1739_v46, %v1771_v12  ;;  %v1628_v21 = vadd.f32 %v1609_v49, %v1182_v3  ;;  %v1533_v20 = vpop.f32.mrf.mxu0 }
 0x1e0   : > { %v1803_v41 = vpack.c.bf16 %v1787_v4, %v1787_v4  ;;  %1699 = vst.msk [vmem:[%s2999_s16 + $0x68] sm:$0xff] %vm621_vm4, %v1683_v45  ;;  %v1552_v36 = vadd.f32 %v1533_v20, %v2957_v22 }
 0x1e1   : > { %v1720_v57 = vmul.f32 %v2973_v52, %v1628_v21 }
 0x1e2   : > { %1820 = vst.msk [vmem:[%s3006_s19 + $0x34] sm:$0xf] %vm1806_vm7, %v1803_v41  ;;  %v1648_v53 = vmul.f32 %v2980_v35, %v1552_v36 }
 0x1e3   : > { %v1740_v58 = vadd.f32 %v2985_v39, %v1720_v57 }
 0x1e4   : > { %v1668_v15 = vadd.f32 %v2990_v42, %v1648_v53  ;;  %v1126_v1 = vpop.f32.mrf.mxu2 }
 0x1e5   : > { %vm1756_vm6 = vcmp.gt.f32.partialorder %v1740_v58, 0.0  ;;  %v1772_v5 = vmul.f32 0.1, %v1740_v58  ;;  %v1184_v6 = vadd.f32 %v1183_v50, %v1126_v1 }
 0x1e6   : > { %v1684_v56 = vmax.f32 %v1668_v15, 0.0 }
 0x1e7   : > { %v1788_v22 = vsel %vm1756_vm6, %v1740_v58, %v1772_v5  ;;  %v1629_v55 = vadd.f32 %v1611_v54, %v1184_v6  ;;  %v1535_v48 = vpop.f32.mrf.mxu0 }
 0x1e8   : > { %v1804_v32 = vpack.c.bf16 %v1788_v22, %v1788_v22  ;;  %1700 = vst.msk [vmem:[%s2999_s16 + $0x70] sm:$0xff] %vm621_vm4, %v1684_v56  ;;  %v1553_v18 = vadd.f32 %v1535_v48, %v2965_v47 }
 0x1e9   : > { %v1721_v63 = vmul.f32 %v2973_v52, %v1629_v55 }
 0x1ea   : > { %1821 = vst.msk [vmem:[%s3006_s19 + $0x38] sm:$0xf] %vm1806_vm7, %v1804_v32  ;;  %v1649_v10 = vmul.f32 %v2980_v35, %v1553_v18 }
 0x1eb   : > { %v1741_v43 = vadd.f32 %v2985_v39, %v1721_v63 }
 0x1ec   : > { %v1669_v38 = vadd.f32 %v2990_v42, %v1649_v10 }
 0x1ed   : > { %vm1757_vm8 = vcmp.gt.f32.partialorder %v1741_v43, 0.0  ;;  %v1773_v13 = vmul.f32 0.1, %v1741_v43 }
 0x1ee   : > { %v1685_v2 = vmax.f32 %v1669_v38, 0.0 }
 0x1ef   : > { %v1789_v17 = vsel %vm1757_vm8, %v1741_v43, %v1773_v13 }
 0x1f0   : > { %v1805_v19 = vpack.c.bf16 %v1789_v17, %v1789_v17  ;;  %1701 = vst.msk [vmem:[%s2999_s16 + $0x78] sm:$0xff] %vm621_vm4, %v1685_v2 }
 0x1f2   : > { %1822 = vst.msk [vmem:[%s3006_s19 + $0x3c] sm:$0xf] %vm1806_vm7, %v1805_v19 }
 0x1f3 PF: > { %s19_s9 = sadd.s32 1, %s2344_s9   ;;  %s3176_s27 = smov %s2336_s29 }
 0x1f4   : > { %p16_p7 = scmp.ge.s32.totalorder %s19_s9, 6   ;;  %s3177_s28 = smov %s2340_s30 }
 0x1f5   : > { %s3178_s29 = smov %s3181_s10  ;;  %s3179_s30 = smov %s3185_s11 }
 0x1f6   :  { %18 = sbr.rel (!%p16_p7) target bundleno = 3 (0x3), region = 97 }

// kernel: ssh_forward.5
= control target key start
LH: loop header
LB: loop body
LE: loop exit
PB: predicated region body
PF: predicated region fallthrough
CT: control target
= control target key end

     0   :  { %s1819_s15 = smov 0   ;;  %s1821_s16 = smov 0   ;;  %s2377_s0 = inlined_call_operand.vmem [shape: bf16[2,18,18,4], index: 0, kind: input, shape index: {}]   ;;  %s2378_s1 = inlined_call_operand.vmem [shape: bf16[3,12,4], index: 1, kind: input, shape index: {}]   ;;  %s2379_s2 = inlined_call_operand.vmem [shape: f32[1,4], index: 2, kind: input, shape index: {}]   ;;  %s2380_s3 = inlined_call_operand.vmem [shape: f32[1,4], index: 3, kind: input, shape index: {}]   ;;  %s2381_s4 = inlined_call_operand.vmem [shape: f32[2,16,16,4], index: 4, kind: output, shape index: {}]  }
   0x1   :  { %s1823_s17 = smov 0   ;;  %s1825_s18 = smov 0  }
   0x2   :  { %s1827_s19 = smov 0  }
   0x3 LB: > { %s23_s20 = sadd.s32 1, %s1782_s17  ;;  %s26_s21 = sadd.s32 1, %s1786_s18  ;;  %s1790_s19 = sphi %s1827_s19, %s14_s19   ;;  %s1786_s18 = sphi %s1825_s18, %s2385_s18   ;;  %s1782_s17 = sphi %s1823_s17, %s2384_s17   ;;  %s1778_s16 = sphi %s1821_s16, %s2383_s16   ;;  %s1774_s15 = sphi %s1819_s15, %s2382_s15  }
   0x4   : > { %p24_p0 = scmp.ge.s32.totalorder %s23_s20, 2  ;;  %p1477_p1 = scmp.ge.s32.totalorder %s1790_s19, 1 }
   0x5   : > { %p176_p2 = scmp.lt.s32.totalorder %s1790_s19, 5 }
   0x6   : > { %s2387_s20 = smov (%p24_p0, %s23_s20), 0  ;;  %s2389_s21 = smov (!%p24_p0, %s26_s21), %s1786_s18 }
   0x7   : > { %p177_p3 = pnand %p1477_p1, %p176_p2  ;;  %p28_p4 = scmp.ge.s32.totalorder %s2389_s21, 2 }
   0x8   : > { %p207_p5 = scmp.lt.s32.totalorder (!%p177_p3), %s1778_s16, 1  ;;  %s1676_s22 = smul.u32 (!%p177_p3), 96, %s1774_s15 }
   0x9   : > { %s2391_s21 = smov (%p28_p4, %s2389_s21), 0  ;;  %180 = sbr.rel (%p177_p3) target bundleno = 410 (0x19a), region = 36 }
   0xa   : > { %s1792_s28 = smov (!%p177_p3), 8   ;;  %s1793_s29 = smov (!%p177_p3), 4  }
   0xe   : > { %s2393_s16 = smov (!%p207_p5, %s1778_s16), 1  ;;  %vm429_vm0 = vcmask 1046528   ;;  %vm316_vm1 = vsmask.f32 7424  ;;  %vm807_vm2 = vcmask 1045504   ;;  %vm470_vm3 = vcmask 31744  }
   0xf   : > { %s1707_s23 = smul.u32 216, %s2393_s16  ;;  %vm487_vm4 = vcmask 64512   ;;  %vm790_vm5 = vcmask 97280   ;;  %s1481_s25 = sshll.u32 %s2393_s16, 5 }
  0x11   : > { %s211_s26 = scalar_lea.vmem %s2377_s0, %s1707_s23  ;;  %s1479_s23 = sshll.u32 %s1774_s15, 3 }
  0x12   : > { %s1858_s27 = scalar_lea.vmem %s211_s26, %s1676_s22  ;;  %p215_p6 = scmp.lt.s32.totalorder %s1479_s23, 15 }
  0x13   : > { %v1861_v0 = vld [vmem:[%s1858_s27 + $0x54] sm:$0xff]  ;;  %v1540_v1 = vld [vmem:[%s1858_s27 + $0x5c] sm:$0x1]  ;;  %v1865_v2 = vld [vmem:[%s1858_s27] sm:$0xff] }
  0x14   : > { %v588_v3 = vunpack.c.l.b16 %v1540_v1  ;;  %v230_v4 = vld [vmem:[%s1858_s27 + $0x8] sm:$0x1]  ;;  %v1606_v5 = vld [vmem:[%s1858_s27 + $0x20] sm:$0x1]  ;;  %v728_v9 = vrot.slane %v1861_v0, 1  ;;  %v673_v10 = vshll.u32 %v1861_v0, 16 }
  0x15   : > { %v300_v6 = vunpack.c.l.b16 %v230_v4  ;;  %v1009_v7 = vunpack.c.l.b16 %v1606_v5  ;;  %v430_v12 = vrot.slane %v1865_v2, 1  ;;  %v1873_v13 = vld [vmem:[%s1858_s27 + $0x18] sm:$0xff]  ;;  %v1522_v16 = vld [vmem:[%s1858_s27 + $0x14] sm:$0x1]  ;;  %v671_v18 = vshrl.u32 %v1861_v0, 16  ;;  %v1887_v34 = vld [vmem:[%s1858_s27 + $0xc] sm:$0xff] }
  0x16   : > { %v596_v8 = vpack.c.b16 %v588_v3, %v588_v3  ;;  %v675_v19 = vrot.slane %v673_v10, 1  ;;  %v1137_v23 = vrot.slane %v1873_v13, 1  ;;  %v582_v24 = vunpack.c.l.b16 %v1522_v16  ;;  %v1609_v33 = vld [vmem:[%s1858_s27 + $0x2c] sm:$0x1]  ;;  %v1543_v42 = vld [vmem:[%s1858_s27 + $0x68] sm:$0x1] }
  0x17   : > { %v308_v11 = vpack.c.b16 %v300_v6, %v300_v6  ;;  %v1017_v15 = vpack.c.b16 %v1009_v7, %v1009_v7  ;;  %v1028_v26 = vshll.u32 %v1873_v13, 16  ;;  %v318_v27 = vshrl.u32 %v1865_v2, 16  ;;  %v1893_v43 = vld [vmem:[%s1858_s27 + $0x24] sm:$0xff]  ;;  %v1525_v54 = vld [vmem:[%s1858_s27 + $0x20] sm:$0x1]  ;;  %v1914_v4 = vld [vmem:[%s1858_s27 + $0x18] sm:$0xff] }
  0x18   : > { %v729_v14 = vrot.slane %v596_v8, 1  ;;  %v678_v20 = vshll.u32 %v596_v8, 16  ;;  %v320_v28 = vshll.u32 %v1865_v2, 16  ;;  %v676_v29 = vor.u32 %v675_v19, %v671_v18  ;;  %v233_v58 = vld [vmem:[%s1858_s27 + $0x14] sm:$0x1]  ;;  %v1909_v59 = vld [vmem:[%s1858_s27 + $0x60] sm:$0xff] }
  0x19   : > { %v431_v17 = vrot.slane %v308_v11, 1  ;;  %v1138_v25 = vrot.slane %v1017_v15, 1  ;;  %v325_v31 = vshll.u32 %v308_v11, 16  ;;  %v590_v35 = vpack.c.b16 %v582_v24, %v582_v24  ;;  %v1919_v8 = vld [vmem:[%s1858_s27 + $0xc] sm:$0xff]  ;;  %s2395_s23 = smov (!%p215_p6, %s1479_s23), 15 }
  0x1a   : > { %v730_v21 = vsel %vm429_vm0, %v728_v9, %v729_v14  ;;  %v680_v30 = vrot.slane %v678_v20, 1  ;;  %v322_v32 = vrot.slane %v320_v28, 1  ;;  %v1026_v36 = vshrl.u32 %v1873_v13, 16  ;;  %s1480_s24 = sshll.u32 %s2395_s23, 1 }
  0x1b   : > { %746 = vrot.lane.b32.xlu1 %v730_v21, %s1792_s28  ;;  %v432_v22 = vsel %vm429_vm0, %v430_v12, %v431_v17  ;;  %v327_v37 = vrot.slane %v325_v31, 1  ;;  %v1139_v38 = vsel %vm429_vm0, %v1137_v23, %v1138_v25  ;;  %v1030_v39 = vrot.slane %v1028_v26, 1  ;;  %v248_v25 = vld [vmem:[%s1858_s27 + $0x50] sm:$0x1] }
  0x1c   : > { %454 = vrot.lane.b32.xlu0 %v432_v22, %s1792_s28  ;;  %v1033_v40 = vshll.u32 %v1017_v15, 16  ;;  %v323_v41 = vor.u32 %v322_v32, %v318_v27  ;;  %v681_v44 = vsel %vm316_vm1, %v676_v29, %v680_v30  ;;  %v1010_v45 = vunpack.c.l.b16 %v1609_v33  ;;  %v1935_v33 = vld [vmem:[%s1858_s27 + $0x48] sm:$0xff] }
  0x1d   : > { %v710_v47 = vrot.slane %v1887_v34, 1  ;;  %v589_v48 = vunpack.c.l.b16 %v1543_v42  ;;  %v711_v49 = vrot.slane %v590_v35, 1  ;;  %v1031_v50 = vor.u32 %v1030_v39, %v1026_v36 }
  0x1e   : > { %v328_v46 = vsel %vm316_vm1, %v323_v41, %v327_v37  ;;  %v1035_v51 = vrot.slane %v1033_v40, 1  ;;  %v1040_v52 = vshll.u32 %v1893_v43, 16  ;;  %v1902_v53 = vpack.c.b16 %v1010_v45, %v1010_v45 }
  0x1f   : > { %413 = vrot.lane.b32.xlu2 %v328_v46, %s1793_s29  ;;  %v599_v55 = vshrl.u32 %v1887_v34, 16  ;;  %v601_v56 = vshll.u32 %v1887_v34, 16  ;;  %v606_v57 = vshll.u32 %v590_v35, 16  ;;  %v597_v60 = vpack.c.b16 %v589_v48, %v589_v48 }
  0x20   : > { %v712_v63 = vsel %vm429_vm0, %v710_v47, %v711_v49  ;;  %v1038_v1 = vshrl.u32 %v1893_v43, 16  ;;  %v1042_v3 = vrot.slane %v1040_v52, 1  ;;  %v583_v5 = vunpack.c.l.b16 %v1525_v54  ;;  %v1612_v54 = vld [vmem:[%s1858_s27 + $0x38] sm:$0x1] }
  0x21   : > { %v603_v61 = vrot.slane %v601_v56, 1  ;;  %v608_v62 = vrot.slane %v606_v57, 1  ;;  %v1036_v6 = vsel %vm316_vm1, %v1031_v50, %v1035_v51  ;;  %v1045_v7 = vshll.u32 %v1902_v53, 16  ;;  %v1952_v57 = vld [vmem:[%s1858_s27 + $0x30] sm:$0xff] }
  0x22   : > { %v301_v9 = vunpack.c.l.b16 %v233_v58  ;;  %v683_v11 = vshrl.u32 %v1909_v59, 16  ;;  %v685_v12 = vshll.u32 %v1909_v59, 16  ;;  %v731_v14 = vrot.slane %v1909_v59, 1 }
  0x23   : > { %1161 = vrot.lane.b32.xlu1 %v1139_v38, %s1792_s28  ;;  %v604_v10 = vor.u32 %v603_v61, %v599_v55  ;;  %v732_v15 = vrot.slane %v597_v60, 1  ;;  %v690_v17 = vshll.u32 %v597_v60, 16  ;;  %v1043_v18 = vor.u32 %v1042_v3, %v1038_v1 }
  0x24   : > { %706 = vrot.lane.b32.xlu0 %v681_v44, %s1793_s29  ;;  %v591_v19 = vpack.c.b16 %v583_v5, %v583_v5  ;;  %v613_v20 = vshll.u32 %v1914_v4, 16  ;;  %v687_v21 = vrot.slane %v685_v12, 1  ;;  %v1047_v22 = vrot.slane %v1045_v7, 1 }
  0x25   : > { %v609_v16 = vsel %vm316_vm1, %v604_v10, %v608_v62  ;;  %v309_v23 = vpack.c.b16 %v301_v9, %v301_v9  ;;  %v332_v24 = vshll.u32 %v1919_v8, 16  ;;  %v692_v26 = vrot.slane %v690_v17, 1  ;;  %v236_v10 = vld [vmem:[%s1858_s27 + $0x20] sm:$0x1] }
  0x26   : > { %v688_v27 = vor.u32 %v687_v21, %v683_v11  ;;  %v611_v28 = vshrl.u32 %v1914_v4, 16  ;;  %v330_v29 = vshrl.u32 %v1919_v8, 16  ;;  %v733_v30 = vsel %vm429_vm0, %v731_v14, %v732_v15  ;;  %v1964_v11 = vld [vmem:[%s1858_s27 + $0x24] sm:$0xff] }
  0x27   : > { %694 = vrot.lane.b32.xlu2 %v609_v16, %s1793_s29  ;;  %v615_v31 = vrot.slane %v613_v20, 1  ;;  %v618_v32 = vshll.u32 %v591_v19, 16  ;;  %v306_v35 = vunpack.c.l.b16 %v248_v25  ;;  %v1048_v36 = vsel %vm316_vm1, %v1043_v18, %v1047_v22  ;;  %v1972_v22 = vld [vmem:[%s1858_s27 + $0x18] sm:$0xff] }
  0x28   : > { %v334_v37 = vrot.slane %v332_v24, 1  ;;  %v337_v38 = vshll.u32 %v309_v23, 16  ;;  %v693_v39 = vsel %vm316_vm1, %v688_v27, %v692_v26  ;;  %v392_v44 = vshll.u32 %v1935_v33, 16  ;;  %v1615_v26 = vld [vmem:[%s1858_s27 + $0x44] sm:$0x1] }
  0x29   : > { %v616_v40 = vor.u32 %v615_v31, %v611_v28  ;;  %v620_v41 = vrot.slane %v618_v32, 1  ;;  %v314_v42 = vpack.c.b16 %v306_v35, %v306_v35  ;;  %v1140_v47 = vrot.slane %v1893_v43, 1  ;;  %v251_v27 = vld [vmem:[%s1858_s27 + $0x5c] sm:$0x1] }
  0x2a   : > { %v335_v45 = vor.u32 %v334_v37, %v330_v29  ;;  %v339_v46 = vrot.slane %v337_v38, 1  ;;  %v1141_v48 = vrot.slane %v1902_v53, 1  ;;  %v390_v50 = vshrl.u32 %v1935_v33, 16 }
  0x2b   : > { %734 = vrot.lane.b32.xlu1 %v712_v63, %s1792_s28  ;;  %v621_v49 = vsel %vm316_vm1, %v616_v40, %v620_v41  ;;  %v394_v51 = vrot.slane %v392_v44, 1  ;;  %v397_v52 = vshll.u32 %v314_v42, 16  ;;  %v1011_v58 = vunpack.c.l.b16 %v1612_v54  ;;  %v1528_v63 = vld [vmem:[%s1858_s27 + $0x2c] sm:$0x1] }
  0x2c   : > { %1121 = vrot.lane.b32.xlu0 %v1036_v6, %s1793_s29  ;;  %v340_v55 = vsel %vm316_vm1, %v335_v45, %v339_v46  ;;  %v1142_v56 = vsel %vm429_vm0, %v1140_v47, %v1141_v48  ;;  %v713_v61 = vrot.slane %v1914_v4, 1  ;;  %v714_v62 = vrot.slane %v591_v19, 1 }
  0x2d   : > { %v395_v53 = vor.u32 %v394_v51, %v390_v50  ;;  %v399_v60 = vrot.slane %v397_v52, 1  ;;  %v433_v1 = vrot.slane %v1919_v8, 1  ;;  %v434_v3 = vrot.slane %v309_v23, 1 }
  0x2e   : > { %v1052_v5 = vshll.u32 %v1952_v57, 16  ;;  %v1019_v6 = vpack.c.b16 %v1011_v58, %v1011_v58  ;;  %v715_v9 = vsel %vm429_vm0, %v713_v61, %v714_v62  ;;  %v584_v12 = vunpack.c.l.b16 %v1528_v63  ;;  %v239_v58 = vld [vmem:[%s1858_s27 + $0x2c] sm:$0x1] }
  0x2f   : > { %708 = vrot.lane.b32.xlu2 %v693_v39, %s1793_s29  ;;  %v400_v7 = vsel %vm316_vm1, %v395_v53, %v399_v60  ;;  %v435_v14 = vsel %vm429_vm0, %v433_v1, %v434_v3  ;;  %v1050_v15 = vshrl.u32 %v1952_v57, 16  ;;  %v1143_v18 = vrot.slane %v1952_v57, 1  ;;  %v1987_v39 = vld [vmem:[%s1858_s27 + $0x3c] sm:$0xff] }
  0x30   : > { %v1054_v16 = vrot.slane %v1052_v5, 1  ;;  %v1057_v17 = vshll.u32 %v1019_v6, 16  ;;  %v1144_v19 = vrot.slane %v1019_v6, 1  ;;  %v448_v20 = vrot.slane %v1935_v33, 1  ;;  %v2005_v5 = vld [vmem:[%s1858_s27 + $0x24] sm:$0xff] }
  0x31   : > { %v449_v21 = vrot.slane %v314_v42, 1  ;;  %v302_v23 = vunpack.c.l.b16 %v236_v10  ;;  %v1975_v24 = vpack.c.b16 %v584_v12, %v584_v12  ;;  %v625_v25 = vshll.u32 %v1964_v11, 16  ;;  %v1990_v42 = vld [vmem:[%s1858_s27 + $0x54] sm:$0xff] }
  0x32   : > { %v1055_v28 = vor.u32 %v1054_v16, %v1050_v15  ;;  %v1059_v29 = vrot.slane %v1057_v17, 1  ;;  %v1145_v31 = vsel %vm429_vm0, %v1143_v18, %v1144_v19  ;;  %v1012_v40 = vunpack.c.l.b16 %v1615_v26 }
  0x33   : > { %748 = vrot.lane.b32.xlu1 %v733_v30, %s1792_s28  ;;  %v344_v30 = vshll.u32 %v1972_v22, 16  ;;  %v450_v32 = vsel %vm429_vm0, %v448_v20, %v449_v21  ;;  %v310_v35 = vpack.c.b16 %v302_v23, %v302_v23  ;;  %v627_v37 = vrot.slane %v625_v25, 1 }
  0x34   : > { %1123 = vrot.lane.b32.xlu0 %v1048_v36, %s1793_s29  ;;  %v623_v36 = vshrl.u32 %v1964_v11, 16  ;;  %v630_v38 = vshll.u32 %v1975_v24, 16  ;;  %v307_v41 = vunpack.c.l.b16 %v251_v27  ;;  %v1060_v44 = vsel %vm316_vm1, %v1055_v28, %v1059_v29  ;;  %v1531_v28 = vld [vmem:[%s1858_s27 + $0x38] sm:$0x1] }
  0x35   : > { %v342_v45 = vshrl.u32 %v1972_v22, 16  ;;  %v346_v46 = vrot.slane %v344_v30, 1  ;;  %v349_v47 = vshll.u32 %v310_v35, 16  ;;  %v436_v48 = vrot.slane %v1972_v22, 1 }
  0x36   : > { %v628_v50 = vor.u32 %v627_v37, %v623_v36  ;;  %v632_v51 = vrot.slane %v630_v38, 1  ;;  %v1020_v52 = vpack.c.b16 %v1012_v40, %v1012_v40  ;;  %v1064_v54 = vshll.u32 %v1987_v39, 16  ;;  %v1624_v38 = vld [vmem:[%s1858_s27 + $0x68] sm:$0x1] }
  0x37   : > { %1163 = vrot.lane.b32.xlu2 %v1142_v56, %s1792_s28  ;;  %v404_v56 = vshll.u32 %v1990_v42, 16  ;;  %v347_v53 = vor.u32 %v346_v46, %v342_v45  ;;  %v351_v60 = vrot.slane %v349_v47, 1  ;;  %v1062_v62 = vshrl.u32 %v1987_v39, 16  ;;  %v1618_v46 = vld [vmem:[%s1858_s27 + $0x50] sm:$0x1]  ;;  %v2032_v47 = vld [vmem:[%s1858_s27 + $0x60] sm:$0xff] }
  0x38   : > { %v1066_v63 = vrot.slane %v1064_v54, 1  ;;  %v1069_v1 = vshll.u32 %v1020_v52, 16  ;;  %v402_v3 = vshrl.u32 %v1990_v42, 16  ;;  %v303_v6 = vunpack.c.l.b16 %v239_v58  ;;  %v2040_v58 = vld [vmem:[%s1858_s27 + $0x48] sm:$0xff] }
  0x39   : > { %v352_v12 = vsel %vm316_vm1, %v347_v53, %v351_v60  ;;  %v356_v17 = vshll.u32 %v2005_v5, 16  ;;  %v716_v20 = vrot.slane %v1964_v11, 1  ;;  %v717_v21 = vrot.slane %v1975_v24, 1 }
  0x3a   : > { %v1071_v15 = vrot.slane %v1069_v1, 1  ;;  %v311_v16 = vpack.c.b16 %v303_v6, %v303_v6  ;;  %v354_v25 = vshrl.u32 %v2005_v5, 16  ;;  %v1146_v36 = vrot.slane %v1987_v39, 1  ;;  %v242_v6 = vld [vmem:[%s1858_s27 + $0x38] sm:$0x1] }
  0x3b   : > { %696 = vrot.lane.b32.xlu1 %v621_v49, %s1793_s29  ;;  %v437_v49 = vrot.slane %v310_v35, 1  ;;  %v358_v26 = vrot.slane %v356_v17, 1  ;;  %v718_v30 = vsel %vm429_vm0, %v716_v20, %v717_v21  ;;  %v1147_v37 = vrot.slane %v1020_v52, 1 }
  0x3c   : > { %415 = vrot.lane.b32.xlu0 %v340_v55, %s1793_s29  ;;  %v315_v55 = vpack.c.b16 %v307_v41, %v307_v41  ;;  %v361_v27 = vshll.u32 %v311_v16, 16  ;;  %v451_v40 = vrot.slane %v1990_v42, 1  ;;  %v1100_v60 = vshll.u32 %v2032_v47, 16 }
  0x3d   : > { %v438_v61 = vsel %vm429_vm0, %v436_v48, %v437_v49  ;;  %v359_v24 = vor.u32 %v358_v26, %v354_v25  ;;  %v1015_v48 = vunpack.c.l.b16 %v1624_v38  ;;  %v440_v1 = vrot.slane %v311_v16, 1  ;;  %v2057_v16 = vld [vmem:[%s1858_s27 + $0x3c] sm:$0xff] }
  0x3e   : > { %v409_v10 = vshll.u32 %v315_v55, 16  ;;  %v363_v35 = vrot.slane %v361_v27, 1  ;;  %v452_v41 = vrot.slane %v315_v55, 1  ;;  %v1013_v55 = vunpack.c.l.b16 %v1618_v46 }
  0x3f   : > { %456 = vrot.lane.b32.xlu2 %v435_v14, %s1792_s28  ;;  %v1067_v14 = vor.u32 %v1066_v63, %v1062_v62  ;;  %v2042_v53 = vpack.c.b16 %v1015_v48, %v1015_v48  ;;  %v439_v63 = vrot.slane %v2005_v5, 1  ;;  %v304_v21 = vunpack.c.l.b16 %v242_v6 }
  0x40   : > { %v411_v19 = vrot.slane %v409_v10, 1  ;;  %v364_v49 = vsel %vm316_vm1, %v359_v24, %v363_v35  ;;  %v1076_v10 = vshll.u32 %v2040_v58, 16  ;;  %v1074_v26 = vshrl.u32 %v2040_v58, 16  ;;  %v1685_v24 = vld [vmem:[%s2378_s1] sm:$0x30] }
  0x41   : > { %v1072_v23 = vsel %vm316_vm1, %v1067_v14, %v1071_v15  ;;  %v1098_v14 = vshrl.u32 %v2032_v47, 16  ;;  %v1102_v15 = vrot.slane %v1100_v60, 1  ;;  %v1105_v17 = vshll.u32 %v2042_v53, 16 }
  0x42   : > { %v1078_v27 = vrot.slane %v1076_v10, 1 }
  0x43   : > { %425 = vrot.lane.b32.xlu1 %v400_v7, %s1793_s29  ;;  %v633_v7 = vsel %vm316_vm1, %v628_v50, %v632_v51  ;;  %v1148_v50 = vsel %vm429_vm0, %v1146_v36, %v1147_v37  ;;  %v453_v51 = vsel %vm429_vm0, %v451_v40, %v452_v41  ;;  %v1103_v35 = vor.u32 %v1102_v15, %v1098_v14 }
  0x44   : > { %736 = vrot.lane.b32.xlu0 %v715_v9, %s1792_s28  ;;  %v406_v9 = vrot.slane %v404_v56, 1  ;;  %v1107_v36 = vrot.slane %v1105_v17, 1  ;;  %v649_v40 = vshll.u32 %v2057_v16, 16  ;;  %v2076_v41 = vpack.c.b16 %v304_v21, %v304_v21 }
  0x45   : > { %v1079_v46 = vor.u32 %v1078_v27, %v1074_v26 }
  0x46   : > { %v407_v18 = vor.u32 %v406_v9, %v402_v3  ;;  %v1534_v3 = vld [vmem:[%s1858_s27 + $0x44] sm:$0x1] }
  0x47   : > { %1125 = vrot.lane.b32.xlu2 %v1060_v44, %s1793_s29  ;;  %v586_v20 = vunpack.c.l.b16 %v1534_v3  ;;  %v1580_v3 = vld [vmem:[%s2378_s1 + $0x8] sm:$0xf] }
  0x48   : > { %v412_v29 = vsel %vm316_vm1, %v407_v18, %v411_v19  ;;  %v441_v19 = vsel %vm429_vm0, %v439_v63, %v440_v1  ;;  %v373_v63 = vshll.u32 %v2076_v41, 16 }
  0x49   : > { %v2073_v38 = vpack.c.b16 %v586_v20, %v586_v20 }
  0x4a   : > { %v375_v17 = vrot.slane %v373_v63, 1 }
  0x4b   : > { %1165 = vrot.lane.b32.xlu1 %v1145_v31, %s1792_s28  ;;  %v2022_v31 = vld [vmem:[%s1858_s27 + $0x30] sm:$0xff] }
  0x4c   : > { %466 = vrot.lane.b32.xlu0 %v450_v32, %s1792_s28  ;;  %v585_v32 = vunpack.c.l.b16 %v1531_v28  ;;  %v637_v44 = vshll.u32 %v2022_v31, 16  ;;  %v635_v52 = vshrl.u32 %v2022_v31, 16 }
  0x4e   : > { %v593_v45 = vpack.c.b16 %v585_v32, %v585_v32  ;;  %v639_v54 = vrot.slane %v637_v44, 1 }
  0x4f   : > { %417 = vrot.lane.b32.xlu2 %v352_v12, %s1793_s29  ;;  %v1021_v12 = vpack.c.b16 %v1013_v55, %v1013_v55  ;;  %v654_v55 = vshll.u32 %v2073_v38, 16 }
  0x50   : > { %v642_v56 = vshll.u32 %v593_v45, 16  ;;  %v720_v62 = vrot.slane %v593_v45, 1  ;;  %v1621_v45 = vld [vmem:[%s1858_s27 + $0x5c] sm:$0x1] }
  0x51   : > { %v1081_v28 = vshll.u32 %v1021_v12, 16  ;;  %v1150_v32 = vrot.slane %v1021_v12, 1  ;;  %v1014_v60 = vunpack.c.l.b16 %v1621_v45  ;;  %v656_v10 = vrot.slane %v654_v55, 1 }
  0x52   : > { %v644_v9 = vrot.slane %v642_v56, 1  ;;  %v651_v56 = vrot.slane %v649_v40, 1  ;;  %v723_v45 = vrot.slane %v2073_v38, 1 }
  0x53   : > { %458 = vrot.lane.b32.xlu1 %v438_v61, %s1792_s28  ;;  %v719_v61 = vrot.slane %v2022_v31, 1  ;;  %v1083_v48 = vrot.slane %v1081_v28, 1  ;;  %v2101_v12 = vpack.c.b16 %v1014_v60, %v1014_v60  ;;  %v1627_v28 = vld [vmem:[%s1858_s27 + $0x74] sm:$0x1]  ;;  %v245_v60 = vld [vmem:[%s1858_s27 + $0x44] sm:$0x1] }
  0x54   : > { %698 = vrot.lane.b32.xlu0 %v633_v7, %s1793_s29  ;;  %v640_v7 = vor.u32 %v639_v54, %v635_v52  ;;  %v2085_v52 = vld [vmem:[%s1858_s27 + $0x54] sm:$0xff]  ;;  %v647_v54 = vshrl.u32 %v2057_v16, 16 }
  0x55   : > { %v721_v18 = vsel %vm429_vm0, %v719_v61, %v720_v62  ;;  %v1084_v1 = vsel %vm316_vm1, %v1079_v46, %v1083_v48  ;;  %v1088_v6 = vshll.u32 %v2085_v52, 16  ;;  %v1086_v21 = vshrl.u32 %v2085_v52, 16  ;;  %v1537_v48 = vld [vmem:[%s1858_s27 + $0x50] sm:$0x1] }
  0x56   : > { %v645_v25 = vsel %vm316_vm1, %v640_v7, %v644_v9  ;;  %v1694_v7 = vld [vmem:[%s2378_s1 + $0x8] sm:$0x30]  ;;  %v652_v9 = vor.u32 %v651_v56, %v647_v54  ;;  %v1093_v27 = vshll.u32 %v2101_v12, 16 }
  0x57   : > { %738 = vrot.lane.b32.xlu2 %v718_v30, %s1792_s28  ;;  %v1149_v30 = vrot.slane %v2040_v58, 1  ;;  %v1581_v14 = vor.u32 %v1694_v7, %v1580_v3 }
  0x58   : > { %v657_v26 = vsel %vm316_vm1, %v652_v9, %v656_v10  ;;  %v1095_v40 = vrot.slane %v1093_v27, 1  ;;  %v1152_v9 = vrot.slane %v2085_v52, 1  ;;  %v1153_v10 = vrot.slane %v2101_v12, 1 }
  0x59   : > { %v809_v20 = vsel %vm807_vm2, %v1581_v14, 0  ;;  %v2148_v14 = vld [vmem:[%s1858_s27 + $0x3c] sm:$0xff] }
  0x5a   : > { %1704 = vmatpush.bf16.msra.mxu3 %v809_v20  ;;  %818 = vmatpush.bf16.msra.mxu0 %v809_v20  ;;  %v1154_v27 = vsel %vm429_vm0, %v1152_v9, %v1153_v10 }
  0x5b   : > { %1127 = vrot.lane.b32.xlu1 %v1072_v23, %s1793_s29  ;;  %v2060_v23 = vld [vmem:[%s1858_s27 + $0x30] sm:$0xff] }
  0x5c   : > { %427 = vrot.lane.b32.xlu0 %v412_v29, %s1793_s29  ;;  %v1592_v29 = vld [vmem:[%s2378_s1] sm:$0xf]  ;;  %v368_v44 = vshll.u32 %v2060_v23, 16  ;;  %v366_v61 = vshrl.u32 %v2060_v23, 16 }
  0x5d   : > { %v1593_v37 = vor.u32 %v1685_v24, %v1592_v29 }
  0x5e   : > { %v370_v62 = vrot.slane %v368_v44, 1  ;;  %v722_v44 = vrot.slane %v2057_v16, 1 }
  0x5f   : > { %468 = vrot.lane.b32.xlu2 %v453_v51, %s1792_s28  ;;  %v1108_v51 = vsel %vm316_vm1, %v1103_v35, %v1107_v36  ;;  %v2121_v36 = vld [vmem:[%s1858_s27 + $0x6c] sm:$0xff] }
  0x60   : > { %v371_v15 = vor.u32 %v370_v62, %v366_v61  ;;  %v724_v38 = vsel %vm429_vm0, %v722_v44, %v723_v45  ;;  %v2139_v61 = vld [vmem:[%s1858_s27 + $0x48] sm:$0xff]  ;;  %v587_v62 = vunpack.c.l.b16 %v1537_v48 }
  0x62   : > { %v376_v29 = vsel %vm316_vm1, %v371_v15, %v375_v17  ;;  %v305_v15 = vunpack.c.l.b16 %v245_v60  ;;  %v595_v17 = vpack.c.b16 %v587_v62, %v587_v62 }
  0x63   : > { %419 = vrot.lane.b32.xlu1 %v364_v49, %s1793_s29  ;;  %v882_v49 = vsel %vm807_vm2, %v1593_v37, 0  ;;  %v1016_v37 = vunpack.c.l.b16 %v1627_v28  ;;  %v659_v28 = vshrl.u32 %v2139_v61, 16 }
  0x64   : > { %1167 = vrot.lane.b32.xlu0 %v1148_v50, %s1792_s28  ;;  %891 = vmatpush.bf16.msra.mxu1 %v882_v49  ;;  %v1151_v50 = vsel %vm429_vm0, %v1149_v30, %v1150_v32  ;;  %v1703_v32 = vld [vmem:[%s2378_s1 + $0x10] sm:$0x30]  ;;  %v313_v12 = vpack.c.b16 %v305_v15, %v305_v15 }
  0x65   : > { %1705 = vmatpush.bf16.msrb.mxu3 %v882_v49  ;;  %v442_v49 = vrot.slane %v2060_v23, 1  ;;  %v1024_v56 = vpack.c.b16 %v1016_v37, %v1016_v37 }
  0x66   : > { %v446_v44 = vrot.slane %v313_v12, 1 }
  0x67   : > { %700 = vrot.lane.b32.xlu2 %v645_v25, %s1793_s29  ;;  %v1090_v25 = vrot.slane %v1088_v6, 1  ;;  %v1117_v3 = vshll.u32 %v1024_v56, 16  ;;  %v1158_v6 = vrot.slane %v2121_v36, 1  ;;  %v1159_v7 = vrot.slane %v1024_v56, 1 }
  0x69   : > { %v1091_v35 = vor.u32 %v1090_v25, %v1086_v21  ;;  %v1119_v20 = vrot.slane %v1117_v3, 1  ;;  %v380_v21 = vshll.u32 %v2148_v14, 16 }
  0x6b   : > { %740 = vrot.lane.b32.xlu1 %v721_v18, %s1792_s28  ;;  %v1155_v18 = vrot.slane %v2032_v47, 1  ;;  %v1096_v55 = vsel %vm316_vm1, %v1091_v35, %v1095_v40  ;;  %v385_v35 = vshll.u32 %v313_v12, 16  ;;  %v445_v40 = vrot.slane %v2148_v14, 1 }
  0x6c   : > { %460 = vrot.lane.b32.xlu0 %v441_v19, %s1792_s28  ;;  %v1156_v19 = vrot.slane %v2042_v53, 1  ;;  %v1664_v53 = vld [vmem:[%s2378_s1 + $0x10] sm:$0xf] }
  0x6d   : > { %v1665_v24 = vor.u32 %v1703_v32, %v1664_v53  ;;  %v378_v32 = vshrl.u32 %v2148_v14, 16  ;;  %v447_v60 = vsel %vm429_vm0, %v445_v40, %v446_v44 }
  0x6e   : > { %v1157_v30 = vsel %vm429_vm0, %v1155_v18, %v1156_v19  ;;  %v661_v18 = vshll.u32 %v2139_v61, 16 }
  0x6f   : > { %1129 = vrot.lane.b32.xlu2 %v1084_v1, %s1793_s29  ;;  %v2128_v46 = vsel %vm807_vm2, %v1665_v24, 0  ;;  %v1110_v1 = vshrl.u32 %v2121_v36, 16  ;;  %v382_v24 = vrot.slane %v380_v21, 1 }
  0x70   : > { %1243 = vmatpush.bf16.msra.mxu2 %v2128_v46 }
  0x73   : > { %1169 = vrot.lane.b32.xlu1 %v1151_v50, %s1792_s28  ;;  %v443_v50 = vrot.slane %v2076_v41, 1 }
  0x74   : > { %1133 = vrot.lane.b32.xlu0 %v1108_v51, %s1793_s29  ;;  %v1112_v51 = vshll.u32 %v2121_v36, 16 }
  0x75   : > { %v444_v63 = vsel %vm429_vm0, %v442_v49, %v443_v50  ;;  %v383_v50 = vor.u32 %v382_v24, %v378_v32 }
  0x76   : > { %v1114_v41 = vrot.slane %v1112_v51, 1  ;;  %v387_v51 = vrot.slane %v385_v35, 1 }
  0x77   : > { %1173 = vrot.lane.b32.xlu2 %v1157_v30, %s1792_s28  ;;  %v666_v30 = vshll.u32 %v595_v17, 16 }
  0x78   : > { %v1115_v19 = vor.u32 %v1114_v41, %v1110_v1  ;;  %v726_v1 = vrot.slane %v595_v17, 1 }
  0x79   : > { %v414_v54 = vpop.permute.xlu2 %413  ;;  %v668_v49 = vrot.slane %v666_v30, 1 }
  0x7a   : > { %v1120_v53 = vsel %vm316_vm1, %v1115_v19, %v1119_v20  ;;  %v472_v37 = vsel %vm470_vm3, %v1865_v2, %v414_v54  ;;  %v388_v54 = vsel %vm316_vm1, %v383_v50, %v387_v51 }
  0x7b   : > { %702 = vrot.lane.b32.xlu1 %v657_v26, %s1793_s29  ;;  %v1160_v26 = vsel %vm429_vm0, %v1158_v6, %v1159_v7 }
  0x7c   : > { %421 = vrot.lane.b32.xlu0 %v376_v29, %s1793_s29  ;;  %v663_v29 = vrot.slane %v661_v18, 1 }
  0x7e   : > { %v664_v48 = vor.u32 %v663_v29, %v659_v28 }
  0x7f   : > { %462 = vrot.lane.b32.xlu2 %v444_v63, %s1792_s28  ;;  %v725_v63 = vrot.slane %v2139_v61, 1 }
  0x80   : > { %v669_v2 = vsel %vm316_vm1, %v664_v48, %v668_v49 }
  0x81   : > { %v695_v25 = vpop.permute.xlu2 %694  ;;  %v727_v9 = vsel %vm429_vm0, %v725_v63, %v726_v1 }
  0x82   : > { %v751_v10 = vsel %vm470_vm3, %v1887_v34, %v695_v25 }
  0x83   : > { %1131 = vrot.lane.b32.xlu1 %v1096_v55, %s1793_s29 }
  0x84   : > { %742 = vrot.lane.b32.xlu0 %v724_v38, %s1792_s28 }
  0x87   : > { %1135 = vrot.lane.b32.xlu2 %v1120_v53, %s1793_s29 }
  0x89   : > { %v709_v55 = vpop.permute.xlu2 %708 }
  0x8b   : > { %1175 = vrot.lane.b32.xlu1 %v1160_v26, %s1792_s28 }
  0x8c   : > { %1171 = vrot.lane.b32.xlu0 %v1154_v27, %s1792_s28 }
  0x8d   : > { %v747_v45 = vpop.permute.xlu1 %746 }
  0x8e   : > { %v455_v56 = vpop.permute.xlu0 %454 }
  0x8f   : > { %v489_v38 = vsel %vm487_vm4, %v472_v37, %v455_v56  ;;  %423 = vrot.lane.b32.xlu2 %v388_v54, %s1793_s29 }
  0x90   : > { %1594 = vmatmul.msk.bf16.vlgmr.msra.gmra.mxu1 %vm790_vm5, %v489_v38 }
  0x91   : > { %v1164_v3 = vpop.permute.xlu2 %1163 }
  0x93   : > { %464 = vrot.lane.b32.xlu1 %v447_v60, %s1792_s28 }
  0x94   : > { %704 = vrot.lane.b32.xlu0 %v669_v2, %s1793_s29 }
  0x95   : > { %v1162_v62 = vpop.permute.xlu1 %1161 }
  0x96   : > { %v707_v41 = vpop.permute.xlu0 %706 }
  0x97   : > { %v763_v6 = vsel %vm470_vm3, %v1861_v0, %v707_v41  ;;  %744 = vrot.lane.b32.xlu2 %v727_v9, %s1792_s28  ;;  %s219_s28 = sadd.s32 %s1481_s25, %s1480_s24 }
  0x98   : > { %v779_v7 = vsel %vm487_vm4, %v763_v6, %v747_v45  ;;  %s1482_s15 = sshll.u32 %s219_s28, 3 }
  0x99   : > { %1588 = vmatmul.msk.bf16.vlgmr.msra.gmra.mxu3 %vm790_vm5, %v779_v7  ;;  %v457_v19 = vpop.permute.xlu2 %456  ;;  %s2290_s6 = scalar_lea.vmem %s2381_s4, %s1482_s15 }
  0x9a   : > { %1706 = vmatpush.bf16.msra.mxu3 %v2128_v46  ;;  %v765_v46 = vsel %vm470_vm3, %v1909_v59, %v709_v55 }
  0x9d   : > { %v735_v15 = vpop.permute.xlu1 %734 }
  0x9e   : > { %v1122_v17 = vpop.permute.xlu0 %1121  ;;  %v767_v18 = vsel %vm487_vm4, %v751_v10, %v735_v15 }
  0x9f   : > { %v1178_v0 = vsel %vm470_vm3, %v1873_v13, %v1122_v17  ;;  %1582 = vmatmul.msk.bf16.vlgmr.msra.gmra.mxu0 %vm790_vm5, %v767_v18 }
  0xa0   : > { %v1194_v20 = vsel %vm487_vm4, %v1178_v0, %v1162_v62 }
  0xa1   : > { %1666 = vmatmul.msk.bf16.vlgmr.msra.gmra.mxu2 %vm790_vm5, %v1194_v20  ;;  %v1126_v25 = vpop.permute.xlu2 %1125 }
  0xa5   : > { %v749_v21 = vpop.permute.xlu1 %748 }
  0xa6   : > { %v1124_v26 = vpop.permute.xlu0 %1123  ;;  %v781_v34 = vsel %vm487_vm4, %v765_v46, %v749_v21 }
  0xa7   : > { %v1180_v27 = vsel %vm470_vm3, %v1893_v43, %v1124_v26 }
  0xa8   : > { %v1196_v59 = vsel %vm487_vm4, %v1180_v27, %v1164_v3 }
  0xa9   : > { %1589 = vmatmul.msk.bf16.gmra.mxu3 %vm790_vm5, %v781_v34  ;;  %v418_v28 = vpop.permute.xlu2 %417 }
  0xad   : > { %v697_v13 = vpop.permute.xlu1 %696 }
  0xae   : > { %v416_v12 = vpop.permute.xlu0 %415  ;;  %v753_v32 = vsel %vm470_vm3, %v1914_v4, %v697_v13  ;;  %v476_v4 = vsel %vm470_vm3, %v1972_v22, %v418_v28 }
  0xaf   : > { %v474_v29 = vsel %vm470_vm3, %v1919_v8, %v416_v12  ;;  %v1182_v8 = vsel %vm470_vm3, %v1952_v57, %v1126_v25 }
  0xb0   : > { %v491_v30 = vsel %vm487_vm4, %v474_v29, %v457_v19 }
  0xb1   : > { %1595 = vmatmul.msk.bf16.gmra.mxu1 %vm790_vm5, %v491_v30  ;;  %1667 = vmatmul.msk.bf16.gmra.mxu2 %vm790_vm5, %v1196_v59  ;;  %v739_v43 = vpop.permute.xlu2 %738 }
  0xb5   : > { %v426_v53 = vpop.permute.xlu1 %425 }
  0xb6   : > { %v737_v24 = vpop.permute.xlu0 %736  ;;  %v484_v40 = vsel %vm470_vm3, %v1935_v33, %v426_v53 }
  0xb7   : > { %v769_v35 = vsel %vm487_vm4, %v753_v32, %v737_v24 }
  0xb8   : > { %1583 = vmatmul.msk.bf16.gmra.mxu0 %vm790_vm5, %v769_v35 }
  0xb9   : > { %v469_v49 = vpop.permute.xlu2 %468 }
  0xbd   : > { %v1166_v37 = vpop.permute.xlu1 %1165 }
  0xbe   : > { %v467_v44 = vpop.permute.xlu0 %466  ;;  %v1198_v45 = vsel %vm487_vm4, %v1182_v8, %v1166_v37 }
  0xbf   : > { %v501_v48 = vsel %vm487_vm4, %v484_v40, %v467_v44  ;;  %v2281_v44 = vld [vmem:[%s2380_s3] ss:$0 sm:$0xff] }
  0xc0   : > { %1600 = vmatmul.msk.bf16.vlgmr.msrb.gmra.mxu3 %vm790_vm5, %v501_v48 }
  0xc1   : > { %1668 = vmatmul.msk.bf16.gmra.mxu2 %vm790_vm5, %v1198_v45  ;;  %v701_v55 = vpop.permute.xlu2 %700 }
  0xc2   : > { %v757_v41 = vsel %vm470_vm3, %v2022_v31, %v701_v55 }
  0xc5   : > { %v459_v50 = vpop.permute.xlu1 %458 }
  0xc6   : > { %v699_v51 = vpop.permute.xlu0 %698  ;;  %v493_v57 = vsel %vm487_vm4, %v476_v4, %v459_v50 }
  0xc7   : > { %v755_v33 = vsel %vm470_vm3, %v1964_v11, %v699_v51  ;;  %1596 = vmatmul.msk.bf16.gmra.mxu1 %vm790_vm5, %v493_v57 }
  0xc8   : > { %v771_v56 = vsel %vm487_vm4, %v755_v33, %v739_v43 }
  0xc9   : > { %1584 = vmatmul.msk.bf16.gmra.mxu0 %vm790_vm5, %v771_v56  ;;  %v1130_v54 = vpop.permute.xlu2 %1129 }
  0xca   : > { %v1186_v10 = vsel %vm470_vm3, %v2040_v58, %v1130_v54 }
  0xcd   : > { %v1128_v38 = vpop.permute.xlu1 %1127 }
  0xce   : > { %v428_v60 = vpop.permute.xlu0 %427  ;;  %v1184_v11 = vsel %vm470_vm3, %v1987_v39, %v1128_v38 }
  0xcf   : > { %v486_v2 = vsel %vm470_vm3, %v1990_v42, %v428_v60 }
  0xd0   : > { %v503_v22 = vsel %vm487_vm4, %v486_v2, %v469_v49 }
  0xd1   : > { %1601 = vmatmul.msk.bf16.gmra.mxu3 %vm790_vm5, %v503_v22  ;;  %v1174_v6 = vpop.permute.xlu2 %1173 }
  0xd5   : > { %v420_v62 = vpop.permute.xlu1 %419 }
  0xd6   : > { %v1168_v63 = vpop.permute.xlu0 %1167  ;;  %v478_v42 = vsel %vm470_vm3, %v2005_v5, %v420_v62 }
  0xd7   : > { %v1200_v1 = vsel %vm487_vm4, %v1184_v11, %v1168_v63 }
  0xd8   : > { %1669 = vmatmul.msk.bf16.gmra.mxu2 %vm790_vm5, %v1200_v1 }
  0xd9   : > { %v463_v5 = vpop.permute.xlu2 %462 }
  0xdd   : > { %v741_v3 = vpop.permute.xlu1 %740 }
  0xde   : > { %v461_v7 = vpop.permute.xlu0 %460  ;;  %v773_v9 = vsel %vm487_vm4, %v757_v41, %v741_v3 }
  0xdf   : > { %1585 = vmatmul.msk.bf16.gmra.mxu0 %vm790_vm5, %v773_v9  ;;  %v495_v39 = vsel %vm487_vm4, %v478_v42, %v461_v7 }
  0xe0   : > { %1597 = vmatmul.msk.bf16.gmra.mxu1 %vm790_vm5, %v495_v39 }
  0xe1   : > { %v1136_v21 = vpop.permute.xlu2 %1135 }
  0xe2   : > { %v1192_v13 = vsel %vm470_vm3, %v2121_v36, %v1136_v21 }
  0xe5   : > { %v1170_v15 = vpop.permute.xlu1 %1169 }
  0xe6   : > { %v1134_v17 = vpop.permute.xlu0 %1133  ;;  %v1202_v31 = vsel %vm487_vm4, %v1186_v10, %v1170_v15 }
  0xe7   : > { %v1190_v18 = vsel %vm470_vm3, %v2032_v47, %v1134_v17 }
  0xe8   : > { %v1206_v19 = vsel %vm487_vm4, %v1190_v18, %v1174_v6  ;;  %1670 = vmatmul.msk.bf16.gmra.mxu2 %vm790_vm5, %v1202_v31 }
  0xe9   : > { %1672 = vmatmul.msk.bf16.vlgmr.msra.gmra.mxu3 %vm790_vm5, %v1206_v19  ;;  %v424_v27 = vpop.permute.xlu2 %423 }
  0xed   : > { %v703_v0 = vpop.permute.xlu1 %702 }
  0xee   : > { %v422_v20 = vpop.permute.xlu0 %421  ;;  %v759_v47 = vsel %vm470_vm3, %v2057_v16, %v703_v0  ;;  %v482_v16 = vsel %vm470_vm3, %v2148_v14, %v424_v27 }
  0xef   : > { %v480_v46 = vsel %vm470_vm3, %v2060_v23, %v422_v20 }
  0xf0   : > { %v497_v58 = vsel %vm487_vm4, %v480_v46, %v463_v5 }
  0xf1   : > { %1598 = vmatmul.msk.bf16.gmra.mxu1 %vm790_vm5, %v497_v58  ;;  %v745_v36 = vpop.permute.xlu2 %744 }
  0xf5   : > { %v1132_v26 = vpop.permute.xlu1 %1131 }
  0xf6   : > { %v743_v34 = vpop.permute.xlu0 %742  ;;  %v1188_v23 = vsel %vm470_vm3, %v2085_v52, %v1132_v26 }
  0xf7   : > { %v775_v25 = vsel %vm487_vm4, %v759_v47, %v743_v34 }
  0xf8   : > { %1586 = vmatmul.msk.bf16.gmra.mxu0 %vm790_vm5, %v775_v25 }
  0xfd   : > { %v1176_v12 = vpop.permute.xlu1 %1175 }
  0xfe   : > { %v1172_v28 = vpop.permute.xlu0 %1171  ;;  %v1208_v29 = vsel %vm487_vm4, %v1192_v13, %v1176_v12 }
  0xff   : > { %v1204_v30 = vsel %vm487_vm4, %v1188_v23, %v1172_v28  ;;  %1673 = vmatmul.msk.bf16.gmra.mxu3 %vm790_vm5, %v1208_v29 }
 0x100   : > { %1671 = vmatmul.msk.bf16.gmra.mxu2 %vm790_vm5, %v1204_v30 }
 0x105   : > { %v465_v59 = vpop.permute.xlu1 %464 }
 0x106   : > { %v705_v53 = vpop.permute.xlu0 %704  ;;  %v499_v32 = vsel %vm487_vm4, %v482_v16, %v465_v59 }
 0x107   : > { %v761_v52 = vsel %vm470_vm3, %v2139_v61, %v705_v53  ;;  %1599 = vmatmul.msk.bf16.gmra.mxu1 %vm790_vm5, %v499_v32  ;;  %v2276_v61 = vld [vmem:[%s2379_s2] ss:$0 sm:$0xff] }
 0x108   : > { %v777_v24 = vsel %vm487_vm4, %v761_v52, %v745_v36 }
 0x109   : > { %1587 = vmatmul.msk.bf16.gmra.mxu0 %vm790_vm5, %v777_v24 }
 0x10d   : > { %v893_v35 = vpop.f32.mrf.mxu1 }
 0x115   : > { %v895_v50 = vpop.f32.mrf.mxu1 }
 0x11c   : > { %v820_v43 = vpop.f32.mrf.mxu0  ;;  %v2270_v14 = vpop.f32.mrf.mxu3 }
 0x11d   : > { %v894_v8 = vadd.f32 %v893_v35, %v820_v43 }
 0x124   : > { %v1245_v37 = vpop.f32.mrf.mxu2  ;;  %v822_v48 = vpop.f32.mrf.mxu0 }
 0x125   : > { %v1285_v40 = vadd.f32 %v1245_v37, %v894_v8  ;;  %v2284_v49 = vpop.f32.mrf.mxu3  ;;  %v896_v57 = vadd.f32 %v895_v50, %v822_v48 }
 0x127   : > { %v1305_v45 = vmul.f32 %v2276_v61, %v1285_v40 }
 0x129   : > { %v1325_v4 = vadd.f32 %v2281_v44, %v1305_v45 }
 0x12b   : > { %v1341_v51 = vmax.f32 %v1325_v4, 0.0 }
 0x12c   : > { %v1247_v33 = vpop.f32.mrf.mxu2 }
 0x12d   : > { %1357 = vst.msk [vmem:[%s2290_s6] sm:$0xff] %vm470_vm3, %v1341_v51  ;;  %v1286_v56 = vadd.f32 %v1247_v33, %v896_v57  ;;  %v2296_v2 = vpop.f32.mrf.mxu3 }
 0x12e   : > { %v898_v60 = vpop.f32.mrf.mxu1 }
 0x12f   : > { %v1306_v55 = vmul.f32 %v2276_v61, %v1286_v56 }
 0x131   : > { %v1326_v38 = vadd.f32 %v2281_v44, %v1306_v55 }
 0x133   : > { %v1342_v22 = vmax.f32 %v1326_v38, 0.0 }
 0x134   : > { %v1250_v54 = vpop.f32.mrf.mxu2 }
 0x135   : > { %1358 = vst.msk [vmem:[%s2290_s6 + $0x8] sm:$0xff] %vm470_vm3, %v1342_v22  ;;  %v825_v62 = vpop.f32.mrf.mxu0  ;;  %v2302_v42 = vpop.f32.mrf.mxu3 }
 0x136   : > { %v899_v11 = vadd.f32 %v898_v60, %v825_v62  ;;  %v900_v3 = vpop.f32.mrf.mxu1 }
 0x138   : > { %v1287_v63 = vadd.f32 %v1250_v54, %v899_v11 }
 0x13a   : > { %v1307_v1 = vmul.f32 %v2276_v61, %v1287_v63 }
 0x13c   : > { %v1327_v41 = vadd.f32 %v2281_v44, %v1307_v1  ;;  %v1252_v6 = vpop.f32.mrf.mxu2 }
 0x13d   : > { %v827_v7 = vpop.f32.mrf.mxu0 }
 0x13e   : > { %v1343_v9 = vmax.f32 %v1327_v41, 0.0  ;;  %v901_v39 = vadd.f32 %v900_v3, %v827_v7 }
 0x140   : > { %1359 = vst.msk [vmem:[%s2290_s6 + $0x10] sm:$0xff] %vm470_vm3, %v1343_v9  ;;  %v1288_v10 = vadd.f32 %v1252_v6, %v901_v39 }
 0x142   : > { %v1308_v15 = vmul.f32 %v2276_v61, %v1288_v10 }
 0x143   : > { %v923_v18 = vpop.f32.mrf.mxu3 }
 0x144   : > { %v1328_v17 = vadd.f32 %v2281_v44, %v1308_v15  ;;  %v903_v31 = vpop.f32.mrf.mxu1  ;;  %v1255_v19 = vpop.f32.mrf.mxu2  ;;  %v924_v50 = vadd.f32 %v923_v18, %v2270_v14 }
 0x146   : > { %v1344_v5 = vmax.f32 %v1328_v17, 0.0  ;;  %v830_v0 = vpop.f32.mrf.mxu0 }
 0x147   : > { %v904_v20 = vadd.f32 %v903_v31, %v830_v0 }
 0x148   : > { %1360 = vst.msk [vmem:[%s2290_s6 + $0x18] sm:$0xff] %vm470_vm3, %v1344_v5 }
 0x149   : > { %v1289_v46 = vadd.f32 %v1255_v19, %v904_v20 }
 0x14b   : > { %v1309_v58 = vmul.f32 %v2276_v61, %v1289_v46  ;;  %v925_v27 = vpop.f32.mrf.mxu3 }
 0x14c   : > { %v905_v21 = vpop.f32.mrf.mxu1  ;;  %v1257_v13 = vpop.f32.mrf.mxu2  ;;  %v926_v22 = vadd.f32 %v925_v27, %v2284_v49 }
 0x14d   : > { %v1329_v26 = vadd.f32 %v2281_v44, %v1309_v58 }
 0x14e   : > { %v832_v47 = vpop.f32.mrf.mxu0 }
 0x14f   : > { %v1345_v34 = vmax.f32 %v1329_v26, 0.0  ;;  %v906_v25 = vadd.f32 %v905_v21, %v832_v47 }
 0x151   : > { %1361 = vst.msk [vmem:[%s2290_s6 + $0x20] sm:$0xff] %vm470_vm3, %v1345_v34  ;;  %v1290_v12 = vadd.f32 %v1257_v13, %v906_v25 }
 0x153   : > { %v1310_v23 = vmul.f32 %v2276_v61, %v1290_v12 }
 0x154   : > { %v928_v30 = vpop.f32.mrf.mxu3 }
 0x155   : > { %v1330_v28 = vadd.f32 %v2281_v44, %v1310_v23  ;;  %v929_v5 = vadd.f32 %v928_v30, %v2296_v2 }
 0x157   : > { %v1346_v29 = vmax.f32 %v1330_v28, 0.0 }
 0x159   : > { %1362 = vst.msk [vmem:[%s2290_s6 + $0x28] sm:$0xff] %vm470_vm3, %v1346_v29 }
 0x15b   : > { %v1260_v59 = vpop.f32.mrf.mxu2 }
 0x15c   : > { %v835_v16 = vpop.f32.mrf.mxu0  ;;  %v930_v24 = vpop.f32.mrf.mxu3 }
 0x15d   : > { %v908_v36 = vpop.f32.mrf.mxu1  ;;  %v931_v2 = vadd.f32 %v930_v24, %v2302_v42 }
 0x15e   : > { %v909_v53 = vadd.f32 %v908_v36, %v835_v16 }
 0x160   : > { %v1291_v32 = vadd.f32 %v1260_v59, %v909_v53 }
 0x162   : > { %v1311_v52 = vmul.f32 %v2276_v61, %v1291_v32 }
 0x163   : > { %v1262_v45 = vpop.f32.mrf.mxu2 }
 0x164   : > { %v1331_v43 = vadd.f32 %v2281_v44, %v1311_v52  ;;  %v837_v35 = vpop.f32.mrf.mxu0 }
 0x165   : > { %v910_v8 = vpop.f32.mrf.mxu1 }
 0x166   : > { %v1347_v37 = vmax.f32 %v1331_v43, 0.0  ;;  %v911_v40 = vadd.f32 %v910_v8, %v837_v35 }
 0x168   : > { %1363 = vst.msk [vmem:[%s2290_s6 + $0x30] sm:$0xff] %vm470_vm3, %v1347_v37  ;;  %v1292_v48 = vadd.f32 %v1262_v45, %v911_v40 }
 0x16a   : > { %v1312_v4 = vmul.f32 %v2276_v61, %v1292_v48 }
 0x16b   : > { %v1265_v62 = vpop.f32.mrf.mxu2 }
 0x16c   : > { %v1332_v51 = vadd.f32 %v2281_v44, %v1312_v4  ;;  %v1275_v57 = vpop.f32.mrf.mxu3 }
 0x16d   : > { %v1297_v33 = vadd.f32 %v1275_v57, %v924_v50 }
 0x16e   : > { %v1348_v56 = vmax.f32 %v1332_v51, 0.0  ;;  %v913_v60 = vpop.f32.mrf.mxu1 }
 0x16f   : > { %v1317_v55 = vmul.f32 %v2276_v61, %v1297_v33 }
 0x170   : > { %1364 = vst.msk [vmem:[%s2290_s6 + $0x38] sm:$0xff] %vm470_vm3, %v1348_v56 }
 0x171   : > { %v1337_v38 = vadd.f32 %v2281_v44, %v1317_v55 }
 0x173   : > { %v1353_v54 = vmax.f32 %v1337_v38, 0.0  ;;  %v1267_v15 = vpop.f32.mrf.mxu2 }
 0x174   : > { %v1277_v11 = vpop.f32.mrf.mxu3 }
 0x175   : > { %1369 = vst.msk [vmem:[%s2290_s6 + $0x60] sm:$0xff] %vm470_vm3, %v1353_v54  ;;  %v1298_v14 = vadd.f32 %v1277_v11, %v926_v22  ;;  %v840_v63 = vpop.f32.mrf.mxu0 }
 0x176   : > { %v914_v1 = vadd.f32 %v913_v60, %v840_v63  ;;  %v915_v49 = vpop.f32.mrf.mxu1 }
 0x177   : > { %v1318_v41 = vmul.f32 %v2276_v61, %v1298_v14 }
 0x178   : > { %v1293_v3 = vadd.f32 %v1265_v62, %v914_v1 }
 0x179   : > { %v1338_v6 = vadd.f32 %v2281_v44, %v1318_v41 }
 0x17a   : > { %v1313_v7 = vmul.f32 %v2276_v61, %v1293_v3 }
 0x17b   : > { %v1354_v9 = vmax.f32 %v1338_v6, 0.0 }
 0x17c   : > { %v1333_v39 = vadd.f32 %v2281_v44, %v1313_v7 }
 0x17d   : > { %1370 = vst.msk [vmem:[%s2290_s6 + $0x68] sm:$0xff] %vm470_vm3, %v1354_v9  ;;  %v842_v10 = vpop.f32.mrf.mxu0 }
 0x17e   : > { %v1349_v17 = vmax.f32 %v1333_v39, 0.0  ;;  %v916_v31 = vadd.f32 %v915_v49, %v842_v10 }
 0x180   : > { %1365 = vst.msk [vmem:[%s2290_s6 + $0x40] sm:$0xff] %vm470_vm3, %v1349_v17  ;;  %v1294_v18 = vadd.f32 %v1267_v15, %v916_v31 }
 0x182   : > { %v1314_v19 = vmul.f32 %v2276_v61, %v1294_v18  ;;  %v1280_v0 = vpop.f32.mrf.mxu3 }
 0x183   : > { %v1299_v20 = vadd.f32 %v1280_v0, %v929_v5  ;;  %v1270_v47 = vpop.f32.mrf.mxu2 }
 0x184   : > { %v1334_v46 = vadd.f32 %v2281_v44, %v1314_v19  ;;  %v918_v58 = vpop.f32.mrf.mxu1 }
 0x185   : > { %v1319_v21 = vmul.f32 %v2276_v61, %v1299_v20 }
 0x186   : > { %v1350_v26 = vmax.f32 %v1334_v46, 0.0  ;;  %v845_v34 = vpop.f32.mrf.mxu0 }
 0x187   : > { %v1339_v25 = vadd.f32 %v2281_v44, %v1319_v21  ;;  %v919_v27 = vadd.f32 %v918_v58, %v845_v34 }
 0x188   : > { %1366 = vst.msk [vmem:[%s2290_s6 + $0x48] sm:$0xff] %vm470_vm3, %v1350_v26 }
 0x189   : > { %v1355_v13 = vmax.f32 %v1339_v25, 0.0  ;;  %v1295_v12 = vadd.f32 %v1270_v47, %v919_v27 }
 0x18a   : > { %v1282_v23 = vpop.f32.mrf.mxu3 }
 0x18b   : > { %1371 = vst.msk [vmem:[%s2290_s6 + $0x70] sm:$0xff] %vm470_vm3, %v1355_v13  ;;  %v1315_v28 = vmul.f32 %v2276_v61, %v1295_v12  ;;  %v1300_v29 = vadd.f32 %v1282_v23, %v931_v2  ;;  %v1272_v52 = vpop.f32.mrf.mxu2 }
 0x18c   : > { %v920_v30 = vpop.f32.mrf.mxu1 }
 0x18d   : > { %v1335_v16 = vadd.f32 %v2281_v44, %v1315_v28  ;;  %v1320_v59 = vmul.f32 %v2276_v61, %v1300_v29 }
 0x18e   : > { %v847_v36 = vpop.f32.mrf.mxu0 }
 0x18f   : > { %v1351_v53 = vmax.f32 %v1335_v16, 0.0  ;;  %v1340_v32 = vadd.f32 %v2281_v44, %v1320_v59  ;;  %v921_v42 = vadd.f32 %v920_v30, %v847_v36 }
 0x191   : > { %1367 = vst.msk [vmem:[%s2290_s6 + $0x50] sm:$0xff] %vm470_vm3, %v1351_v53  ;;  %v1356_v24 = vmax.f32 %v1340_v32, 0.0  ;;  %v1296_v43 = vadd.f32 %v1272_v52, %v921_v42 }
 0x193   : > { %1372 = vst.msk [vmem:[%s2290_s6 + $0x78] sm:$0xff] %vm470_vm3, %v1356_v24  ;;  %v1316_v35 = vmul.f32 %v2276_v61, %v1296_v43 }
 0x195   : > { %v1336_v8 = vadd.f32 %v2281_v44, %v1316_v35 }
 0x197   : > { %v1352_v37 = vmax.f32 %v1336_v8, 0.0 }
 0x199   : > { %1368 = vst.msk [vmem:[%s2290_s6 + $0x58] sm:$0xff] %vm470_vm3, %v1352_v37 }
 0x19a PF: > { %s14_s19 = sadd.s32 1, %s1790_s19   ;;  %s2382_s15 = smov %s1782_s17 }
 0x19b   : > { %p11_p7 = scmp.ge.s32.totalorder %s14_s19, 6   ;;  %s2383_s16 = smov %s1786_s18 }
 0x19c   : > { %s2384_s17 = smov %s2387_s20  ;;  %s2385_s18 = smov %s2391_s21 }
 0x19d   :  { %13 = sbr.rel (!%p11_p7) target bundleno = 3 (0x3), region = 71 }

// kernel: ssh_forward.4
= control target key start
LH: loop header
LB: loop body
LE: loop exit
PB: predicated region body
PF: predicated region fallthrough
CT: control target
= control target key end

     0   :  { %s2393_s27 = smov 0   ;;  %s2395_s28 = smov 0   ;;  %s3167_s0 = inlined_call_operand.vmem [shape: bf16[2,18,18,4], index: 0, kind: input, shape index: {}]   ;;  %s3168_s1 = inlined_call_operand.vmem [shape: bf16[3,12,4], index: 1, kind: input, shape index: {}]   ;;  %s3169_s2 = inlined_call_operand.vmem [shape: f32[1,4], index: 2, kind: input, shape index: {}]   ;;  %s3170_s3 = inlined_call_operand.vmem [shape: f32[1,4], index: 3, kind: input, shape index: {}]   ;;  %s3171_s4 = inlined_call_operand.vmem [shape: bf16[3,12,4], index: 4, kind: input, shape index: {}]   ;;  %s3172_s5 = inlined_call_operand.vmem [shape: f32[1,4], index: 5, kind: input, shape index: {}]   ;;  %s3173_s6 = inlined_call_operand.vmem [shape: f32[1,4], index: 6, kind: input, shape index: {}]   ;;  %s3174_s7 = inlined_call_operand.vmem [shape: f32[2,16,16,4], index: 7, kind: output, shape index: {0}]   ;;  %s3175_s8 = inlined_call_operand.vmem [shape: bf16[2,16,16,4], index: 8, kind: output, shape index: {1}]  }
   0x1   :  { %s2397_s29 = smov 0   ;;  %s2399_s30 = smov 0  }
   0x2   :  { %s2401_s9 = smov 0  }
   0x3 LB: > { %s28_s10 = sadd.s32 1, %s2336_s29  ;;  %s31_s11 = sadd.s32 1, %s2340_s30  ;;  %s2344_s9 = sphi %s2401_s9, %s19_s9   ;;  %s2340_s30 = sphi %s2399_s30, %s3179_s30   ;;  %s2336_s29 = sphi %s2397_s29, %s3178_s29   ;;  %s2332_s28 = sphi %s2395_s28, %s3177_s28   ;;  %s2328_s27 = sphi %s2393_s27, %s3176_s27  }
   0x4   : > { %p29_p0 = scmp.ge.s32.totalorder %s28_s10, 2  ;;  %p1983_p1 = scmp.ge.s32.totalorder %s2344_s9, 1 }
   0x5   : > { %p281_p2 = scmp.lt.s32.totalorder %s2344_s9, 5 }
   0x6   : > { %s3181_s10 = smov (%p29_p0, %s28_s10), 0  ;;  %s3183_s11 = smov (!%p29_p0, %s31_s11), %s2340_s30 }
   0x7   : > { %p282_p3 = pnand %p1983_p1, %p281_p2  ;;  %p33_p4 = scmp.ge.s32.totalorder %s3183_s11, 2 }
   0x8   : > { %p330_p5 = scmp.lt.s32.totalorder (!%p282_p3), %s2332_s28, 1  ;;  %s2226_s12 = smul.u32 (!%p282_p3), 96, %s2328_s27 }
   0x9   : > { %s3185_s11 = smov (%p33_p4, %s3183_s11), 0  ;;  %285 = sbr.rel (%p282_p3) target bundleno = 499 (0x1f3), region = 48 }
   0xa   : > { %s2346_s18 = smov (!%p282_p3), 8   ;;  %s2347_s19 = smov (!%p282_p3), 4  }
   0xe   : > { %s3187_s28 = smov (!%p330_p5, %s2332_s28), 1  ;;  %vm563_vm0 = vcmask 1046528   ;;  %vm450_vm1 = vsmask.f32 7424  ;;  %vm943_vm2 = vcmask 1045504   ;;  %vm604_vm3 = vcmask 31744  }
   0xf   : > { %s2259_s13 = smul.u32 216, %s3187_s28  ;;  %vm621_vm4 = vcmask 64512   ;;  %vm926_vm5 = vcmask 97280   ;;  %vm1806_vm7 = vcmask 27648  }
  0x11   : > { %s334_s16 = scalar_lea.vmem %s3167_s0, %s2259_s13 }
  0x12   : > { %s2432_s17 = scalar_lea.vmem %s334_s16, %s2226_s12 }
  0x13   : > { %v2435_v0 = vld [vmem:[%s2432_s17 + $0x30] sm:$0xff]  ;;  %v376_v1 = vld [vmem:[%s2432_s17 + $0x38] sm:$0x1]  ;;  %v2439_v2 = vld [vmem:[%s2432_s17 + $0x3c] sm:$0xff] }
  0x14   : > { %v438_v3 = vunpack.c.l.b16 %v376_v1  ;;  %v2044_v4 = vld [vmem:[%s2432_s17 + $0x44] sm:$0x1]  ;;  %v500_v5 = vshrl.u32 %v2435_v0, 16  ;;  %v502_v6 = vshll.u32 %v2435_v0, 16  ;;  %v364_v8 = vld [vmem:[%s2432_s17 + $0x8] sm:$0x1] }
  0x15   : > { %v722_v7 = vunpack.c.l.b16 %v2044_v4  ;;  %v576_v10 = vrot.slane %v2435_v0, 1  ;;  %v785_v11 = vshll.u32 %v2439_v2, 16  ;;  %v2032_v12 = vld [vmem:[%s2432_s17 + $0x14] sm:$0x1]  ;;  %v2449_v15 = vld [vmem:[%s2432_s17] sm:$0xff]  ;;  %v434_v18 = vunpack.c.l.b16 %v364_v8  ;;  %v2454_v26 = vld [vmem:[%s2432_s17 + $0xc] sm:$0xff] }
  0x16   : > { %v446_v9 = vpack.c.b16 %v438_v3, %v438_v3  ;;  %v504_v13 = vrot.slane %v502_v6, 1  ;;  %v783_v20 = vshrl.u32 %v2439_v2, 16  ;;  %v718_v22 = vunpack.c.l.b16 %v2032_v12  ;;  %v2047_v41 = vld [vmem:[%s2432_s17 + $0x50] sm:$0x1]  ;;  %v379_v43 = vld [vmem:[%s2432_s17 + $0x44] sm:$0x1] }
  0x17   : > { %v730_v14 = vpack.c.b16 %v722_v7, %v722_v7  ;;  %v787_v21 = vrot.slane %v785_v11, 1  ;;  %v442_v27 = vpack.c.b16 %v434_v18, %v434_v18  ;;  %v564_v28 = vrot.slane %v2449_v15, 1  ;;  %v2472_v50 = vld [vmem:[%s2432_s17 + $0x48] sm:$0xff]  ;;  %v2480_v61 = vld [vmem:[%s2432_s17 + $0x3c] sm:$0xff]  ;;  %v367_v63 = vld [vmem:[%s2432_s17 + $0x14] sm:$0x1] }
  0x18   : > { %v577_v16 = vrot.slane %v446_v9, 1  ;;  %v507_v17 = vshll.u32 %v446_v9, 16  ;;  %v505_v19 = vor.u32 %v504_v13, %v500_v5  ;;  %v858_v30 = vrot.slane %v2439_v2, 1  ;;  %v382_v18 = vld [vmem:[%s2432_s17 + $0x50] sm:$0x1] }
  0x19   : > { %v790_v25 = vshll.u32 %v730_v14, 16  ;;  %v859_v31 = vrot.slane %v730_v14, 1  ;;  %v565_v32 = vrot.slane %v442_v27, 1  ;;  %v726_v33 = vpack.c.b16 %v718_v22, %v718_v22 }
  0x1a   : > { %v578_v23 = vsel %vm563_vm0, %v576_v10, %v577_v16  ;;  %v509_v24 = vrot.slane %v507_v17, 1  ;;  %v788_v34 = vor.u32 %v787_v21, %v783_v20  ;;  %v737_v37 = vshll.u32 %v2454_v26, 16  ;;  %v2490_v10 = vld [vmem:[%s2432_s17 + $0xc] sm:$0xff]  ;;  %v2035_v17 = vld [vmem:[%s2432_s17 + $0x20] sm:$0x1] }
  0x1b   : > { %596 = vrot.lane.b32.xlu1 %v578_v23, %s2346_s18  ;;  %v792_v35 = vrot.slane %v790_v25, 1  ;;  %v566_v36 = vsel %vm563_vm0, %v564_v28, %v565_v32  ;;  %v452_v38 = vshrl.u32 %v2449_v15, 16  ;;  %v454_v39 = vshll.u32 %v2449_v15, 16 }
  0x1c   : > { %v510_v29 = vsel %vm450_vm1, %v505_v19, %v509_v24  ;;  %588 = vrot.lane.b32.xlu2 %v566_v36, %s2346_s18  ;;  %v459_v40 = vshll.u32 %v442_v27, 16  ;;  %v860_v42 = vsel %vm563_vm0, %v858_v30, %v859_v31  ;;  %v735_v44 = vshrl.u32 %v2454_v26, 16  ;;  %v2499_v24 = vld [vmem:[%s2432_s17 + $0x18] sm:$0xff] }
  0x1d   : > { %555 = vrot.lane.b32.xlu0 %v510_v29, %s2347_s19  ;;  %v456_v45 = vrot.slane %v454_v39, 1  ;;  %v793_v47 = vsel %vm450_vm1, %v788_v34, %v792_v35  ;;  %v739_v48 = vrot.slane %v737_v37, 1  ;;  %v742_v49 = vshll.u32 %v726_v33, 16  ;;  %v2504_v29 = vld [vmem:[%s2432_s17 + $0x48] sm:$0xff] }
  0x1e   : > { %v461_v46 = vrot.slane %v459_v40, 1  ;;  %v723_v51 = vunpack.c.l.b16 %v2047_v41  ;;  %v439_v52 = vunpack.c.l.b16 %v379_v43  ;;  %v846_v54 = vrot.slane %v2454_v26, 1  ;;  %v2050_v43 = vld [vmem:[%s2432_s17 + $0x5c] sm:$0x1] }
  0x1f   : > { %v457_v53 = vor.u32 %v456_v45, %v452_v38  ;;  %v847_v55 = vrot.slane %v726_v33, 1  ;;  %v740_v57 = vor.u32 %v739_v48, %v735_v44  ;;  %v744_v58 = vrot.slane %v742_v49, 1 }
  0x20   : > { %v731_v59 = vpack.c.b16 %v723_v51, %v723_v51  ;;  %v797_v60 = vshll.u32 %v2472_v50, 16  ;;  %v447_v62 = vpack.c.b16 %v439_v52, %v439_v52  ;;  %v795_v3 = vshrl.u32 %v2472_v50, 16  ;;  %v2521_v51 = vld [vmem:[%s2432_s17 + $0x54] sm:$0xff] }
  0x21   : > { %v462_v56 = vsel %vm450_vm1, %v457_v53, %v461_v46  ;;  %v848_v1 = vsel %vm563_vm0, %v846_v54, %v847_v55  ;;  %v512_v4 = vshrl.u32 %v2480_v61, 16  ;;  %v514_v5 = vshll.u32 %v2480_v61, 16 }
  0x22   : > { %v519_v6 = vshll.u32 %v447_v62, 16  ;;  %v745_v7 = vsel %vm450_vm1, %v740_v57, %v744_v58  ;;  %v799_v8 = vrot.slane %v797_v60, 1  ;;  %v802_v9 = vshll.u32 %v731_v59, 16 }
  0x23   : > { %878 = vrot.lane.b32.xlu1 %v860_v42, %s2346_s18  ;;  %v435_v11 = vunpack.c.l.b16 %v367_v63  ;;  %v516_v12 = vrot.slane %v514_v5, 1  ;;  %v579_v14 = vrot.slane %v2480_v61, 1  ;;  %v580_v16 = vrot.slane %v447_v62, 1 }
  0x24   : > { %547 = vrot.lane.b32.xlu2 %v462_v56, %s2347_s19  ;;  %v521_v13 = vrot.slane %v519_v6, 1  ;;  %v800_v20 = vor.u32 %v799_v8, %v795_v3  ;;  %v804_v21 = vrot.slane %v802_v9, 1  ;;  %v466_v23 = vshll.u32 %v2490_v10, 16  ;;  %v370_v3 = vld [vmem:[%s2432_s17 + $0x20] sm:$0x1] }
  0x25   : > { %838 = vrot.lane.b32.xlu0 %v793_v47, %s2347_s19  ;;  %v517_v19 = vor.u32 %v516_v12, %v512_v4  ;;  %v443_v22 = vpack.c.b16 %v435_v11, %v435_v11  ;;  %v719_v25 = vunpack.c.l.b16 %v2035_v17  ;;  %v581_v28 = vsel %vm563_vm0, %v579_v14, %v580_v16  ;;  %v2038_v4 = vld [vmem:[%s2432_s17 + $0x2c] sm:$0x1]  ;;  %v2537_v12 = vld [vmem:[%s2432_s17 + $0x18] sm:$0xff]  ;;  %v2541_v16 = vld [vmem:[%s2432_s17 + $0x24] sm:$0xff] }
  0x26   : > { %v440_v30 = vunpack.c.l.b16 %v382_v18  ;;  %v861_v31 = vrot.slane %v2472_v50, 1  ;;  %v862_v32 = vrot.slane %v731_v59, 1  ;;  %v749_v33 = vshll.u32 %v2499_v24, 16 }
  0x27   : > { %v522_v27 = vsel %vm450_vm1, %v517_v19, %v521_v13  ;;  %v805_v34 = vsel %vm450_vm1, %v800_v20, %v804_v21  ;;  %v464_v35 = vshrl.u32 %v2490_v10, 16  ;;  %v468_v36 = vrot.slane %v466_v23, 1 }
  0x28   : > { %v471_v37 = vshll.u32 %v443_v22, 16  ;;  %v727_v38 = vpack.c.b16 %v719_v25, %v719_v25  ;;  %v567_v39 = vrot.slane %v2490_v10, 1  ;;  %v568_v40 = vrot.slane %v443_v22, 1 }
  0x29   : > { %v2513_v41 = vpack.c.b16 %v440_v30, %v440_v30  ;;  %v526_v42 = vshll.u32 %v2504_v29, 16  ;;  %v863_v44 = vsel %vm563_vm0, %v861_v31, %v862_v32  ;;  %v747_v45 = vshrl.u32 %v2499_v24, 16  ;;  %v2053_v30 = vld [vmem:[%s2432_s17 + $0x68] sm:$0x1] }
  0x2a   : > { %v751_v46 = vrot.slane %v749_v33, 1  ;;  %v754_v47 = vshll.u32 %v727_v38, 16  ;;  %v469_v48 = vor.u32 %v468_v36, %v464_v35  ;;  %v473_v49 = vrot.slane %v471_v37, 1 }
  0x2b   : > { %870 = vrot.lane.b32.xlu1 %v848_v1, %s2346_s18  ;;  %v724_v52 = vunpack.c.l.b16 %v2050_v43  ;;  %v569_v53 = vsel %vm563_vm0, %v567_v39, %v568_v40  ;;  %v524_v54 = vshrl.u32 %v2504_v29, 16  ;;  %v528_v55 = vrot.slane %v526_v42, 1  ;;  %v2559_v43 = vld [vmem:[%s2432_s17 + $0x60] sm:$0xff] }
  0x2c   : > { %557 = vrot.lane.b32.xlu2 %v522_v27, %s2347_s19  ;;  %v531_v56 = vshll.u32 %v2513_v41, 16  ;;  %v752_v57 = vor.u32 %v751_v46, %v747_v45  ;;  %v756_v58 = vrot.slane %v754_v47, 1  ;;  %v809_v59 = vshll.u32 %v2521_v51, 16 }
  0x2d   : > { %830 = vrot.lane.b32.xlu0 %v745_v7, %s2347_s19  ;;  %v474_v60 = vsel %vm450_vm1, %v469_v48, %v473_v49  ;;  %v732_v62 = vpack.c.b16 %v724_v52, %v724_v52  ;;  %v529_v63 = vor.u32 %v528_v55, %v524_v54  ;;  %v807_v6 = vshrl.u32 %v2521_v51, 16  ;;  %v2564_v48 = vld [vmem:[%s2432_s17 + $0x54] sm:$0xff]  ;;  %v373_v55 = vld [vmem:[%s2432_s17 + $0x2c] sm:$0x1] }
  0x2e   : > { %v533_v1 = vrot.slane %v531_v56, 1  ;;  %v757_v5 = vsel %vm450_vm1, %v752_v57, %v756_v58  ;;  %v811_v7 = vrot.slane %v809_v59, 1  ;;  %v849_v9 = vrot.slane %v2499_v24, 1 }
  0x2f   : > { %v814_v8 = vshll.u32 %v732_v62, 16  ;;  %v850_v11 = vrot.slane %v727_v38, 1  ;;  %v436_v13 = vunpack.c.l.b16 %v370_v3  ;;  %v720_v17 = vunpack.c.l.b16 %v2038_v4  ;;  %v385_v38 = vld [vmem:[%s2432_s17 + $0x5c] sm:$0x1]  ;;  %v2579_v4 = vld [vmem:[%s2432_s17 + $0x24] sm:$0xff] }
  0x30   : > { %v534_v14 = vsel %vm450_vm1, %v529_v63, %v533_v1  ;;  %v812_v18 = vor.u32 %v811_v7, %v807_v6  ;;  %v478_v20 = vshll.u32 %v2537_v12, 16  ;;  %v864_v23 = vrot.slane %v2521_v51, 1 }
  0x31   : > { %v816_v19 = vrot.slane %v814_v8, 1  ;;  %v851_v21 = vsel %vm563_vm0, %v849_v9, %v850_v11  ;;  %v444_v22 = vpack.c.b16 %v436_v13, %v436_v13  ;;  %v865_v25 = vrot.slane %v732_v62, 1 }
  0x32   : > { %v728_v27 = vpack.c.b16 %v720_v17, %v720_v17  ;;  %v476_v32 = vshrl.u32 %v2537_v12, 16  ;;  %v480_v33 = vrot.slane %v478_v20, 1  ;;  %v582_v35 = vrot.slane %v2504_v29, 1 }
  0x33   : > { %598 = vrot.lane.b32.xlu1 %v581_v28, %s2346_s18  ;;  %v761_v28 = vshll.u32 %v2541_v16, 16  ;;  %v817_v31 = vsel %vm450_vm1, %v812_v18, %v816_v19  ;;  %v583_v36 = vrot.slane %v2513_v41, 1  ;;  %v759_v37 = vshrl.u32 %v2541_v16, 16 }
  0x34   : > { %880 = vrot.lane.b32.xlu2 %v863_v44, %s2346_s18  ;;  %v866_v39 = vsel %vm563_vm0, %v864_v23, %v865_v25  ;;  %v766_v42 = vshll.u32 %v728_v27, 16  ;;  %v725_v44 = vunpack.c.l.b16 %v2053_v30  ;;  %v481_v45 = vor.u32 %v480_v33, %v476_v32  ;;  %v2041_v23 = vld [vmem:[%s2432_s17 + $0x38] sm:$0x1] }
  0x35   : > { %840 = vrot.lane.b32.xlu0 %v805_v34, %s2347_s19  ;;  %v483_v34 = vshll.u32 %v444_v22, 16  ;;  %v763_v40 = vrot.slane %v761_v28, 1  ;;  %v584_v47 = vsel %vm563_vm0, %v582_v35, %v583_v36  ;;  %v441_v41 = vunpack.c.l.b16 %v385_v38  ;;  %v2142_v38 = vld [vmem:[%s2432_s17 + $0x20] sm:$0x1] }
  0x36   : > { %v768_v52 = vrot.slane %v766_v42, 1  ;;  %v821_v54 = vshll.u32 %v2559_v43, 16  ;;  %v570_v57 = vrot.slane %v2537_v12, 1  ;;  %v571_v58 = vrot.slane %v444_v22, 1 }
  0x37   : > { %v485_v46 = vrot.slane %v483_v34, 1  ;;  %v764_v49 = vor.u32 %v763_v40, %v759_v37  ;;  %v449_v59 = vpack.c.b16 %v441_v41, %v441_v41  ;;  %v819_v62 = vshrl.u32 %v2559_v43, 16  ;;  %v2596_v34 = vld [vmem:[%s2432_s17 + $0x30] sm:$0xff]  ;;  %v2145_v40 = vld [vmem:[%s2432_s17 + $0x2c] sm:$0x1] }
  0x38   : > { %v823_v1 = vrot.slane %v821_v54, 1  ;;  %v852_v6 = vrot.slane %v2541_v16, 1  ;;  %v853_v7 = vrot.slane %v728_v27, 1  ;;  %v572_v8 = vsel %vm563_vm0, %v570_v57, %v571_v58 }
  0x39   : > { %v486_v56 = vsel %vm450_vm1, %v481_v45, %v485_v46  ;;  %v769_v63 = vsel %vm450_vm1, %v764_v49, %v768_v52  ;;  %v536_v9 = vshrl.u32 %v2564_v48, 16  ;;  %v543_v13 = vshll.u32 %v449_v59, 16  ;;  %v2612_v52 = vld [vmem:[%s2432_s17 + $0x24] sm:$0xff] }
  0x3a   : > { %v490_v19 = vshll.u32 %v2579_v4, 16  ;;  %v854_v20 = vsel %vm563_vm0, %v852_v6, %v853_v7  ;;  %v488_v27 = vshrl.u32 %v2579_v4, 16  ;;  %v586_v32 = vrot.slane %v449_v59, 1 }
  0x3b   : > { %590 = vrot.lane.b32.xlu1 %v569_v53, %s2346_s18  ;;  %v2567_v53 = vpack.c.b16 %v725_v44, %v725_v44  ;;  %v545_v22 = vrot.slane %v543_v13, 1  ;;  %v721_v35 = vunpack.c.l.b16 %v2041_v23  ;;  %v867_v42 = vrot.slane %v2559_v43, 1  ;;  %v2102_v23 = vld [vmem:[%s3168_s1] sm:$0xf] }
  0x3c   : > { %832 = vrot.lane.b32.xlu2 %v757_v5, %s2347_s19  ;;  %v437_v5 = vunpack.c.l.b16 %v373_v55  ;;  %v492_v28 = vrot.slane %v490_v19, 1  ;;  %v773_v46 = vshll.u32 %v2596_v34, 16  ;;  %v1262_v41 = vunpack.c.l.b16 %v2142_v38 }
  0x3d   : > { %549 = vrot.lane.b32.xlu0 %v474_v60, %s2347_s19  ;;  %v538_v60 = vshll.u32 %v2564_v48, 16  ;;  %v826_v3 = vshll.u32 %v2567_v53, 16  ;;  %v868_v44 = vrot.slane %v2567_v53, 1  ;;  %v729_v45 = vpack.c.b16 %v721_v35, %v721_v35 }
  0x3e   : > { %v445_v18 = vpack.c.b16 %v437_v5, %v437_v5  ;;  %v493_v36 = vor.u32 %v492_v28, %v488_v27  ;;  %v1263_v54 = vunpack.c.l.b16 %v2145_v40  ;;  %v573_v55 = vrot.slane %v2579_v4, 1  ;;  %v2148_v27 = vld [vmem:[%s2432_s17 + $0x38] sm:$0x1] }
  0x3f   : > { %v540_v11 = vrot.slane %v538_v60, 1  ;;  %v828_v17 = vrot.slane %v826_v3, 1  ;;  %v869_v53 = vsel %vm563_vm0, %v867_v42, %v868_v44  ;;  %v771_v58 = vshrl.u32 %v2596_v34, 16 }
  0x40   : > { %v495_v30 = vshll.u32 %v445_v18, 16  ;;  %v775_v59 = vrot.slane %v773_v46, 1  ;;  %v778_v60 = vshll.u32 %v729_v45, 16  ;;  %v1271_v3 = vpack.c.b16 %v1263_v54, %v1263_v54  ;;  %v2245_v54 = vld [vmem:[%s3168_s1 + $0x8] sm:$0x30] }
  0x41   : > { %v1293_v5 = vshll.u32 %v2612_v52, 16 }
  0x42   : > { %v497_v37 = vrot.slane %v495_v30, 1  ;;  %v780_v13 = vrot.slane %v778_v60, 1  ;;  %v1298_v19 = vshll.u32 %v1271_v3, 16  ;;  %v2637_v30 = vld [vmem:[%s2432_s17 + $0x30] sm:$0xff] }
  0x43   : > { %559 = vrot.lane.b32.xlu1 %v534_v14, %s2347_s19  ;;  %v824_v14 = vor.u32 %v823_v1, %v819_v62  ;;  %v1270_v62 = vpack.c.b16 %v1262_v41, %v1262_v41  ;;  %v856_v1 = vrot.slane %v729_v45, 1  ;;  %v1305_v40 = vshll.u32 %v2637_v30, 16 }
  0x44   : > { %842 = vrot.lane.b32.xlu2 %v817_v31, %s2347_s19  ;;  %v585_v31 = vrot.slane %v2564_v48, 1  ;;  %v498_v49 = vsel %vm450_vm1, %v493_v36, %v497_v37  ;;  %v1303_v45 = vshrl.u32 %v2637_v30, 16 }
  0x45   : > { %872 = vrot.lane.b32.xlu0 %v851_v21, %s2346_s18  ;;  %v541_v21 = vor.u32 %v540_v11, %v536_v9  ;;  %v829_v25 = vsel %vm450_vm1, %v824_v14, %v828_v17  ;;  %v1286_v9 = vshll.u32 %v1270_v62, 16  ;;  %v776_v11 = vor.u32 %v775_v59, %v771_v58 }
  0x46   : > { %v1291_v17 = vshrl.u32 %v2612_v52, 16  ;;  %v1391_v38 = vrot.slane %v1270_v62, 1  ;;  %v1307_v46 = vrot.slane %v1305_v40, 1 }
  0x47   : > { %v546_v33 = vsel %vm450_vm1, %v541_v21, %v545_v22  ;;  %v1288_v21 = vrot.slane %v1286_v9, 1  ;;  %v781_v22 = vsel %vm450_vm1, %v776_v11, %v780_v13  ;;  %v2667_v9 = vld [vmem:[%s2432_s17 + $0x3c] sm:$0xff] }
  0x4b   : > { %882 = vrot.lane.b32.xlu1 %v866_v39, %s2346_s18  ;;  %v587_v39 = vsel %vm563_vm0, %v585_v31, %v586_v32  ;;  %v1264_v31 = vunpack.c.l.b16 %v2148_v27  ;;  %v2154_v27 = vld [vmem:[%s2432_s17 + $0x50] sm:$0x1] }
  0x4c   : > { %551 = vrot.lane.b32.xlu2 %v486_v56, %s2347_s19  ;;  %v574_v56 = vrot.slane %v445_v18, 1  ;;  %v1295_v18 = vrot.slane %v1293_v5, 1  ;;  %v1394_v5 = vrot.slane %v1271_v3, 1 }
  0x4d   : > { %600 = vrot.lane.b32.xlu0 %v584_v47, %s2346_s18  ;;  %v2607_v47 = vld [vmem:[%s2432_s17 + $0x18] sm:$0xff] }
  0x4e   : > { %v1281_v57 = vshll.u32 %v2607_v47, 16  ;;  %v575_v6 = vsel %vm563_vm0, %v573_v55, %v574_v56  ;;  %v1279_v7 = vshrl.u32 %v2607_v47, 16  ;;  %v1296_v32 = vor.u32 %v1295_v18, %v1291_v17 }
  0x4f   : > { %v1390_v37 = vrot.slane %v2607_v47, 1  ;;  %v1396_v55 = vrot.slane %v2637_v30, 1 }
  0x51   : > { %v1392_v44 = vsel %vm563_vm0, %v1390_v37, %v1391_v38 }
  0x53   : > { %834 = vrot.lane.b32.xlu1 %v769_v63, %s2347_s19  ;;  %v855_v63 = vrot.slane %v2596_v34, 1 }
  0x54   : > { %874 = vrot.lane.b32.xlu2 %v854_v20, %s2346_s18 }
  0x55   : > { %592 = vrot.lane.b32.xlu0 %v572_v8, %s2346_s18  ;;  %v1283_v8 = vrot.slane %v1281_v57, 1  ;;  %v857_v14 = vsel %vm563_vm0, %v855_v63, %v856_v1  ;;  %v1393_v1 = vrot.slane %v2612_v52, 1 }
  0x57   : > { %v1284_v20 = vor.u32 %v1283_v8, %v1279_v7  ;;  %v2151_v7 = vld [vmem:[%s2432_s17 + $0x44] sm:$0x1] }
  0x58   : > { %v1265_v8 = vunpack.c.l.b16 %v2151_v7 }
  0x59   : > { %v1289_v35 = vsel %vm450_vm1, %v1284_v20, %v1288_v21  ;;  %v2116_v20 = vld [vmem:[%s3171_s4 + $0x8] sm:$0xf]  ;;  %v2128_v21 = vld [vmem:[%s3171_s4] sm:$0xf] }
  0x5a   : > { %v1273_v11 = vpack.c.b16 %v1265_v8, %v1265_v8 }
  0x5b   : > { %844 = vrot.lane.b32.xlu1 %v829_v25, %s2347_s19  ;;  %v2235_v25 = vld [vmem:[%s3168_s1] sm:$0x30] }
  0x5c   : > { %602 = vrot.lane.b32.xlu2 %v587_v39, %s2346_s18  ;;  %v2103_v28 = vor.u32 %v2235_v25, %v2102_v23  ;;  %v1272_v39 = vpack.c.b16 %v1264_v31, %v1264_v31  ;;  %v1400_v17 = vrot.slane %v1273_v11, 1  ;;  %v2236_v23 = vld [vmem:[%s3171_s4] sm:$0x30]  ;;  %v2694_v31 = vld [vmem:[%s2432_s17 + $0x48] sm:$0xff]  ;;  %v1322_v7 = vshll.u32 %v1273_v11, 16 }
  0x5d   : > { %561 = vrot.lane.b32.xlu0 %v546_v33, %s2347_s19  ;;  %v1300_v33 = vrot.slane %v1298_v19, 1  ;;  %v2129_v25 = vor.u32 %v2236_v23, %v2128_v21  ;;  %v1329_v37 = vshll.u32 %v2694_v31, 16  ;;  %v1327_v40 = vshrl.u32 %v2694_v31, 16 }
  0x5e   : > { %v1018_v36 = vsel %vm943_vm2, %v2103_v28, 0  ;;  %v1310_v41 = vshll.u32 %v1272_v39, 16  ;;  %v1397_v56 = vrot.slane %v1272_v39, 1 }
  0x5f   : > { %1027 = vmatpush.bf16.msra.mxu1 %v1018_v36  ;;  %2258 = vmatpush.bf16.msra.mxu3 %v1018_v36  ;;  %v1301_v42 = vsel %vm450_vm1, %v1296_v32, %v1300_v33  ;;  %v1266_v32 = vunpack.c.l.b16 %v2154_v27  ;;  %v1135_v33 = vsel %vm943_vm2, %v2129_v25, 0 }
  0x60   : > { %v1312_v58 = vrot.slane %v1310_v41, 1  ;;  %v1398_v60 = vsel %vm563_vm0, %v1396_v55, %v1397_v56  ;;  %v2256_v41 = vld [vmem:[%s3171_s4 + $0x10] sm:$0x30] }
  0x61   : > { %v2697_v36 = vpack.c.b16 %v1266_v32, %v1266_v32 }
  0x63   : > { %553 = vrot.lane.b32.xlu1 %v498_v49, %s2347_s19  ;;  %v2090_v49 = vld [vmem:[%s3168_s1 + $0x8] sm:$0xf]  ;;  %1144 = vmatpush.bf16.msrb.mxu3 %v1135_v33 }
  0x64   : > { %594 = vrot.lane.b32.xlu2 %v575_v6, %s2346_s18  ;;  %v2091_v57 = vor.u32 %v2245_v54, %v2090_v49  ;;  %v1395_v6 = vsel %vm563_vm0, %v1393_v1, %v1394_v5  ;;  %v1315_v5 = vshrl.u32 %v2667_v9, 16 }
  0x65   : > { %884 = vrot.lane.b32.xlu0 %v869_v53, %s2346_s18  ;;  %v1308_v53 = vor.u32 %v1307_v46, %v1303_v45  ;;  %v2214_v46 = vld [vmem:[%s3171_s4 + $0x10] sm:$0xf] }
  0x66   : > { %v945_v59 = vsel %vm943_vm2, %v2091_v57, 0  ;;  %v2215_v54 = vor.u32 %v2256_v41, %v2214_v46  ;;  %v2255_v57 = vld [vmem:[%s3168_s1 + $0x10] sm:$0x30] }
  0x67   : > { %2257 = vmatpush.bf16.msra.mxu2 %v945_v59  ;;  %954 = vmatpush.bf16.msra.mxu0 %v945_v59  ;;  %v1313_v63 = vsel %vm450_vm1, %v1308_v53, %v1312_v58 }
  0x68   : > { %v1563_v53 = vsel %vm943_vm2, %v2215_v54, 0 }
  0x69   : > { %1572 = vmatpush.bf16.msrb.mxu1 %v1563_v53 }
  0x6b   : > { %876 = vrot.lane.b32.xlu1 %v857_v14, %s2346_s18  ;;  %v1399_v14 = vrot.slane %v2667_v9, 1 }
  0x6c   : > { %1374 = vrot.lane.b32.xlu2 %v1289_v35, %s2347_s19 }
  0x6d   : > { %836 = vrot.lane.b32.xlu0 %v781_v22, %s2347_s19  ;;  %v1401_v19 = vsel %vm563_vm0, %v1399_v14, %v1400_v17  ;;  %v1324_v17 = vrot.slane %v1322_v7, 1 }
  0x73   : > { %1376 = vrot.lane.b32.xlu1 %v1301_v42, %s2347_s19  ;;  %v1331_v42 = vrot.slane %v1329_v37, 1 }
  0x74   : > { %1416 = vrot.lane.b32.xlu2 %v1395_v6, %s2346_s18 }
  0x75   : > { %1414 = vrot.lane.b32.xlu0 %v1392_v44, %s2346_s18  ;;  %v1334_v44 = vshll.u32 %v2697_v36, 16  ;;  %v1332_v55 = vor.u32 %v1331_v42, %v1327_v40 }
  0x76   : > { %v589_v62 = vpop.permute.xlu2 %588 }
  0x77   : > { %v1336_v56 = vrot.slane %v1334_v44, 1 }
  0x79   : > { %v1337_v59 = vsel %vm450_vm1, %v1332_v55, %v1336_v56  ;;  %v1402_v55 = vrot.slane %v2694_v31, 1  ;;  %v1403_v56 = vrot.slane %v2697_v36, 1 }
  0x7b   : > { %1418 = vrot.lane.b32.xlu1 %v1398_v60, %s2346_s18 }
  0x7d   : > { %1378 = vrot.lane.b32.xlu0 %v1313_v63, %s2347_s19  ;;  %v1317_v63 = vshll.u32 %v2667_v9, 16 }
  0x7e   : > { %v548_v13 = vpop.permute.xlu2 %547 }
  0x7f   : > { %v606_v3 = vsel %vm604_vm3, %v2449_v15, %v548_v13  ;;  %v2246_v15 = vld [vmem:[%s3171_s4 + $0x8] sm:$0x30]  ;;  %v1319_v6 = vrot.slane %v1317_v63, 1 }
  0x80   : > { %v2673_v18 = vsel %vm621_vm4, %v606_v3, %v589_v62  ;;  %v2117_v22 = vor.u32 %v2246_v15, %v2116_v20  ;;  %v2737_v15 = vld [vmem:[%s2432_s17 + $0x54] sm:$0xff] }
  0x81   : > { %2104 = vmatmul.msk.bf16.vlgmr.msra.gmra.mxu1 %vm926_vm5, %v2673_v18  ;;  %v1320_v14 = vor.u32 %v1319_v6, %v1315_v5  ;;  %v1339_v25 = vshrl.u32 %v2737_v15, 16 }
  0x82   : > { %v1078_v28 = vsel %vm943_vm2, %v2117_v22, 0 }
  0x83   : > { %1087 = vmatpush.bf16.msrb.mxu2 %v1078_v28  ;;  %1382 = vrot.lane.b32.xlu1 %v1337_v59, %s2347_s19  ;;  %v1325_v20 = vsel %vm450_vm1, %v1320_v14, %v1324_v17  ;;  %v2163_v17 = vld [vmem:[%s2432_s17 + $0x74] sm:$0x1] }
  0x84   : > { %1380 = vrot.lane.b32.xlu2 %v1325_v20, %s2347_s19  ;;  %v2797_v20 = vld [vmem:[%s2432_s17 + $0x6c] sm:$0xff] }
  0x85   : > { %1420 = vrot.lane.b32.xlu0 %v1401_v19, %s2346_s18  ;;  %v2157_v19 = vld [vmem:[%s2432_s17 + $0x5c] sm:$0x1] }
  0x86   : > { %v558_v38 = vpop.permute.xlu2 %557  ;;  %v1267_v21 = vunpack.c.l.b16 %v2157_v19 }
  0x87   : > { %v616_v44 = vsel %vm604_vm3, %v2480_v61, %v558_v38 }
  0x88   : > { %v1275_v22 = vpack.c.b16 %v1267_v21, %v1267_v21  ;;  %v1269_v21 = vunpack.c.l.b16 %v2163_v17 }
  0x8a   : > { %v1346_v28 = vshll.u32 %v1275_v22, 16  ;;  %v1406_v42 = vrot.slane %v1275_v22, 1  ;;  %v1365_v22 = vshll.u32 %v2797_v20, 16 }
  0x8c   : > { %v1348_v37 = vrot.slane %v1346_v28, 1 }
  0x8d   : > { %v597_v35 = vpop.permute.xlu1 %596 }
  0x8e   : > { %v881_v13 = vpop.permute.xlu2 %880 }
  0x8f   : > { %v556_v39 = vpop.permute.xlu0 %555 }
  0x90   : > { %v614_v45 = vsel %vm604_vm3, %v2435_v0, %v556_v39  ;;  %v2200_v0 = vld [vmem:[%s3168_s1 + $0x10] sm:$0xf]  ;;  %v1405_v39 = vrot.slane %v2737_v15, 1 }
  0x91   : > { %v2711_v49 = vsel %vm621_vm4, %v614_v45, %v597_v35  ;;  %v2201_v58 = vor.u32 %v2255_v57, %v2200_v0  ;;  %v1404_v0 = vsel %vm563_vm0, %v1402_v55, %v1403_v56 }
  0x92   : > { %2108 = vmatmul.msk.bf16.vlgmr.msra.gmra.mxu3 %vm926_vm5, %v2711_v49  ;;  %1422 = vrot.lane.b32.xlu2 %v1404_v0, %s2346_s18 }
  0x93   : > { %v1487_v62 = vsel %vm943_vm2, %v2201_v58, 0  ;;  %v2160_v58 = vld [vmem:[%s2432_s17 + $0x68] sm:$0x1] }
  0x94   : > { %1496 = vmatpush.bf16.msrb.mxu0 %v1487_v62  ;;  %v1268_v59 = vunpack.c.l.b16 %v2160_v58  ;;  %v2776_v62 = vld [vmem:[%s2432_s17 + $0x60] sm:$0xff]  ;;  %s1985_s17 = sshll.u32 %s2328_s27, 3 }
  0x95   : > { %v879_v60 = vpop.permute.xlu1 %878  ;;  %p338_p6 = scmp.lt.s32.totalorder %s1985_s17, 15 }
  0x96   : > { %v833_v40 = vpop.permute.xlu2 %832  ;;  %v1276_v36 = vpack.c.b16 %v1268_v59, %v1268_v59 }
  0x97   : > { %v839_v1 = vpop.permute.xlu0 %838  ;;  %v889_v7 = vsel %vm604_vm3, %v2499_v24, %v833_v40  ;;  %v1277_v24 = vpack.c.b16 %v1269_v21, %v1269_v21  ;;  %s3189_s17 = smov (!%p338_p6, %s1985_s17), 15 }
  0x98   : > { %v895_v8 = vsel %vm604_vm3, %v2439_v2, %v839_v1  ;;  %v1341_v2 = vshll.u32 %v2737_v15, 16  ;;  %v1408_v1 = vrot.slane %v2776_v62, 1  ;;  %v1409_v5 = vrot.slane %v1276_v36, 1 }
  0x99   : > { %v2730_v3 = vsel %vm621_vm4, %v895_v8, %v879_v60  ;;  %v1370_v28 = vshll.u32 %v1277_v24, 16  ;;  %v1358_v55 = vshll.u32 %v1276_v36, 16 }
  0x9a   : > { %2096 = vmatmul.msk.bf16.vlgmr.msra.gmra.mxu2 %vm926_vm5, %v2730_v3  ;;  %v1343_v27 = vrot.slane %v1341_v2, 1  ;;  %v1410_v6 = vsel %vm563_vm0, %v1408_v1, %v1409_v5 }
  0x9b   : > { %v1360_v0 = vrot.slane %v1358_v55, 1 }
  0x9c   : > { %v1344_v35 = vor.u32 %v1343_v27, %v1339_v25  ;;  %v1363_v27 = vshrl.u32 %v2797_v20, 16 }
  0x9d   : > { %v871_v11 = vpop.permute.xlu1 %870 }
  0x9e   : > { %v1349_v45 = vsel %vm450_vm1, %v1344_v35, %v1348_v37  ;;  %v843_v57 = vpop.permute.xlu2 %842 }
  0x9f   : > { %v831_v23 = vpop.permute.xlu0 %830  ;;  %1384 = vrot.lane.b32.xlu0 %v1349_v45, %s2347_s19  ;;  %v899_v19 = vsel %vm604_vm3, %v2521_v51, %v843_v57  ;;  %v1367_v51 = vrot.slane %v1365_v22, 1 }
  0xa0   : > { %v887_v32 = vsel %vm604_vm3, %v2454_v26, %v831_v23  ;;  %v1407_v26 = vsel %vm563_vm0, %v1405_v39, %v1406_v42  ;;  %v1372_v39 = vrot.slane %v1370_v28, 1 }
  0xa1   : > { %v2745_v33 = vsel %vm621_vm4, %v887_v32, %v871_v11  ;;  %1424 = vrot.lane.b32.xlu1 %v1407_v26, %s2346_s18  ;;  %v1368_v37 = vor.u32 %v1367_v51, %v1363_v27 }
  0xa2   : > { %2092 = vmatmul.msk.bf16.vlgmr.msra.gmra.mxu0 %vm926_vm5, %v2745_v33 }
  0xa3   : > { %v1373_v40 = vsel %vm450_vm1, %v1368_v37, %v1372_v39 }
  0xa5   : > { %v599_v46 = vpop.permute.xlu1 %598 }
  0xa6   : > { %v2757_v41 = vsel %vm621_vm4, %v616_v44, %v599_v46  ;;  %v1353_v44 = vshll.u32 %v2776_v62, 16 }
  0xa7   : > { %v841_v54 = vpop.permute.xlu0 %840  ;;  %2109 = vmatmul.msk.bf16.gmra.mxu3 %vm926_vm5, %v2757_v41  ;;  %1426 = vrot.lane.b32.xlu0 %v1410_v6, %s2346_s18 }
  0xa8   : > { %v897_v61 = vsel %vm604_vm3, %v2472_v50, %v841_v54  ;;  %v1351_v54 = vshrl.u32 %v2776_v62, 16 }
  0xa9   : > { %v2764_v38 = vsel %vm621_vm4, %v897_v61, %v881_v13  ;;  %1388 = vrot.lane.b32.xlu1 %v1373_v40, %s2347_s19  ;;  %v1355_v61 = vrot.slane %v1353_v44, 1 }
  0xaa   : > { %2097 = vmatmul.msk.bf16.gmra.mxu2 %vm926_vm5, %v2764_v38 }
  0xad   : > { %v591_v53 = vpop.permute.xlu1 %590 }
  0xaf   : > { %v550_v60 = vpop.permute.xlu0 %549 }
  0xb0   : > { %v608_v50 = vsel %vm604_vm3, %v2490_v10, %v550_v60  ;;  %v552_v10 = vpop.permute.xlu2 %551 }
  0xb1   : > { %v2779_v63 = vsel %vm621_vm4, %v608_v50, %v591_v53 }
  0xb2   : > { %2105 = vmatmul.msk.bf16.gmra.mxu1 %vm926_vm5, %v2779_v63 }
  0xb5   : > { %v560_v8 = vpop.permute.xlu1 %559 }
  0xb6   : > { %v618_v23 = vsel %vm604_vm3, %v2504_v29, %v560_v8  ;;  %v610_v29 = vsel %vm604_vm3, %v2537_v12, %v552_v10  ;;  %v1356_v12 = vor.u32 %v1355_v61, %v1351_v54  ;;  %v1412_v10 = vrot.slane %v1277_v24, 1 }
  0xb7   : > { %v873_v13 = vpop.permute.xlu0 %872 }
  0xb8   : > { %v2789_v14 = vsel %vm621_vm4, %v889_v7, %v873_v13  ;;  %v875_v35 = vpop.permute.xlu2 %874  ;;  %v1361_v53 = vsel %vm450_vm1, %v1356_v12, %v1360_v0 }
  0xb9   : > { %2093 = vmatmul.msk.bf16.gmra.mxu0 %vm926_vm5, %v2789_v14  ;;  %1386 = vrot.lane.b32.xlu2 %v1361_v53, %s2347_s19  ;;  %s1987_s19 = sshll.u32 %s3187_s28, 5 }
  0xbd   : > { %v883_v11 = vpop.permute.xlu1 %882 }
  0xbe   : > { %v2801_v2 = vsel %vm621_vm4, %v899_v19, %v883_v11 }
  0xbf   : > { %v601_v25 = vpop.permute.xlu0 %600  ;;  %2098 = vmatmul.msk.bf16.gmra.mxu2 %vm926_vm5, %v2801_v2 }
  0xc0   : > { %v2809_v32 = vsel %vm621_vm4, %v618_v23, %v601_v25  ;;  %v603_v57 = vpop.permute.xlu2 %602 }
  0xc1   : > { %2110 = vmatmul.msk.bf16.gmra.mxu3 %vm926_vm5, %v2809_v32 }
  0xc5   : > { %v835_v42 = vpop.permute.xlu1 %834 }
  0xc6   : > { %v891_v45 = vsel %vm604_vm3, %v2541_v16, %v835_v42 }
  0xc7   : > { %v593_v26 = vpop.permute.xlu0 %592  ;;  %v907_v46 = vsel %vm621_vm4, %v891_v45, %v875_v35 }
  0xc8   : > { %v627_v56 = vsel %vm621_vm4, %v610_v29, %v593_v26  ;;  %v595_v50 = vpop.permute.xlu2 %594 }
  0xc9   : > { %2094 = vmatmul.msk.bf16.gmra.mxu0 %vm926_vm5, %v907_v46  ;;  %2106 = vmatmul.msk.bf16.gmra.mxu1 %vm926_vm5, %v627_v56 }
  0xcd   : > { %v845_v16 = vpop.permute.xlu1 %844 }
  0xce   : > { %v901_v5 = vsel %vm604_vm3, %v2559_v43, %v845_v16 }
  0xcf   : > { %v562_v58 = vpop.permute.xlu0 %561 }
  0xd0   : > { %v620_v59 = vsel %vm604_vm3, %v2564_v48, %v562_v58  ;;  %v1411_v48 = vrot.slane %v2797_v20, 1  ;;  %v1375_v21 = vpop.permute.xlu2 %1374 }
  0xd1   : > { %v2830_v60 = vsel %vm621_vm4, %v620_v59, %v603_v57  ;;  %v1431_v11 = vsel %vm604_vm3, %v2607_v47, %v1375_v21 }
  0xd2   : > { %2111 = vmatmul.msk.bf16.gmra.mxu3 %vm926_vm5, %v2830_v60  ;;  %v1413_v13 = vsel %vm563_vm0, %v1411_v48, %v1412_v10 }
  0xd3   : > { %1428 = vrot.lane.b32.xlu2 %v1413_v13, %s2346_s18  ;;  %s1986_s18 = sshll.u32 %s3189_s17, 1 }
  0xd4   : > { %s342_s23 = sadd.s32 %s1987_s19, %s1986_s18 }
  0xd5   : > { %v554_v36 = vpop.permute.xlu1 %553  ;;  %s1988_s12 = sshll.u32 %s342_s23, 3  ;;  %s1992_s13 = sshll.u32 %s342_s23, 2 }
  0xd6   : > { %v612_v1 = vsel %vm604_vm3, %v2579_v4, %v554_v36  ;;  %s2999_s16 = scalar_lea.vmem %s3174_s7, %s1988_s12  ;;  %s3006_s19 = scalar_lea.vmem %s3175_s8, %s1992_s13 }
  0xd7   : > { %v885_v6 = vpop.permute.xlu0 %884  ;;  %v629_v7 = vsel %vm621_vm4, %v612_v1, %v595_v50 }
  0xd8   : > { %v2840_v8 = vsel %vm621_vm4, %v901_v5, %v885_v6  ;;  %v1417_v23 = vpop.permute.xlu2 %1416 }
  0xd9   : > { %2099 = vmatmul.msk.bf16.gmra.mxu2 %vm926_vm5, %v2840_v8  ;;  %2107 = vmatmul.msk.bf16.gmra.mxu1 %vm926_vm5, %v629_v7 }
  0xdd   : > { %v877_v4 = vpop.permute.xlu1 %876 }
  0xdf   : > { %v837_v43 = vpop.permute.xlu0 %836 }
  0xe0   : > { %v893_v17 = vsel %vm604_vm3, %v2596_v34, %v837_v43 }
  0xe1   : > { %v909_v19 = vsel %vm621_vm4, %v893_v17, %v877_v4 }
  0xe2   : > { %2095 = vmatmul.msk.bf16.gmra.mxu0 %vm926_vm5, %v909_v19  ;;  %2130 = vmatmul.msk.bf16.vlgmr.msrb.gmra.mxu3 %vm926_vm5, %v2673_v18 }
  0xe5   : > { %v1377_v34 = vpop.permute.xlu1 %1376 }
  0xe6   : > { %v1433_v18 = vsel %vm604_vm3, %v2612_v52, %v1377_v34  ;;  %v1381_v52 = vpop.permute.xlu2 %1380 }
  0xe7   : > { %v1415_v24 = vpop.permute.xlu0 %1414  ;;  %v1449_v47 = vsel %vm621_vm4, %v1433_v18, %v1417_v23 }
  0xe8   : > { %v1447_v22 = vsel %vm621_vm4, %v1431_v11, %v1415_v24 }
  0xe9   : > { %2118 = vmatmul.msk.bf16.vlgmr.msrb.gmra.mxu2 %vm926_vm5, %v2745_v33  ;;  %2216 = vmatmul.msk.bf16.vlgmr.msrb.gmra.mxu1 %vm926_vm5, %v1447_v22 }
  0xed   : > { %v1419_v25 = vpop.permute.xlu1 %1418 }
  0xee   : > { %v1423_v42 = vpop.permute.xlu2 %1422 }
  0xef   : > { %v1379_v33 = vpop.permute.xlu0 %1378 }
  0xf2   : > { %2131 = vmatmul.msk.bf16.gmra.mxu3 %vm926_vm5, %v2779_v63  ;;  %2202 = vmatmul.msk.bf16.vlgmr.msrb.gmra.mxu0 %vm926_vm5, %v1447_v22  ;;  %v1435_v63 = vsel %vm604_vm3, %v2637_v30, %v1379_v33 }
  0xf3   : > { %v1451_v27 = vsel %vm621_vm4, %v1435_v63, %v1419_v25 }
  0xf5   : > { %v1383_v39 = vpop.permute.xlu1 %1382 }
  0xf6   : > { %v1439_v29 = vsel %vm604_vm3, %v2694_v31, %v1383_v39  ;;  %v2985_v39 = vld [vmem:[%s3173_s6] ss:$0 sm:$0xff] }
  0xf7   : > { %v1421_v51 = vpop.permute.xlu0 %1420  ;;  %v1455_v26 = vsel %vm621_vm4, %v1439_v29, %v1423_v42  ;;  %v2990_v42 = vld [vmem:[%s3170_s3] ss:$0 sm:$0xff] }
  0xf9   : > { %2119 = vmatmul.msk.bf16.gmra.mxu2 %vm926_vm5, %v2789_v14  ;;  %2217 = vmatmul.msk.bf16.gmra.mxu1 %vm926_vm5, %v1449_v47  ;;  %v1437_v14 = vsel %vm604_vm3, %v2667_v9, %v1381_v52  ;;  %v2973_v52 = vld [vmem:[%s3172_s5] ss:$0 sm:$0xff] }
  0xfa   : > { %v1453_v28 = vsel %vm621_vm4, %v1437_v14, %v1421_v51 }
  0xfe   : > { %v2885_v40 = vpop.f32.mrf.mxu1 }
 0x102   : > { %2132 = vmatmul.msk.bf16.gmra.mxu3 %vm926_vm5, %v627_v56  ;;  %2203 = vmatmul.msk.bf16.gmra.mxu0 %vm926_vm5, %v1449_v47 }
 0x106   : > { %v2900_v54 = vpop.f32.mrf.mxu1 }
 0x109   : > { %2120 = vmatmul.msk.bf16.gmra.mxu2 %vm926_vm5, %v907_v46  ;;  %2218 = vmatmul.msk.bf16.gmra.mxu1 %vm926_vm5, %v1451_v27 }
 0x111   : > { %v1385_v31 = vpop.permute.xlu0 %1384 }
 0x112   : > { %2133 = vmatmul.msk.bf16.gmra.mxu3 %vm926_vm5, %v629_v7  ;;  %2204 = vmatmul.msk.bf16.gmra.mxu0 %vm926_vm5, %v1451_v27  ;;  %v1441_v12 = vsel %vm604_vm3, %v2737_v15, %v1385_v31 }
 0x113   : > { %v1387_v50 = vpop.permute.xlu2 %1386 }
 0x114   : > { %v1443_v1 = vsel %vm604_vm3, %v2776_v62, %v1387_v50 }
 0x115   : > { %v1049_v35 = vpop.f32.mrf.mxu3 }
 0x119   : > { %2121 = vmatmul.msk.bf16.gmra.mxu2 %vm926_vm5, %v909_v19  ;;  %2219 = vmatmul.msk.bf16.gmra.mxu1 %vm926_vm5, %v1453_v28  ;;  %v1427_v5 = vpop.permute.xlu0 %1426 }
 0x11a   : > { %v1459_v48 = vsel %vm621_vm4, %v1443_v1, %v1427_v5 }
 0x11d   : > { %v976_v30 = vpop.f32.mrf.mxu2  ;;  %v1051_v9 = vpop.f32.mrf.mxu3 }
 0x11e   : > { %v2883_v37 = vadd.f32 %v1049_v35, %v976_v30  ;;  %v2980_v35 = vld [vmem:[%s3169_s2] ss:$0 sm:$0xff] }
 0x11f   : > { %v2895_v46 = vpop.f32.mrf.mxu0 }
 0x120   : > { %v1030_v51 = vadd.f32 %v2885_v40, %v2895_v46 }
 0x122   : > { %2134 = vmatmul.msk.bf16.gmra.mxu3 %vm926_vm5, %v2711_v49  ;;  %2205 = vmatmul.msk.bf16.gmra.mxu0 %vm926_vm5, %v1453_v28 }
 0x125   : > { %v978_v44 = vpop.f32.mrf.mxu2 }
 0x126   : > { %v2892_v45 = vadd.f32 %v1051_v9, %v978_v44 }
 0x127   : > { %v2904_v56 = vpop.f32.mrf.mxu0 }
 0x129   : > { %2122 = vmatmul.msk.bf16.gmra.mxu2 %vm926_vm5, %v2730_v3  ;;  %2220 = vmatmul.msk.bf16.gmra.mxu1 %vm926_vm5, %v1455_v26  ;;  %v1425_v3 = vpop.permute.xlu1 %1424 }
 0x12a   : > { %v1054_v49 = vpop.f32.mrf.mxu3  ;;  %v1457_v58 = vsel %vm621_vm4, %v1441_v12, %v1425_v3  ;;  %v1032_v3 = vadd.f32 %v2900_v54, %v2904_v56 }
 0x12d   : > { %v981_v61 = vpop.f32.mrf.mxu2  ;;  %v1429_v17 = vpop.permute.xlu2 %1428 }
 0x12e   : > { %v2902_v55 = vadd.f32 %v1054_v49, %v981_v61 }
 0x12f   : > { %v2911_v0 = vpop.f32.mrf.mxu1 }
 0x131   : > { %v1389_v43 = vpop.permute.xlu1 %1388 }
 0x132   : > { %2135 = vmatmul.msk.bf16.gmra.mxu3 %vm926_vm5, %v2757_v41  ;;  %2206 = vmatmul.msk.bf16.gmra.mxu0 %vm926_vm5, %v1455_v26  ;;  %v1056_v57 = vpop.f32.mrf.mxu3 }
 0x135   : > { %v983_v53 = vpop.f32.mrf.mxu2 }
 0x136   : > { %v2913_v16 = vadd.f32 %v1056_v57, %v983_v53  ;;  %v2916_v59 = vpop.f32.mrf.mxu0 }
 0x137   : > { %v2921_v41 = vpop.f32.mrf.mxu1 }
 0x139   : > { %2123 = vmatmul.msk.bf16.gmra.mxu2 %vm926_vm5, %v2764_v38  ;;  %2221 = vmatmul.msk.bf16.gmra.mxu1 %vm926_vm5, %v1457_v58 }
 0x13e   : > { %v2926_v36 = vpop.f32.mrf.mxu0 }
 0x142   : > { %v986_v15 = vpop.f32.mrf.mxu2  ;;  %2136 = vmatmul.msk.bf16.gmra.mxu3 %vm926_vm5, %v2809_v32  ;;  %2207 = vmatmul.msk.bf16.gmra.mxu0 %vm926_vm5, %v1457_v58 }
 0x144   : > { %v1059_v6 = vpop.f32.mrf.mxu3 }
 0x145   : > { %v2930_v7 = vadd.f32 %v1059_v6, %v986_v15 }
 0x146   : > { %v2932_v38 = vpop.f32.mrf.mxu1  ;;  %v2938_v13 = vpop.f32.mrf.mxu0 }
 0x149   : > { %2124 = vmatmul.msk.bf16.gmra.mxu2 %vm926_vm5, %v2801_v2  ;;  %2222 = vmatmul.msk.bf16.gmra.mxu1 %vm926_vm5, %v1459_v48  ;;  %v1445_v2 = vsel %vm604_vm3, %v2797_v20, %v1389_v43 }
 0x14a   : > { %v988_v32 = vpop.f32.mrf.mxu2  ;;  %v1461_v11 = vsel %vm621_vm4, %v1445_v2, %v1429_v17  ;;  %v1035_v17 = vadd.f32 %v2911_v0, %v2916_v59 }
 0x14c   : > { %v1061_v10 = vpop.f32.mrf.mxu3 }
 0x14d   : > { %v2940_v4 = vadd.f32 %v1061_v10, %v988_v32 }
 0x14e   : > { %v2942_v62 = vpop.f32.mrf.mxu1  ;;  %v2952_v24 = vpop.f32.mrf.mxu0 }
 0x152   : > { %2137 = vmatmul.msk.bf16.gmra.mxu3 %vm926_vm5, %v2830_v60  ;;  %2208 = vmatmul.msk.bf16.gmra.mxu0 %vm926_vm5, %v1459_v48 }
 0x155   : > { %v1064_v19 = vpop.f32.mrf.mxu3 }
 0x156   : > { %v2949_v21 = vpop.f32.mrf.mxu1 }
 0x159   : > { %2125 = vmatmul.msk.bf16.gmra.mxu2 %vm926_vm5, %v2840_v8  ;;  %2223 = vmatmul.msk.bf16.gmra.mxu1 %vm926_vm5, %v1461_v11 }
 0x15c   : > { %v991_v60 = vpop.f32.mrf.mxu2 }
 0x15d   : > { %v2957_v22 = vadd.f32 %v1064_v19, %v991_v60  ;;  %v1066_v34 = vpop.f32.mrf.mxu3 }
 0x15e   : > { %v2959_v18 = vpop.f32.mrf.mxu1 }
 0x15f   : > { %v2961_v20 = vpop.f32.mrf.mxu0 }
 0x162   : > { %2209 = vmatmul.msk.bf16.gmra.mxu0 %vm926_vm5, %v1461_v11 }
 0x164   : > { %v993_v23 = vpop.f32.mrf.mxu2 }
 0x165   : > { %v2965_v47 = vadd.f32 %v1066_v34, %v993_v23  ;;  %v1146_v33 = vpop.f32.mrf.mxu3 }
 0x166   : > { %v1574_v8 = vpop.f32.mrf.mxu1 }
 0x167   : > { %v2967_v63 = vpop.f32.mrf.mxu0 }
 0x16c   : > { %v1089_v25 = vpop.f32.mrf.mxu2 }
 0x16d   : > { %v1147_v27 = vadd.f32 %v1146_v33, %v1089_v25  ;;  %v1148_v14 = vpop.f32.mrf.mxu3 }
 0x16e   : > { %v1576_v28 = vpop.f32.mrf.mxu1 }
 0x16f   : > { %v1614_v30 = vadd.f32 %v1574_v8, %v1147_v27  ;;  %v1498_v9 = vpop.f32.mrf.mxu0 }
 0x170   : > { %v1538_v29 = vadd.f32 %v1498_v9, %v1030_v51  ;;  %v1037_v9 = vadd.f32 %v2921_v41, %v2926_v36 }
 0x171   : > { %v1706_v40 = vmul.f32 %v2973_v52, %v1614_v30 }
 0x172   : > { %v1634_v44 = vmul.f32 %v2980_v35, %v1538_v29 }
 0x173   : > { %v1726_v26 = vadd.f32 %v2985_v39, %v1706_v40 }
 0x174   : > { %v1654_v46 = vadd.f32 %v2990_v42, %v1634_v44  ;;  %v1091_v49 = vpop.f32.mrf.mxu2 }
 0x175   : > { %vm1742_vm6 = vcmp.gt.f32.partialorder %v1726_v26, 0.0  ;;  %v1758_v61 = vmul.f32 0.1, %v1726_v26  ;;  %v1149_v31 = vadd.f32 %v1148_v14, %v1091_v49  ;;  %v1151_v12 = vpop.f32.mrf.mxu3 }
 0x176   : > { %v1670_v57 = vmax.f32 %v1654_v46, 0.0  ;;  %v1579_v53 = vpop.f32.mrf.mxu1 }
 0x177   : > { %v1774_v58 = vsel %vm1742_vm6, %v1726_v26, %v1758_v61  ;;  %v1615_v50 = vadd.f32 %v1576_v28, %v1149_v31  ;;  %v1500_v15 = vpop.f32.mrf.mxu0 }
 0x178   : > { %v1790_v1 = vpack.c.bf16 %v1774_v58, %v1774_v58  ;;  %1686 = vst.msk [vmem:[%s2999_s16] sm:$0xff] %vm604_vm3, %v1670_v57  ;;  %v1539_v5 = vadd.f32 %v1500_v15, %v1032_v3 }
 0x179   : > { %v1707_v6 = vmul.f32 %v2973_v52, %v1615_v50  ;;  %v1040_v50 = vadd.f32 %v2932_v38, %v2938_v13 }
 0x17a   : > { %1807 = vst.msk [vmem:[%s3006_s19] sm:$0xf] %vm1806_vm7, %v1790_v1  ;;  %v1635_v54 = vmul.f32 %v2980_v35, %v1539_v5 }
 0x17b   : > { %v1727_v56 = vadd.f32 %v2985_v39, %v1707_v6 }
 0x17c   : > { %v1655_v48 = vadd.f32 %v2990_v42, %v1635_v54  ;;  %v1094_v32 = vpop.f32.mrf.mxu2 }
 0x17d   : > { %vm1743_vm8 = vcmp.gt.f32.partialorder %v1727_v56, 0.0  ;;  %v1759_v10 = vmul.f32 0.1, %v1727_v56  ;;  %v1152_v43 = vadd.f32 %v1151_v12, %v1094_v32  ;;  %v1153_v2 = vpop.f32.mrf.mxu3 }
 0x17e   : > { %v1671_v19 = vmax.f32 %v1655_v48, 0.0  ;;  %v1581_v11 = vpop.f32.mrf.mxu1 }
 0x17f   : > { %v1775_v60 = vsel %vm1743_vm8, %v1727_v56, %v1759_v10  ;;  %v1616_v34 = vadd.f32 %v1579_v53, %v1152_v43  ;;  %v1503_v23 = vpop.f32.mrf.mxu0 }
 0x180   : > { %v1791_v33 = vpack.c.bf16 %v1775_v60, %v1775_v60  ;;  %1687 = vst.msk [vmem:[%s2999_s16 + $0x8] sm:$0xff] %vm604_vm3, %v1671_v19  ;;  %v1540_v8 = vadd.f32 %v1503_v23, %v1035_v17 }
 0x181   : > { %v1708_v25 = vmul.f32 %v2973_v52, %v1616_v34 }
 0x182   : > { %1808 = vst.msk [vmem:[%s3006_s19 + $0x4] sm:$0xf] %vm1806_vm7, %v1791_v33  ;;  %v1636_v27 = vmul.f32 %v2980_v35, %v1540_v8 }
 0x183   : > { %v1728_v14 = vadd.f32 %v2985_v39, %v1708_v25 }
 0x184   : > { %v1656_v0 = vadd.f32 %v2990_v42, %v1636_v27  ;;  %v1096_v59 = vpop.f32.mrf.mxu2 }
 0x185   : > { %vm1744_vm9 = vcmp.gt.f32.partialorder %v1728_v14, 0.0  ;;  %v1760_v51 = vmul.f32 0.1, %v1728_v14  ;;  %v1154_v28 = vadd.f32 %v1153_v2, %v1096_v59  ;;  %v1156_v30 = vpop.f32.mrf.mxu3 }
 0x186   : > { %v1672_v29 = vmax.f32 %v1656_v0, 0.0  ;;  %v1584_v40 = vpop.f32.mrf.mxu1 }
 0x187   : > { %v1776_v44 = vsel %vm1744_vm9, %v1728_v14, %v1760_v51  ;;  %v1617_v26 = vadd.f32 %v1581_v11, %v1154_v28  ;;  %v1505_v46 = vpop.f32.mrf.mxu0  ;;  %v1042_v11 = vadd.f32 %v2942_v62, %v2952_v24 }
 0x188   : > { %v1792_v49 = vpack.c.bf16 %v1776_v44, %v1776_v44  ;;  %1688 = vst.msk [vmem:[%s2999_s16 + $0x10] sm:$0xff] %vm604_vm3, %v1672_v29  ;;  %v1541_v61 = vadd.f32 %v1505_v46, %v1037_v9  ;;  %v1045_v9 = vadd.f32 %v2949_v21, %v2961_v20 }
 0x189   : > { %v1709_v31 = vmul.f32 %v2973_v52, %v1617_v26 }
 0x18a   : > { %1809 = vst.msk [vmem:[%s3006_s19 + $0x8] sm:$0xf] %vm1806_vm7, %v1792_v49  ;;  %v1637_v12 = vmul.f32 %v2980_v35, %v1541_v61 }
 0x18b   : > { %v1729_v3 = vadd.f32 %v2985_v39, %v1709_v31 }
 0x18c   : > { %v1657_v41 = vadd.f32 %v2990_v42, %v1637_v12  ;;  %v1099_v36 = vpop.f32.mrf.mxu2 }
 0x18d   : > { %vm1745_vm10 = vcmp.gt.f32.partialorder %v1729_v3, 0.0  ;;  %v1761_v57 = vmul.f32 0.1, %v1729_v3  ;;  %v1157_v53 = vadd.f32 %v1156_v30, %v1099_v36  ;;  %v1158_v58 = vpop.f32.mrf.mxu3 }
 0x18e   : > { %v1673_v15 = vmax.f32 %v1657_v41, 0.0  ;;  %v1586_v1 = vpop.f32.mrf.mxu1 }
 0x18f   : > { %v1777_v5 = vsel %vm1745_vm10, %v1729_v3, %v1761_v57  ;;  %v1618_v6 = vadd.f32 %v1584_v40, %v1157_v53  ;;  %v1508_v54 = vpop.f32.mrf.mxu0  ;;  %v1047_v53 = vadd.f32 %v2959_v18, %v2967_v63 }
 0x190   : > { %v1793_v56 = vpack.c.bf16 %v1777_v5, %v1777_v5  ;;  %1689 = vst.msk [vmem:[%s2999_s16 + $0x18] sm:$0xff] %vm604_vm3, %v1673_v15  ;;  %v1542_v48 = vadd.f32 %v1508_v54, %v1040_v50 }
 0x191   : > { %v1710_v32 = vmul.f32 %v2973_v52, %v1618_v6 }
 0x192   : > { %1810 = vst.msk [vmem:[%s3006_s19 + $0xc] sm:$0xf] %vm1806_vm7, %v1793_v56  ;;  %v1638_v10 = vmul.f32 %v2980_v35, %v1542_v48 }
 0x193   : > { %v1730_v43 = vadd.f32 %v2985_v39, %v1710_v32 }
 0x194   : > { %v1658_v38 = vadd.f32 %v2990_v42, %v1638_v10  ;;  %v1101_v13 = vpop.f32.mrf.mxu2 }
 0x195   : > { %vm1746_vm11 = vcmp.gt.f32.partialorder %v1730_v43, 0.0  ;;  %v1762_v2 = vmul.f32 0.1, %v1730_v43  ;;  %v1159_v17 = vadd.f32 %v1158_v58, %v1101_v13  ;;  %v1161_v19 = vpop.f32.mrf.mxu3 }
 0x196   : > { %v1674_v60 = vmax.f32 %v1658_v38, 0.0  ;;  %v1589_v34 = vpop.f32.mrf.mxu1 }
 0x197   : > { %v1778_v23 = vsel %vm1746_vm11, %v1730_v43, %v1762_v2  ;;  %v1619_v33 = vadd.f32 %v1586_v1, %v1159_v17  ;;  %v1510_v8 = vpop.f32.mrf.mxu0 }
 0x198   : > { %v1794_v25 = vpack.c.bf16 %v1778_v23, %v1778_v23  ;;  %1690 = vst.msk [vmem:[%s2999_s16 + $0x20] sm:$0xff] %vm604_vm3, %v1674_v60  ;;  %v1543_v27 = vadd.f32 %v1510_v8, %v1042_v11 }
 0x199   : > { %v1711_v14 = vmul.f32 %v2973_v52, %v1619_v33 }
 0x19a   : > { %1811 = vst.msk [vmem:[%s3006_s19 + $0x10] sm:$0xf] %vm1806_vm7, %v1794_v25  ;;  %v1639_v0 = vmul.f32 %v2980_v35, %v1543_v27 }
 0x19b   : > { %v1731_v59 = vadd.f32 %v2985_v39, %v1711_v14 }
 0x19c   : > { %v1659_v62 = vadd.f32 %v2990_v42, %v1639_v0  ;;  %v1104_v24 = vpop.f32.mrf.mxu2 }
 0x19d   : > { %vm1747_vm12 = vcmp.gt.f32.partialorder %v1731_v59, 0.0  ;;  %v1763_v51 = vmul.f32 0.1, %v1731_v59  ;;  %v1162_v28 = vadd.f32 %v1161_v19, %v1104_v24  ;;  %v1163_v30 = vpop.f32.mrf.mxu3 }
 0x19e   : > { %v1675_v29 = vmax.f32 %v1659_v62, 0.0  ;;  %v1591_v40 = vpop.f32.mrf.mxu1 }
 0x19f   : > { %v1779_v44 = vsel %vm1747_vm12, %v1731_v59, %v1763_v51  ;;  %v1620_v26 = vadd.f32 %v1589_v34, %v1162_v28  ;;  %v1513_v46 = vpop.f32.mrf.mxu0 }
 0x1a0   : > { %v1795_v49 = vpack.c.bf16 %v1779_v44, %v1779_v44  ;;  %1691 = vst.msk [vmem:[%s2999_s16 + $0x28] sm:$0xff] %vm604_vm3, %v1675_v29  ;;  %v1544_v61 = vadd.f32 %v1513_v46, %v1045_v9 }
 0x1a1   : > { %v1712_v31 = vmul.f32 %v2973_v52, %v1620_v26 }
 0x1a2   : > { %1812 = vst.msk [vmem:[%s3006_s19 + $0x14] sm:$0xf] %vm1806_vm7, %v1795_v49  ;;  %v1640_v12 = vmul.f32 %v2980_v35, %v1544_v61 }
 0x1a3   : > { %v1732_v3 = vadd.f32 %v2985_v39, %v1712_v31 }
 0x1a4   : > { %v1660_v21 = vadd.f32 %v2990_v42, %v1640_v12  ;;  %v1106_v20 = vpop.f32.mrf.mxu2 }
 0x1a5   : > { %vm1748_vm13 = vcmp.gt.f32.partialorder %v1732_v3, 0.0  ;;  %v1764_v41 = vmul.f32 0.1, %v1732_v3  ;;  %v1164_v36 = vadd.f32 %v1163_v30, %v1106_v20  ;;  %v1166_v57 = vpop.f32.mrf.mxu3 }
 0x1a6   : > { %v1676_v58 = vmax.f32 %v1660_v21, 0.0  ;;  %v1594_v50 = vpop.f32.mrf.mxu1 }
 0x1a7   : > { %v1780_v15 = vsel %vm1748_vm13, %v1732_v3, %v1764_v41  ;;  %v1621_v1 = vadd.f32 %v1591_v40, %v1164_v36  ;;  %v1515_v5 = vpop.f32.mrf.mxu0 }
 0x1a8   : > { %v1796_v6 = vpack.c.bf16 %v1780_v15, %v1780_v15  ;;  %1692 = vst.msk [vmem:[%s2999_s16 + $0x30] sm:$0xff] %vm604_vm3, %v1676_v58  ;;  %v1545_v54 = vadd.f32 %v1515_v5, %v1047_v53 }
 0x1a9   : > { %v1713_v56 = vmul.f32 %v2973_v52, %v1621_v1 }
 0x1aa   : > { %1813 = vst.msk [vmem:[%s3006_s19 + $0x18] sm:$0xf] %vm1806_vm7, %v1796_v6  ;;  %v1641_v48 = vmul.f32 %v2980_v35, %v1545_v54 }
 0x1ab   : > { %v1733_v32 = vadd.f32 %v2985_v39, %v1713_v56 }
 0x1ac   : > { %v1661_v18 = vadd.f32 %v2990_v42, %v1641_v48  ;;  %v1109_v63 = vpop.f32.mrf.mxu2 }
 0x1ad   : > { %vm1749_vm14 = vcmp.gt.f32.partialorder %v1733_v32, 0.0  ;;  %v1765_v10 = vmul.f32 0.1, %v1733_v32  ;;  %v1167_v43 = vadd.f32 %v1166_v57, %v1109_v63  ;;  %v1168_v38 = vpop.f32.mrf.mxu3 }
 0x1ae   : > { %v1677_v13 = vmax.f32 %v1661_v18, 0.0  ;;  %v1596_v2 = vpop.f32.mrf.mxu1 }
 0x1af   : > { %v1781_v17 = vsel %vm1749_vm14, %v1733_v32, %v1765_v10  ;;  %v1622_v19 = vadd.f32 %v1594_v50, %v1167_v43  ;;  %v1518_v11 = vpop.f32.mrf.mxu0 }
 0x1b0   : > { %v1797_v60 = vpack.c.bf16 %v1781_v17, %v1781_v17  ;;  %1693 = vst.msk [vmem:[%s2999_s16 + $0x38] sm:$0xff] %vm604_vm3, %v1677_v13  ;;  %v1546_v34 = vadd.f32 %v1518_v11, %v2883_v37 }
 0x1b1   : > { %v1714_v23 = vmul.f32 %v2973_v52, %v1622_v19 }
 0x1b2   : > { %1814 = vst.msk [vmem:[%s3006_s19 + $0x1c] sm:$0xf] %vm1806_vm7, %v1797_v60  ;;  %v1642_v33 = vmul.f32 %v2980_v35, %v1546_v34 }
 0x1b3   : > { %v1734_v8 = vadd.f32 %v2985_v39, %v1714_v23 }
 0x1b4   : > { %v1662_v25 = vadd.f32 %v2990_v42, %v1642_v33  ;;  %v1111_v27 = vpop.f32.mrf.mxu2 }
 0x1b5   : > { %vm1750_vm15 = vcmp.gt.f32.partialorder %v1734_v8, 0.0  ;;  %v1766_v14 = vmul.f32 0.1, %v1734_v8  ;;  %v1169_v0 = vadd.f32 %v1168_v38, %v1111_v27  ;;  %v1171_v59 = vpop.f32.mrf.mxu3 }
 0x1b6   : > { %v1678_v62 = vmax.f32 %v1662_v25, 0.0  ;;  %v1599_v24 = vpop.f32.mrf.mxu1 }
 0x1b7   : > { %v1782_v37 = vsel %vm1750_vm15, %v1734_v8, %v1766_v14  ;;  %v1623_v51 = vadd.f32 %v1596_v2, %v1169_v0  ;;  %v1520_v28 = vpop.f32.mrf.mxu0 }
 0x1b8   : > { %v1798_v30 = vpack.c.bf16 %v1782_v37, %v1782_v37  ;;  %1694 = vst.msk [vmem:[%s2999_s16 + $0x40] sm:$0xff] %vm604_vm3, %v1678_v62  ;;  %v1547_v9 = vadd.f32 %v1520_v28, %v2892_v45 }
 0x1b9   : > { %v1715_v29 = vmul.f32 %v2973_v52, %v1623_v51 }
 0x1ba   : > { %1815 = vst.msk [vmem:[%s3006_s19 + $0x20] sm:$0xf] %vm1806_vm7, %v1798_v30  ;;  %v1643_v40 = vmul.f32 %v2980_v35, %v1547_v9 }
 0x1bb   : > { %v1735_v44 = vadd.f32 %v2985_v39, %v1715_v29 }
 0x1bc   : > { %v1663_v26 = vadd.f32 %v2990_v42, %v1643_v40  ;;  %v1114_v46 = vpop.f32.mrf.mxu2 }
 0x1bd   : > { %vm1751_vm0 = vcmp.gt.f32.partialorder %v1735_v44, 0.0  ;;  %v1767_v49 = vmul.f32 0.1, %v1735_v44  ;;  %v1172_v61 = vadd.f32 %v1171_v59, %v1114_v46  ;;  %v1173_v31 = vpop.f32.mrf.mxu3 }
 0x1be   : > { %v1679_v12 = vmax.f32 %v1663_v26, 0.0  ;;  %v1601_v3 = vpop.f32.mrf.mxu1 }
 0x1bf   : > { %v1783_v45 = vsel %vm1751_vm0, %v1735_v44, %v1767_v49  ;;  %v1624_v21 = vadd.f32 %v1599_v24, %v1172_v61  ;;  %v1523_v20 = vpop.f32.mrf.mxu0 }
 0x1c0   : > { %v1799_v41 = vpack.c.bf16 %v1783_v45, %v1783_v45  ;;  %1695 = vst.msk [vmem:[%s2999_s16 + $0x48] sm:$0xff] %vm604_vm3, %v1679_v12  ;;  %v1548_v36 = vadd.f32 %v1523_v20, %v2902_v55 }
 0x1c1   : > { %v1716_v57 = vmul.f32 %v2973_v52, %v1624_v21 }
 0x1c2   : > { %1816 = vst.msk [vmem:[%s3006_s19 + $0x24] sm:$0xf] %vm1806_vm7, %v1799_v41  ;;  %v1644_v53 = vmul.f32 %v2980_v35, %v1548_v36 }
 0x1c3   : > { %v1736_v58 = vadd.f32 %v2985_v39, %v1716_v57 }
 0x1c4   : > { %v1664_v50 = vadd.f32 %v2990_v42, %v1644_v53  ;;  %v1116_v15 = vpop.f32.mrf.mxu2 }
 0x1c5   : > { %vm1752_vm1 = vcmp.gt.f32.partialorder %v1736_v58, 0.0  ;;  %v1768_v1 = vmul.f32 0.1, %v1736_v58  ;;  %v1174_v5 = vadd.f32 %v1173_v31, %v1116_v15  ;;  %v1176_v54 = vpop.f32.mrf.mxu3 }
 0x1c6   : > { %v1680_v6 = vmax.f32 %v1664_v50, 0.0  ;;  %v1604_v18 = vpop.f32.mrf.mxu1 }
 0x1c7   : > { %v1784_v56 = vsel %vm1752_vm1, %v1736_v58, %v1768_v1  ;;  %v1625_v55 = vadd.f32 %v1601_v3, %v1174_v5  ;;  %v1525_v48 = vpop.f32.mrf.mxu0 }
 0x1c8   : > { %v1800_v32 = vpack.c.bf16 %v1784_v56, %v1784_v56  ;;  %1696 = vst.msk [vmem:[%s2999_s16 + $0x50] sm:$0xff] %vm604_vm3, %v1680_v6  ;;  %v1549_v63 = vadd.f32 %v1525_v48, %v2913_v16 }
 0x1c9   : > { %v1717_v10 = vmul.f32 %v2973_v52, %v1625_v55 }
 0x1ca   : > { %1817 = vst.msk [vmem:[%s3006_s19 + $0x28] sm:$0xf] %vm1806_vm7, %v1800_v32  ;;  %v1645_v43 = vmul.f32 %v2980_v35, %v1549_v63 }
 0x1cb   : > { %v1737_v38 = vadd.f32 %v2985_v39, %v1717_v10 }
 0x1cc   : > { %v1665_v13 = vadd.f32 %v2990_v42, %v1645_v43  ;;  %v1119_v2 = vpop.f32.mrf.mxu2 }
 0x1cd   : > { %vm1753_vm2 = vcmp.gt.f32.partialorder %v1737_v38, 0.0  ;;  %v1769_v17 = vmul.f32 0.1, %v1737_v38  ;;  %v1177_v19 = vadd.f32 %v1176_v54, %v1119_v2  ;;  %v1178_v33 = vpop.f32.mrf.mxu3 }
 0x1ce   : > { %v1681_v11 = vmax.f32 %v1665_v13, 0.0  ;;  %v1606_v27 = vpop.f32.mrf.mxu1 }
 0x1cf   : > { %v1785_v60 = vsel %vm1753_vm2, %v1737_v38, %v1769_v17  ;;  %v1626_v34 = vadd.f32 %v1604_v18, %v1177_v19  ;;  %v1528_v23 = vpop.f32.mrf.mxu0 }
 0x1d0   : > { %v1801_v16 = vpack.c.bf16 %v1785_v60, %v1785_v60  ;;  %1697 = vst.msk [vmem:[%s2999_s16 + $0x58] sm:$0xff] %vm604_vm3, %v1681_v11  ;;  %v1550_v8 = vadd.f32 %v1528_v23, %v2930_v7 }
 0x1d1   : > { %v1718_v25 = vmul.f32 %v2973_v52, %v1626_v34 }
 0x1d2   : > { %1818 = vst.msk [vmem:[%s3006_s19 + $0x2c] sm:$0xf] %vm1806_vm7, %v1801_v16  ;;  %v1646_v14 = vmul.f32 %v2980_v35, %v1550_v8 }
 0x1d3   : > { %v1738_v0 = vadd.f32 %v2985_v39, %v1718_v25 }
 0x1d4   : > { %v1666_v59 = vadd.f32 %v2990_v42, %v1646_v14  ;;  %v1121_v62 = vpop.f32.mrf.mxu2 }
 0x1d5   : > { %vm1754_vm4 = vcmp.gt.f32.partialorder %v1738_v0, 0.0  ;;  %v1770_v24 = vmul.f32 0.1, %v1738_v0  ;;  %v1179_v37 = vadd.f32 %v1178_v33, %v1121_v62  ;;  %v1181_v44 = vpop.f32.mrf.mxu3 }
 0x1d6   : > { %v1682_v51 = vmax.f32 %v1666_v59, 0.0  ;;  %v1609_v49 = vpop.f32.mrf.mxu1 }
 0x1d7   : > { %v1786_v28 = vsel %vm1754_vm4, %v1738_v0, %v1770_v24  ;;  %v1627_v7 = vadd.f32 %v1606_v27, %v1179_v37  ;;  %v1530_v30 = vpop.f32.mrf.mxu0 }
 0x1d8   : > { %v1802_v9 = vpack.c.bf16 %v1786_v28, %v1786_v28  ;;  %1698 = vst.msk [vmem:[%s2999_s16 + $0x60] sm:$0xff] %vm604_vm3, %v1682_v51  ;;  %v1551_v29 = vadd.f32 %v1530_v30, %v2940_v4 }
 0x1d9   : > { %v1719_v40 = vmul.f32 %v2973_v52, %v1627_v7 }
 0x1da   : > { %1819 = vst.msk [vmem:[%s3006_s19 + $0x30] sm:$0xf] %vm1806_vm7, %v1802_v9  ;;  %v1647_v26 = vmul.f32 %v2980_v35, %v1551_v29 }
 0x1db   : > { %v1739_v46 = vadd.f32 %v2985_v39, %v1719_v40 }
 0x1dc   : > { %v1667_v61 = vadd.f32 %v2990_v42, %v1647_v26  ;;  %v1124_v31 = vpop.f32.mrf.mxu2 }
 0x1dd   : > { %vm1755_vm5 = vcmp.gt.f32.partialorder %v1739_v46, 0.0  ;;  %v1771_v12 = vmul.f32 0.1, %v1739_v46  ;;  %v1182_v3 = vadd.f32 %v1181_v44, %v1124_v31  ;;  %v1183_v50 = vpop.f32.mrf.mxu3 }
 0x1de   : > { %v1683_v45 = vmax.f32 %v1667_v61, 0.0  ;;  %v1611_v54 = vpop.f32.mrf.mxu1 }
 0x1df   : > { %v1787_v4 = vsel %vm1755_vm5, %v1739_v46, %v1771_v12  ;;  %v1628_v21 = vadd.f32 %v1609_v49, %v1182_v3  ;;  %v1533_v20 = vpop.f32.mrf.mxu0 }
 0x1e0   : > { %v1803_v41 = vpack.c.bf16 %v1787_v4, %v1787_v4  ;;  %1699 = vst.msk [vmem:[%s2999_s16 + $0x68] sm:$0xff] %vm604_vm3, %v1683_v45  ;;  %v1552_v36 = vadd.f32 %v1533_v20, %v2957_v22 }
 0x1e1   : > { %v1720_v57 = vmul.f32 %v2973_v52, %v1628_v21 }
 0x1e2   : > { %1820 = vst.msk [vmem:[%s3006_s19 + $0x34] sm:$0xf] %vm1806_vm7, %v1803_v41  ;;  %v1648_v53 = vmul.f32 %v2980_v35, %v1552_v36 }
 0x1e3   : > { %v1740_v58 = vadd.f32 %v2985_v39, %v1720_v57 }
 0x1e4   : > { %v1668_v15 = vadd.f32 %v2990_v42, %v1648_v53  ;;  %v1126_v1 = vpop.f32.mrf.mxu2 }
 0x1e5   : > { %vm1756_vm6 = vcmp.gt.f32.partialorder %v1740_v58, 0.0  ;;  %v1772_v5 = vmul.f32 0.1, %v1740_v58  ;;  %v1184_v6 = vadd.f32 %v1183_v50, %v1126_v1 }
 0x1e6   : > { %v1684_v56 = vmax.f32 %v1668_v15, 0.0 }
 0x1e7   : > { %v1788_v22 = vsel %vm1756_vm6, %v1740_v58, %v1772_v5  ;;  %v1629_v55 = vadd.f32 %v1611_v54, %v1184_v6  ;;  %v1535_v48 = vpop.f32.mrf.mxu0 }
 0x1e8   : > { %v1804_v32 = vpack.c.bf16 %v1788_v22, %v1788_v22  ;;  %1700 = vst.msk [vmem:[%s2999_s16 + $0x70] sm:$0xff] %vm604_vm3, %v1684_v56  ;;  %v1553_v18 = vadd.f32 %v1535_v48, %v2965_v47 }
 0x1e9   : > { %v1721_v63 = vmul.f32 %v2973_v52, %v1629_v55 }
 0x1ea   : > { %1821 = vst.msk [vmem:[%s3006_s19 + $0x38] sm:$0xf] %vm1806_vm7, %v1804_v32  ;;  %v1649_v10 = vmul.f32 %v2980_v35, %v1553_v18 }
 0x1eb   : > { %v1741_v43 = vadd.f32 %v2985_v39, %v1721_v63 }
 0x1ec   : > { %v1669_v38 = vadd.f32 %v2990_v42, %v1649_v10 }
 0x1ed   : > { %vm1757_vm8 = vcmp.gt.f32.partialorder %v1741_v43, 0.0  ;;  %v1773_v13 = vmul.f32 0.1, %v1741_v43 }
 0x1ee   : > { %v1685_v2 = vmax.f32 %v1669_v38, 0.0 }
 0x1ef   : > { %v1789_v17 = vsel %vm1757_vm8, %v1741_v43, %v1773_v13 }
 0x1f0   : > { %v1805_v19 = vpack.c.bf16 %v1789_v17, %v1789_v17  ;;  %1701 = vst.msk [vmem:[%s2999_s16 + $0x78] sm:$0xff] %vm604_vm3, %v1685_v2 }
 0x1f2   : > { %1822 = vst.msk [vmem:[%s3006_s19 + $0x3c] sm:$0xf] %vm1806_vm7, %v1805_v19 }
 0x1f3 PF: > { %s19_s9 = sadd.s32 1, %s2344_s9   ;;  %s3176_s27 = smov %s2336_s29 }
 0x1f4   : > { %p16_p7 = scmp.ge.s32.totalorder %s19_s9, 6   ;;  %s3177_s28 = smov %s2340_s30 }
 0x1f5   : > { %s3178_s29 = smov %s3181_s10  ;;  %s3179_s30 = smov %s3185_s11 }
 0x1f6   :  { %18 = sbr.rel (!%p16_p7) target bundleno = 3 (0x3), region = 97 }

</bundles_post_ra>
